<compile_context>
chip_gen: v7x
topology: tpu7x:2x2x1
jax: 0.10.0
libtpu: 0.0.40
codegen_flags: <defaults>
</compile_context>

<pallas_src>
import numpy as np
import jax
import jax.numpy as jnp
from jax import lax
from jax.experimental import pallas as pl
from jax.experimental.pallas import tpu as pltpu


# ---------------------------------------------------------------------------
# Fused forward kernel
#
# Index conventions inside the kernel (per batch tile of `tb` images):
#   xs[c]      : (6*tb, 28)   rows (u, b) = image row 4u + c, lanes = width
#   pool1[s]   : (6*tb, 120)  rows (u, b) = pooled row r = 2u + s,
#                             lanes = (pooled col c in [0,12)) * 10 + channel
#   p2         : (4*tb, 80)   rows (t, b) = pooled row h3 = t,
#                             lanes = (pooled col w3 in [0,4)) * 20 + channel
#   out        : (tb, 10)     log-probabilities
# ---------------------------------------------------------------------------
def _fused_net_kernel(x_ref, t1_ref, b1_ref, t2_ref, b2_ref,
                      w1_ref, fb1_ref, w2_ref, fb2_ref, out_ref):
    tb = x_ref.shape[2]
    f32 = jnp.float32
    bf16 = jnp.bfloat16

    # Shifted input row slices: xs[c][(u, b), w] = x[b, 4u + c, w], u in [0,6).
    xs = []
    for c in range(8):
        m, q = c % 4, c // 4
        v = x_ref[m, q:q + 6, :, :]                      # (6, tb, 28)
        xs.append(v.reshape(6 * tb, 28).astype(bf16))

    t1 = [[t1_ref[cp, ki] for ki in range(5)] for cp in range(2)]  # (28, 120) bf16
    t2 = [[t2_ref[cp, ki] for ki in range(5)] for cp in range(2)]  # (120, 80) bf16

    # ---- conv1 (+bias) + 2x2 max-pool + ReLU ------------------------------
    b1 = b1_ref[...]                                     # (1, 120) f32
    pool1 = []
    for s in range(2):                  # parity of the pooled output row
        best = None
        for rp in range(2):             # pre-pool row parity
            for cp in range(2):         # pre-pool col parity
                acc = jnp.zeros((6 * tb, 120), f32)
                for ki in range(5):
                    acc += jnp.dot(xs[2 * s + rp + ki], t1[cp][ki],
                                   preferred_element_type=f32)
                best = acc if best is None else jnp.maximum(best, acc)
        pool1.append(jnp.maximum(best + b1, 0.0).astype(bf16))

    # ---- conv2 (+bias) + 2x2 max-pool + ReLU ------------------------------
    b2 = b2_ref[...]                                     # (1, 80) f32
    best = None
    for rp in range(2):
        for cp in range(2):
            acc = jnp.zeros((4 * tb, 80), f32)
            for ki in range(5):
                par, p0 = (rp + ki) % 2, (rp + ki) // 2
                src = pool1[par][p0 * tb:(p0 + 4) * tb, :]       # (4*tb, 120)
                acc += jnp.dot(src, t2[cp][ki], preferred_element_type=f32)
            best = acc if best is None else jnp.maximum(best, acc)
    p2 = jnp.maximum(best + b2, 0.0).astype(bf16)        # (4*tb, 80)

    # TODO(synk): nn.Dropout2d / F.dropout are identity (inference/eval mode).

    # ---- fc1 + ReLU --------------------------------------------------------
    acc1 = jnp.zeros((tb, 50), f32)
    for t in range(4):
        acc1 += jnp.dot(p2[t * tb:(t + 1) * tb, :], w1_ref[t],
                        preferred_element_type=f32)
    y1 = jnp.maximum(acc1 + fb1_ref[...], 0.0).astype(bf16)      # (tb, 50)

    # ---- fc2 + log_softmax -------------------------------------------------
    z = jnp.dot(y1, w2_ref[...], preferred_element_type=f32) + fb2_ref[...]
    z = z - jnp.max(z, axis=-1, keepdims=True)
    z = z - jnp.log(jnp.sum(jnp.exp(z), axis=-1, keepdims=True))
    out_ref[...] = z.astype(out_ref.dtype)


# ---------------------------------------------------------------------------
# One-time parameter preparation (layout plumbing, done outside the kernel)
# ---------------------------------------------------------------------------
def _build_conv1_toeplitz(w1):
    """(10,1,5,5) -> (2, 5, 28, 120) banded 'conv along width' matrices.

    t[cp, ki, w, c*10 + oc] = w1[oc, 0, ki, w - (2c + cp)]  when 0 <= kj < 5,
    so  X_rows(., 28) @ t[cp, ki], summed over ki, gives the conv1 output at
    pooled column c / column parity cp for all 10 output channels.
    """
    w1n = np.asarray(w1, np.float32)
    oc_n, _, kh, kw = w1n.shape
    t = np.zeros((2, kh, 28, 12 * oc_n), np.float32)
    for cp in range(2):
        for ki in range(kh):
            for c in range(12):
                ow = 2 * c + cp
                for kj in range(kw):
                    t[cp, ki, ow + kj, c * oc_n:(c + 1) * oc_n] = w1n[:, 0, ki, kj]
    return jnp.asarray(t, jnp.bfloat16)


def _build_conv2_toeplitz(w2):
    """(20,10,5,5) -> (2, 5, 120, 80).

    t[cp, ki, w2*10 + ic, c3*20 + oc] = w2[oc, ic, ki, w2 - (2*c3 + cp)].
    """
    w2n = np.asarray(w2, np.float32)
    oc_n, ic_n, kh, kw = w2n.shape
    t = np.zeros((2, kh, 12 * ic_n, 4 * oc_n), np.float32)
    for cp in range(2):
        for ki in range(kh):
            for c3 in range(4):
                ow = 2 * c3 + cp
                for kj in range(kw):
                    wc = ow + kj
                    t[cp, ki, wc * ic_n:(wc + 1) * ic_n,
                      c3 * oc_n:(c3 + 1) * oc_n] = w2n[:, :, ki, kj].T
    return jnp.asarray(t, jnp.bfloat16)


def _build_fc1(fc1_w):
    """(50, 320) [in-index = c*16 + h*4 + w] -> (4, 80, 50) = [h][(w*20 + c), out]."""
    wn = np.asarray(fc1_w, np.float32).reshape(50, 20, 4, 4)   # [j, c, h, w]
    wn = np.transpose(wn, (2, 3, 1, 0))                        # [h, w, c, j]
    return jnp.asarray(wn.reshape(4, 80, 50), jnp.bfloat16)


def prepare_params(params):
    """One-time prep: banded conv matrices, lane-tiled biases, permuted fcs."""
    return {
        "t1": _build_conv1_toeplitz(params["w1"]),
        "b1t": jnp.tile(params["b1"], 12).reshape(1, 120).astype(jnp.float32),
        "t2": _build_conv2_toeplitz(params["w2"]),
        "b2t": jnp.tile(params["b2"], 4).reshape(1, 80).astype(jnp.float32),
        "w1t": _build_fc1(params["fc1_w"]),
        "fb1": params["fc1_b"].reshape(1, 50).astype(jnp.float32),
        "fc2wt": jnp.asarray(params["fc2_w"], jnp.float32).T.astype(jnp.bfloat16),
        "fb2": params["fc2_b"].reshape(1, 10).astype(jnp.float32),
    }


# ---------------------------------------------------------------------------
# Forward pass (single fused pallas_call, grid over batch tiles)
# ---------------------------------------------------------------------------
@jax.jit
def net_forward(prepped, x):
    # x: (B, 1, 28, 28) float32 NCHW
    B = x.shape[0]
    tb = 8 if B <= 8 else 32
    b_pad = ((B + tb - 1) // tb) * tb
    if b_pad != B:
        x = jnp.pad(x, ((0, b_pad - B), (0, 0), (0, 0), (0, 0)))

    # Input-only layout glue: (B,1,28,28) -> (4, 7, B, 28) grouping image rows
    # by (row mod 4), batch in the sublane dim, width in lanes.
    xg = jnp.transpose(x[:, 0, :, :], (1, 0, 2))             # (28, B, 28)
    xg = xg.reshape(7, 4, b_pad, 28).transpose(1, 0, 2, 3)   # (4, 7, B, 28)

    out = pl.pallas_call(
        _fused_net_kernel,
        out_shape=jax.ShapeDtypeStruct((b_pad, 10), jnp.float32),
        grid=(b_pad // tb,),
        in_specs=[
            pl.BlockSpec((4, 7, tb, 28), lambda i: (0, 0, i, 0)),
            pl.BlockSpec((2, 5, 28, 120), lambda i: (0, 0, 0, 0)),
            pl.BlockSpec((1, 120), lambda i: (0, 0)),
            pl.BlockSpec((2, 5, 120, 80), lambda i: (0, 0, 0, 0)),
            pl.BlockSpec((1, 80), lambda i: (0, 0)),
            pl.BlockSpec((4, 80, 50), lambda i: (0, 0, 0)),
            pl.BlockSpec((1, 50), lambda i: (0, 0)),
            pl.BlockSpec((50, 10), lambda i: (0, 0)),
            pl.BlockSpec((1, 10), lambda i: (0, 0)),
        ],
        out_specs=pl.BlockSpec((tb, 10), lambda i: (i, 0)),
        compiler_params=pltpu.CompilerParams(
            dimension_semantics=("parallel",)),
    )(xg, prepped["t1"], prepped["b1t"], prepped["t2"], prepped["b2t"],
      prepped["w1t"], prepped["fb1"], prepped["fc2wt"], prepped["fb2"])
    return out[:B]


# ---------------------------------------------------------------------------
# Pure-JAX reference (f32) and parameter init
# ---------------------------------------------------------------------------
def net_forward_reference(params, x):
    dn = ("NCHW", "OIHW", "NCHW")
    y = lax.conv_general_dilated(x, params["w1"], (1, 1), "VALID",
                                 dimension_numbers=dn)
    y = y + params["b1"][None, :, None, None]
    B = y.shape[0]
    y = jnp.maximum(y.reshape(B, 10, 12, 2, 12, 2).max(axis=(3, 5)), 0.0)
    y = lax.conv_general_dilated(y, params["w2"], (1, 1), "VALID",
                                 dimension_numbers=dn)
    y = y + params["b2"][None, :, None, None]
    y = jnp.maximum(y.reshape(B, 20, 4, 2, 4, 2).max(axis=(3, 5)), 0.0)
    y = y.reshape(B, 320)
    y = jnp.maximum(y @ params["fc1_w"].T + params["fc1_b"], 0.0)
    y = y @ params["fc2_w"].T + params["fc2_b"]
    return jax.nn.log_softmax(y, axis=-1)


def init_params(key):
    ks = jax.random.split(key, 8)

    def u(k, shape, fan_in):
        bound = 1.0 / (fan_in ** 0.5)
        return jax.random.uniform(k, shape, jnp.float32, -bound, bound)

    return {
        "w1": u(ks[0], (10, 1, 5, 5), 1 * 25),
        "b1": u(ks[1], (10,), 1 * 25),
        "w2": u(ks[2], (20, 10, 5, 5), 10 * 25),
        "b2": u(ks[3], (20,), 10 * 25),
        "fc1_w": u(ks[4], (50, 320), 320),
        "fc1_b": u(ks[5], (50,), 320),
        "fc2_w": u(ks[6], (10, 50), 50),
        "fc2_b": u(ks[7], (10,), 50),
    }


if __name__ == "__main__":
    key = jax.random.PRNGKey(0)
    pkey, xkey = jax.random.split(key)
    params = init_params(pkey)
    prepped = prepare_params(params)

    x = jax.random.normal(xkey, (2, 1, 28, 28), dtype=jnp.float32)

    out = jax.block_until_ready(net_forward(prepped, x))
    assert out.shape == (2, 10)

    # log_softmax rows must exponentiate-and-sum to 1.
    row_sums = jnp.exp(out).sum(axis=-1)
    assert bool(jnp.all(jnp.abs(row_sums - 1.0) < 1e-3))

    # Cross-check against the pure-JAX f32 reference (kernel uses bf16 MXU
    # inputs with f32 accumulation, so allow a small tolerance).
    ref = net_forward_reference(params, x)
    assert bool(jnp.max(jnp.abs(out - ref)) < 1e-1)

    print("KERNEL_OK")
</pallas_src>

<mosaic_0001>
module attributes {stable_mosaic.version = 11 : i64} {
  func.func @_fused_net_kernel(%arg0: i32, %arg1: memref<4x7x8x28xf32, #tpu.memory_space<vmem>>, %arg2: memref<2x5x28x120xbf16, #tpu.memory_space<vmem>>, %arg3: memref<1x120xf32, #tpu.memory_space<vmem>>, %arg4: memref<2x5x120x80xbf16, #tpu.memory_space<vmem>>, %arg5: memref<1x80xf32, #tpu.memory_space<vmem>>, %arg6: memref<4x80x50xbf16, #tpu.memory_space<vmem>>, %arg7: memref<1x50xf32, #tpu.memory_space<vmem>>, %arg8: memref<50x10xbf16, #tpu.memory_space<vmem>>, %arg9: memref<1x10xf32, #tpu.memory_space<vmem>>, %arg10: memref<8x10xf32, #tpu.memory_space<vmem>>) attributes {dimension_semantics = [#tpu.dimension_semantics<parallel>], iteration_bounds = array<i64: 1>, scalar_prefetch = 0 : i64, scratch_operands = 0 : i64, tpu.core_type = #tpu.core_type<tc>, window_params = [{transform_indices = @transform_0, window_bounds = array<i64: 4, 7, 8, 28>}, {pipeline_mode = #tpu.pipeline_mode<synchronous>, transform_indices = @transform_1, window_bounds = array<i64: 2, 5, 28, 120>}, {pipeline_mode = #tpu.pipeline_mode<synchronous>, transform_indices = @transform_2, window_bounds = array<i64: 1, 120>}, {pipeline_mode = #tpu.pipeline_mode<synchronous>, transform_indices = @transform_3, window_bounds = array<i64: 2, 5, 120, 80>}, {pipeline_mode = #tpu.pipeline_mode<synchronous>, transform_indices = @transform_4, window_bounds = array<i64: 1, 80>}, {pipeline_mode = #tpu.pipeline_mode<synchronous>, transform_indices = @transform_5, window_bounds = array<i64: 4, 80, 50>}, {pipeline_mode = #tpu.pipeline_mode<synchronous>, transform_indices = @transform_6, window_bounds = array<i64: 1, 50>}, {pipeline_mode = #tpu.pipeline_mode<synchronous>, transform_indices = @transform_7, window_bounds = array<i64: 50, 10>}, {pipeline_mode = #tpu.pipeline_mode<synchronous>, transform_indices = @transform_8, window_bounds = array<i64: 1, 10>}, {transform_indices = @transform_9, window_bounds = array<i64: 8, 10>}]} {
    %c0 = arith.constant 0 : index
    %c0_0 = arith.constant 0 : index
    %c0_1 = arith.constant 0 : index
    %c0_2 = arith.constant 0 : index
    %0 = vector.load %arg1[%c0, %c0_0, %c0_1, %c0_2] : memref<4x7x8x28xf32, #tpu.memory_space<vmem>>, vector<1x6x8x28xf32>
    %1 = vector.shape_cast %0 : vector<1x6x8x28xf32> to vector<6x8x28xf32>
    %2 = vector.shape_cast %1 : vector<6x8x28xf32> to vector<48x28xf32>
    %3 = arith.truncf %2 : vector<48x28xf32> to vector<48x28xbf16>
    %c1 = arith.constant 1 : index
    %c0_3 = arith.constant 0 : index
    %c0_4 = arith.constant 0 : index
    %c0_5 = arith.constant 0 : index
    %4 = vector.load %arg1[%c1, %c0_3, %c0_4, %c0_5] : memref<4x7x8x28xf32, #tpu.memory_space<vmem>>, vector<1x6x8x28xf32>
    %5 = vector.shape_cast %4 : vector<1x6x8x28xf32> to vector<6x8x28xf32>
    %6 = vector.shape_cast %5 : vector<6x8x28xf32> to vector<48x28xf32>
    %7 = arith.truncf %6 : vector<48x28xf32> to vector<48x28xbf16>
    %c2 = arith.constant 2 : index
    %c0_6 = arith.constant 0 : index
    %c0_7 = arith.constant 0 : index
    %c0_8 = arith.constant 0 : index
    %8 = vector.load %arg1[%c2, %c0_6, %c0_7, %c0_8] : memref<4x7x8x28xf32, #tpu.memory_space<vmem>>, vector<1x6x8x28xf32>
    %9 = vector.shape_cast %8 : vector<1x6x8x28xf32> to vector<6x8x28xf32>
    %10 = vector.shape_cast %9 : vector<6x8x28xf32> to vector<48x28xf32>
    %11 = arith.truncf %10 : vector<48x28xf32> to vector<48x28xbf16>
    %c3 = arith.constant 3 : index
    %c0_9 = arith.constant 0 : index
    %c0_10 = arith.constant 0 : index
    %c0_11 = arith.constant 0 : index
    %12 = vector.load %arg1[%c3, %c0_9, %c0_10, %c0_11] : memref<4x7x8x28xf32, #tpu.memory_space<vmem>>, vector<1x6x8x28xf32>
    %13 = vector.shape_cast %12 : vector<1x6x8x28xf32> to vector<6x8x28xf32>
    %14 = vector.shape_cast %13 : vector<6x8x28xf32> to vector<48x28xf32>
    %15 = arith.truncf %14 : vector<48x28xf32> to vector<48x28xbf16>
    %c0_12 = arith.constant 0 : index
    %c1_13 = arith.constant 1 : index
    %c0_14 = arith.constant 0 : index
    %c0_15 = arith.constant 0 : index
    %16 = vector.load %arg1[%c0_12, %c1_13, %c0_14, %c0_15] : memref<4x7x8x28xf32, #tpu.memory_space<vmem>>, vector<1x6x8x28xf32>
    %17 = vector.shape_cast %16 : vector<1x6x8x28xf32> to vector<6x8x28xf32>
    %18 = vector.shape_cast %17 : vector<6x8x28xf32> to vector<48x28xf32>
    %19 = arith.truncf %18 : vector<48x28xf32> to vector<48x28xbf16>
    %c1_16 = arith.constant 1 : index
    %c1_17 = arith.constant 1 : index
    %c0_18 = arith.constant 0 : index
    %c0_19 = arith.constant 0 : index
    %20 = vector.load %arg1[%c1_16, %c1_17, %c0_18, %c0_19] : memref<4x7x8x28xf32, #tpu.memory_space<vmem>>, vector<1x6x8x28xf32>
    %21 = vector.shape_cast %20 : vector<1x6x8x28xf32> to vector<6x8x28xf32>
    %22 = vector.shape_cast %21 : vector<6x8x28xf32> to vector<48x28xf32>
    %23 = arith.truncf %22 : vector<48x28xf32> to vector<48x28xbf16>
    %c2_20 = arith.constant 2 : index
    %c1_21 = arith.constant 1 : index
    %c0_22 = arith.constant 0 : index
    %c0_23 = arith.constant 0 : index
    %24 = vector.load %arg1[%c2_20, %c1_21, %c0_22, %c0_23] : memref<4x7x8x28xf32, #tpu.memory_space<vmem>>, vector<1x6x8x28xf32>
    %25 = vector.shape_cast %24 : vector<1x6x8x28xf32> to vector<6x8x28xf32>
    %26 = vector.shape_cast %25 : vector<6x8x28xf32> to vector<48x28xf32>
    %27 = arith.truncf %26 : vector<48x28xf32> to vector<48x28xbf16>
    %c3_24 = arith.constant 3 : index
    %c1_25 = arith.constant 1 : index
    %c0_26 = arith.constant 0 : index
    %c0_27 = arith.constant 0 : index
    %28 = vector.load %arg1[%c3_24, %c1_25, %c0_26, %c0_27] : memref<4x7x8x28xf32, #tpu.memory_space<vmem>>, vector<1x6x8x28xf32>
    %29 = vector.shape_cast %28 : vector<1x6x8x28xf32> to vector<6x8x28xf32>
    %30 = vector.shape_cast %29 : vector<6x8x28xf32> to vector<48x28xf32>
    %31 = arith.truncf %30 : vector<48x28xf32> to vector<48x28xbf16>
    %c0_28 = arith.constant 0 : index
    %c0_29 = arith.constant 0 : index
    %c0_30 = arith.constant 0 : index
    %c0_31 = arith.constant 0 : index
    %32 = vector.load %arg2[%c0_28, %c0_29, %c0_30, %c0_31] : memref<2x5x28x120xbf16, #tpu.memory_space<vmem>>, vector<1x1x28x120xbf16>
    %33 = vector.shape_cast %32 : vector<1x1x28x120xbf16> to vector<28x120xbf16>
    %c0_32 = arith.constant 0 : index
    %c1_33 = arith.constant 1 : index
    %c0_34 = arith.constant 0 : index
    %c0_35 = arith.constant 0 : index
    %34 = vector.load %arg2[%c0_32, %c1_33, %c0_34, %c0_35] : memref<2x5x28x120xbf16, #tpu.memory_space<vmem>>, vector<1x1x28x120xbf16>
    %35 = vector.shape_cast %34 : vector<1x1x28x120xbf16> to vector<28x120xbf16>
    %c0_36 = arith.constant 0 : index
    %c2_37 = arith.constant 2 : index
    %c0_38 = arith.constant 0 : index
    %c0_39 = arith.constant 0 : index
    %36 = vector.load %arg2[%c0_36, %c2_37, %c0_38, %c0_39] : memref<2x5x28x120xbf16, #tpu.memory_space<vmem>>, vector<1x1x28x120xbf16>
    %37 = vector.shape_cast %36 : vector<1x1x28x120xbf16> to vector<28x120xbf16>
    %c0_40 = arith.constant 0 : index
    %c3_41 = arith.constant 3 : index
    %c0_42 = arith.constant 0 : index
    %c0_43 = arith.constant 0 : index
    %38 = vector.load %arg2[%c0_40, %c3_41, %c0_42, %c0_43] : memref<2x5x28x120xbf16, #tpu.memory_space<vmem>>, vector<1x1x28x120xbf16>
    %39 = vector.shape_cast %38 : vector<1x1x28x120xbf16> to vector<28x120xbf16>
    %c0_44 = arith.constant 0 : index
    %c4 = arith.constant 4 : index
    %c0_45 = arith.constant 0 : index
    %c0_46 = arith.constant 0 : index
    %40 = vector.load %arg2[%c0_44, %c4, %c0_45, %c0_46] : memref<2x5x28x120xbf16, #tpu.memory_space<vmem>>, vector<1x1x28x120xbf16>
    %41 = vector.shape_cast %40 : vector<1x1x28x120xbf16> to vector<28x120xbf16>
    %c1_47 = arith.constant 1 : index
    %c0_48 = arith.constant 0 : index
    %c0_49 = arith.constant 0 : index
    %c0_50 = arith.constant 0 : index
    %42 = vector.load %arg2[%c1_47, %c0_48, %c0_49, %c0_50] : memref<2x5x28x120xbf16, #tpu.memory_space<vmem>>, vector<1x1x28x120xbf16>
    %43 = vector.shape_cast %42 : vector<1x1x28x120xbf16> to vector<28x120xbf16>
    %c1_51 = arith.constant 1 : index
    %c1_52 = arith.constant 1 : index
    %c0_53 = arith.constant 0 : index
    %c0_54 = arith.constant 0 : index
    %44 = vector.load %arg2[%c1_51, %c1_52, %c0_53, %c0_54] : memref<2x5x28x120xbf16, #tpu.memory_space<vmem>>, vector<1x1x28x120xbf16>
    %45 = vector.shape_cast %44 : vector<1x1x28x120xbf16> to vector<28x120xbf16>
    %c1_55 = arith.constant 1 : index
    %c2_56 = arith.constant 2 : index
    %c0_57 = arith.constant 0 : index
    %c0_58 = arith.constant 0 : index
    %46 = vector.load %arg2[%c1_55, %c2_56, %c0_57, %c0_58] : memref<2x5x28x120xbf16, #tpu.memory_space<vmem>>, vector<1x1x28x120xbf16>
    %47 = vector.shape_cast %46 : vector<1x1x28x120xbf16> to vector<28x120xbf16>
    %c1_59 = arith.constant 1 : index
    %c3_60 = arith.constant 3 : index
    %c0_61 = arith.constant 0 : index
    %c0_62 = arith.constant 0 : index
    %48 = vector.load %arg2[%c1_59, %c3_60, %c0_61, %c0_62] : memref<2x5x28x120xbf16, #tpu.memory_space<vmem>>, vector<1x1x28x120xbf16>
    %49 = vector.shape_cast %48 : vector<1x1x28x120xbf16> to vector<28x120xbf16>
    %c1_63 = arith.constant 1 : index
    %c4_64 = arith.constant 4 : index
    %c0_65 = arith.constant 0 : index
    %c0_66 = arith.constant 0 : index
    %50 = vector.load %arg2[%c1_63, %c4_64, %c0_65, %c0_66] : memref<2x5x28x120xbf16, #tpu.memory_space<vmem>>, vector<1x1x28x120xbf16>
    %51 = vector.shape_cast %50 : vector<1x1x28x120xbf16> to vector<28x120xbf16>
    %c0_67 = arith.constant 0 : index
    %c0_68 = arith.constant 0 : index
    %c0_69 = arith.constant 0 : index
    %c0_70 = arith.constant 0 : index
    %52 = vector.load %arg4[%c0_67, %c0_68, %c0_69, %c0_70] : memref<2x5x120x80xbf16, #tpu.memory_space<vmem>>, vector<1x1x120x80xbf16>
    %53 = vector.shape_cast %52 : vector<1x1x120x80xbf16> to vector<120x80xbf16>
    %c0_71 = arith.constant 0 : index
    %c1_72 = arith.constant 1 : index
    %c0_73 = arith.constant 0 : index
    %c0_74 = arith.constant 0 : index
    %54 = vector.load %arg4[%c0_71, %c1_72, %c0_73, %c0_74] : memref<2x5x120x80xbf16, #tpu.memory_space<vmem>>, vector<1x1x120x80xbf16>
    %55 = vector.shape_cast %54 : vector<1x1x120x80xbf16> to vector<120x80xbf16>
    %c0_75 = arith.constant 0 : index
    %c2_76 = arith.constant 2 : index
    %c0_77 = arith.constant 0 : index
    %c0_78 = arith.constant 0 : index
    %56 = vector.load %arg4[%c0_75, %c2_76, %c0_77, %c0_78] : memref<2x5x120x80xbf16, #tpu.memory_space<vmem>>, vector<1x1x120x80xbf16>
    %57 = vector.shape_cast %56 : vector<1x1x120x80xbf16> to vector<120x80xbf16>
    %c0_79 = arith.constant 0 : index
    %c3_80 = arith.constant 3 : index
    %c0_81 = arith.constant 0 : index
    %c0_82 = arith.constant 0 : index
    %58 = vector.load %arg4[%c0_79, %c3_80, %c0_81, %c0_82] : memref<2x5x120x80xbf16, #tpu.memory_space<vmem>>, vector<1x1x120x80xbf16>
    %59 = vector.shape_cast %58 : vector<1x1x120x80xbf16> to vector<120x80xbf16>
    %c0_83 = arith.constant 0 : index
    %c4_84 = arith.constant 4 : index
    %c0_85 = arith.constant 0 : index
    %c0_86 = arith.constant 0 : index
    %60 = vector.load %arg4[%c0_83, %c4_84, %c0_85, %c0_86] : memref<2x5x120x80xbf16, #tpu.memory_space<vmem>>, vector<1x1x120x80xbf16>
    %61 = vector.shape_cast %60 : vector<1x1x120x80xbf16> to vector<120x80xbf16>
    %c1_87 = arith.constant 1 : index
    %c0_88 = arith.constant 0 : index
    %c0_89 = arith.constant 0 : index
    %c0_90 = arith.constant 0 : index
    %62 = vector.load %arg4[%c1_87, %c0_88, %c0_89, %c0_90] : memref<2x5x120x80xbf16, #tpu.memory_space<vmem>>, vector<1x1x120x80xbf16>
    %63 = vector.shape_cast %62 : vector<1x1x120x80xbf16> to vector<120x80xbf16>
    %c1_91 = arith.constant 1 : index
    %c1_92 = arith.constant 1 : index
    %c0_93 = arith.constant 0 : index
    %c0_94 = arith.constant 0 : index
    %64 = vector.load %arg4[%c1_91, %c1_92, %c0_93, %c0_94] : memref<2x5x120x80xbf16, #tpu.memory_space<vmem>>, vector<1x1x120x80xbf16>
    %65 = vector.shape_cast %64 : vector<1x1x120x80xbf16> to vector<120x80xbf16>
    %c1_95 = arith.constant 1 : index
    %c2_96 = arith.constant 2 : index
    %c0_97 = arith.constant 0 : index
    %c0_98 = arith.constant 0 : index
    %66 = vector.load %arg4[%c1_95, %c2_96, %c0_97, %c0_98] : memref<2x5x120x80xbf16, #tpu.memory_space<vmem>>, vector<1x1x120x80xbf16>
    %67 = vector.shape_cast %66 : vector<1x1x120x80xbf16> to vector<120x80xbf16>
    %c1_99 = arith.constant 1 : index
    %c3_100 = arith.constant 3 : index
    %c0_101 = arith.constant 0 : index
    %c0_102 = arith.constant 0 : index
    %68 = vector.load %arg4[%c1_99, %c3_100, %c0_101, %c0_102] : memref<2x5x120x80xbf16, #tpu.memory_space<vmem>>, vector<1x1x120x80xbf16>
    %69 = vector.shape_cast %68 : vector<1x1x120x80xbf16> to vector<120x80xbf16>
    %c1_103 = arith.constant 1 : index
    %c4_104 = arith.constant 4 : index
    %c0_105 = arith.constant 0 : index
    %c0_106 = arith.constant 0 : index
    %70 = vector.load %arg4[%c1_103, %c4_104, %c0_105, %c0_106] : memref<2x5x120x80xbf16, #tpu.memory_space<vmem>>, vector<1x1x120x80xbf16>
    %71 = vector.shape_cast %70 : vector<1x1x120x80xbf16> to vector<120x80xbf16>
    %c0_107 = arith.constant 0 : index
    %c0_108 = arith.constant 0 : index
    %72 = vector.load %arg3[%c0_107, %c0_108] : memref<1x120xf32, #tpu.memory_space<vmem>>, vector<1x120xf32>
    %cst = arith.constant 0.000000e+00 : f32
    %73 = vector.broadcast %cst : f32 to vector<48x120xf32>
    %cst_109 = arith.constant dense<0.000000e+00> : vector<48x120xf32>
    %74 = tpu.matmul %3, %33, %cst_109 {dimension_numbers = #tpu.dot_dimension_numbers<[1], [0], [0], [1], [0, 0, 1, 1], [], []>} : vector<48x28xbf16>, vector<28x120xbf16>, vector<48x120xf32> -> vector<48x120xf32>
    %75 = arith.addf %73, %74 : vector<48x120xf32>
    %cst_110 = arith.constant dense<0.000000e+00> : vector<48x120xf32>
    %76 = tpu.matmul %7, %35, %cst_110 {dimension_numbers = #tpu.dot_dimension_numbers<[1], [0], [0], [1], [0, 0, 1, 1], [], []>} : vector<48x28xbf16>, vector<28x120xbf16>, vector<48x120xf32> -> vector<48x120xf32>
    %77 = arith.addf %75, %76 : vector<48x120xf32>
    %cst_111 = arith.constant dense<0.000000e+00> : vector<48x120xf32>
    %78 = tpu.matmul %11, %37, %cst_111 {dimension_numbers = #tpu.dot_dimension_numbers<[1], [0], [0], [1], [0, 0, 1, 1], [], []>} : vector<48x28xbf16>, vector<28x120xbf16>, vector<48x120xf32> -> vector<48x120xf32>
    %79 = arith.addf %77, %78 : vector<48x120xf32>
    %cst_112 = arith.constant dense<0.000000e+00> : vector<48x120xf32>
    %80 = tpu.matmul %15, %39, %cst_112 {dimension_numbers = #tpu.dot_dimension_numbers<[1], [0], [0], [1], [0, 0, 1, 1], [], []>} : vector<48x28xbf16>, vector<28x120xbf16>, vector<48x120xf32> -> vector<48x120xf32>
    %81 = arith.addf %79, %80 : vector<48x120xf32>
    %cst_113 = arith.constant dense<0.000000e+00> : vector<48x120xf32>
    %82 = tpu.matmul %19, %41, %cst_113 {dimension_numbers = #tpu.dot_dimension_numbers<[1], [0], [0], [1], [0, 0, 1, 1], [], []>} : vector<48x28xbf16>, vector<28x120xbf16>, vector<48x120xf32> -> vector<48x120xf32>
    %83 = arith.addf %81, %82 : vector<48x120xf32>
    %cst_114 = arith.constant 0.000000e+00 : f32
    %84 = vector.broadcast %cst_114 : f32 to vector<48x120xf32>
    %cst_115 = arith.constant dense<0.000000e+00> : vector<48x120xf32>
    %85 = tpu.matmul %3, %43, %cst_115 {dimension_numbers = #tpu.dot_dimension_numbers<[1], [0], [0], [1], [0, 0, 1, 1], [], []>} : vector<48x28xbf16>, vector<28x120xbf16>, vector<48x120xf32> -> vector<48x120xf32>
    %86 = arith.addf %84, %85 : vector<48x120xf32>
    %cst_116 = arith.constant dense<0.000000e+00> : vector<48x120xf32>
    %87 = tpu.matmul %7, %45, %cst_116 {dimension_numbers = #tpu.dot_dimension_numbers<[1], [0], [0], [1], [0, 0, 1, 1], [], []>} : vector<48x28xbf16>, vector<28x120xbf16>, vector<48x120xf32> -> vector<48x120xf32>
    %88 = arith.addf %86, %87 : vector<48x120xf32>
    %cst_117 = arith.constant dense<0.000000e+00> : vector<48x120xf32>
    %89 = tpu.matmul %11, %47, %cst_117 {dimension_numbers = #tpu.dot_dimension_numbers<[1], [0], [0], [1], [0, 0, 1, 1], [], []>} : vector<48x28xbf16>, vector<28x120xbf16>, vector<48x120xf32> -> vector<48x120xf32>
    %90 = arith.addf %88, %89 : vector<48x120xf32>
    %cst_118 = arith.constant dense<0.000000e+00> : vector<48x120xf32>
    %91 = tpu.matmul %15, %49, %cst_118 {dimension_numbers = #tpu.dot_dimension_numbers<[1], [0], [0], [1], [0, 0, 1, 1], [], []>} : vector<48x28xbf16>, vector<28x120xbf16>, vector<48x120xf32> -> vector<48x120xf32>
    %92 = arith.addf %90, %91 : vector<48x120xf32>
    %cst_119 = arith.constant dense<0.000000e+00> : vector<48x120xf32>
    %93 = tpu.matmul %19, %51, %cst_119 {dimension_numbers = #tpu.dot_dimension_numbers<[1], [0], [0], [1], [0, 0, 1, 1], [], []>} : vector<48x28xbf16>, vector<28x120xbf16>, vector<48x120xf32> -> vector<48x120xf32>
    %94 = arith.addf %92, %93 : vector<48x120xf32>
    %95 = arith.maximumf %83, %94 : vector<48x120xf32>
    %cst_120 = arith.constant 0.000000e+00 : f32
    %96 = vector.broadcast %cst_120 : f32 to vector<48x120xf32>
    %cst_121 = arith.constant dense<0.000000e+00> : vector<48x120xf32>
    %97 = tpu.matmul %7, %33, %cst_121 {dimension_numbers = #tpu.dot_dimension_numbers<[1], [0], [0], [1], [0, 0, 1, 1], [], []>} : vector<48x28xbf16>, vector<28x120xbf16>, vector<48x120xf32> -> vector<48x120xf32>
    %98 = arith.addf %96, %97 : vector<48x120xf32>
    %cst_122 = arith.constant dense<0.000000e+00> : vector<48x120xf32>
    %99 = tpu.matmul %11, %35, %cst_122 {dimension_numbers = #tpu.dot_dimension_numbers<[1], [0], [0], [1], [0, 0, 1, 1], [], []>} : vector<48x28xbf16>, vector<28x120xbf16>, vector<48x120xf32> -> vector<48x120xf32>
    %100 = arith.addf %98, %99 : vector<48x120xf32>
    %cst_123 = arith.constant dense<0.000000e+00> : vector<48x120xf32>
    %101 = tpu.matmul %15, %37, %cst_123 {dimension_numbers = #tpu.dot_dimension_numbers<[1], [0], [0], [1], [0, 0, 1, 1], [], []>} : vector<48x28xbf16>, vector<28x120xbf16>, vector<48x120xf32> -> vector<48x120xf32>
    %102 = arith.addf %100, %101 : vector<48x120xf32>
    %cst_124 = arith.constant dense<0.000000e+00> : vector<48x120xf32>
    %103 = tpu.matmul %19, %39, %cst_124 {dimension_numbers = #tpu.dot_dimension_numbers<[1], [0], [0], [1], [0, 0, 1, 1], [], []>} : vector<48x28xbf16>, vector<28x120xbf16>, vector<48x120xf32> -> vector<48x120xf32>
    %104 = arith.addf %102, %103 : vector<48x120xf32>
    %cst_125 = arith.constant dense<0.000000e+00> : vector<48x120xf32>
    %105 = tpu.matmul %23, %41, %cst_125 {dimension_numbers = #tpu.dot_dimension_numbers<[1], [0], [0], [1], [0, 0, 1, 1], [], []>} : vector<48x28xbf16>, vector<28x120xbf16>, vector<48x120xf32> -> vector<48x120xf32>
    %106 = arith.addf %104, %105 : vector<48x120xf32>
    %107 = arith.maximumf %95, %106 : vector<48x120xf32>
    %cst_126 = arith.constant 0.000000e+00 : f32
    %108 = vector.broadcast %cst_126 : f32 to vector<48x120xf32>
    %cst_127 = arith.constant dense<0.000000e+00> : vector<48x120xf32>
    %109 = tpu.matmul %7, %43, %cst_127 {dimension_numbers = #tpu.dot_dimension_numbers<[1], [0], [0], [1], [0, 0, 1, 1], [], []>} : vector<48x28xbf16>, vector<28x120xbf16>, vector<48x120xf32> -> vector<48x120xf32>
    %110 = arith.addf %108, %109 : vector<48x120xf32>
    %cst_128 = arith.constant dense<0.000000e+00> : vector<48x120xf32>
    %111 = tpu.matmul %11, %45, %cst_128 {dimension_numbers = #tpu.dot_dimension_numbers<[1], [0], [0], [1], [0, 0, 1, 1], [], []>} : vector<48x28xbf16>, vector<28x120xbf16>, vector<48x120xf32> -> vector<48x120xf32>
    %112 = arith.addf %110, %111 : vector<48x120xf32>
    %cst_129 = arith.constant dense<0.000000e+00> : vector<48x120xf32>
    %113 = tpu.matmul %15, %47, %cst_129 {dimension_numbers = #tpu.dot_dimension_numbers<[1], [0], [0], [1], [0, 0, 1, 1], [], []>} : vector<48x28xbf16>, vector<28x120xbf16>, vector<48x120xf32> -> vector<48x120xf32>
    %114 = arith.addf %112, %113 : vector<48x120xf32>
    %cst_130 = arith.constant dense<0.000000e+00> : vector<48x120xf32>
    %115 = tpu.matmul %19, %49, %cst_130 {dimension_numbers = #tpu.dot_dimension_numbers<[1], [0], [0], [1], [0, 0, 1, 1], [], []>} : vector<48x28xbf16>, vector<28x120xbf16>, vector<48x120xf32> -> vector<48x120xf32>
    %116 = arith.addf %114, %115 : vector<48x120xf32>
    %cst_131 = arith.constant dense<0.000000e+00> : vector<48x120xf32>
    %117 = tpu.matmul %23, %51, %cst_131 {dimension_numbers = #tpu.dot_dimension_numbers<[1], [0], [0], [1], [0, 0, 1, 1], [], []>} : vector<48x28xbf16>, vector<28x120xbf16>, vector<48x120xf32> -> vector<48x120xf32>
    %118 = arith.addf %116, %117 : vector<48x120xf32>
    %119 = arith.maximumf %107, %118 : vector<48x120xf32>
    %120 = vector.broadcast %72 : vector<1x120xf32> to vector<48x120xf32>
    %121 = arith.addf %119, %120 : vector<48x120xf32>
    %cst_132 = arith.constant 0.000000e+00 : f32
    %122 = vector.broadcast %cst_132 : f32 to vector<48x120xf32>
    %123 = arith.maximumf %121, %122 : vector<48x120xf32>
    %124 = arith.truncf %123 : vector<48x120xf32> to vector<48x120xbf16>
    %cst_133 = arith.constant 0.000000e+00 : f32
    %125 = vector.broadcast %cst_133 : f32 to vector<48x120xf32>
    %cst_134 = arith.constant dense<0.000000e+00> : vector<48x120xf32>
    %126 = tpu.matmul %11, %33, %cst_134 {dimension_numbers = #tpu.dot_dimension_numbers<[1], [0], [0], [1], [0, 0, 1, 1], [], []>} : vector<48x28xbf16>, vector<28x120xbf16>, vector<48x120xf32> -> vector<48x120xf32>
    %127 = arith.addf %125, %126 : vector<48x120xf32>
    %cst_135 = arith.constant dense<0.000000e+00> : vector<48x120xf32>
    %128 = tpu.matmul %15, %35, %cst_135 {dimension_numbers = #tpu.dot_dimension_numbers<[1], [0], [0], [1], [0, 0, 1, 1], [], []>} : vector<48x28xbf16>, vector<28x120xbf16>, vector<48x120xf32> -> vector<48x120xf32>
    %129 = arith.addf %127, %128 : vector<48x120xf32>
    %cst_136 = arith.constant dense<0.000000e+00> : vector<48x120xf32>
    %130 = tpu.matmul %19, %37, %cst_136 {dimension_numbers = #tpu.dot_dimension_numbers<[1], [0], [0], [1], [0, 0, 1, 1], [], []>} : vector<48x28xbf16>, vector<28x120xbf16>, vector<48x120xf32> -> vector<48x120xf32>
    %131 = arith.addf %129, %130 : vector<48x120xf32>
    %cst_137 = arith.constant dense<0.000000e+00> : vector<48x120xf32>
    %132 = tpu.matmul %23, %39, %cst_137 {dimension_numbers = #tpu.dot_dimension_numbers<[1], [0], [0], [1], [0, 0, 1, 1], [], []>} : vector<48x28xbf16>, vector<28x120xbf16>, vector<48x120xf32> -> vector<48x120xf32>
    %133 = arith.addf %131, %132 : vector<48x120xf32>
    %cst_138 = arith.constant dense<0.000000e+00> : vector<48x120xf32>
    %134 = tpu.matmul %27, %41, %cst_138 {dimension_numbers = #tpu.dot_dimension_numbers<[1], [0], [0], [1], [0, 0, 1, 1], [], []>} : vector<48x28xbf16>, vector<28x120xbf16>, vector<48x120xf32> -> vector<48x120xf32>
    %135 = arith.addf %133, %134 : vector<48x120xf32>
    %cst_139 = arith.constant 0.000000e+00 : f32
    %136 = vector.broadcast %cst_139 : f32 to vector<48x120xf32>
    %cst_140 = arith.constant dense<0.000000e+00> : vector<48x120xf32>
    %137 = tpu.matmul %11, %43, %cst_140 {dimension_numbers = #tpu.dot_dimension_numbers<[1], [0], [0], [1], [0, 0, 1, 1], [], []>} : vector<48x28xbf16>, vector<28x120xbf16>, vector<48x120xf32> -> vector<48x120xf32>
    %138 = arith.addf %136, %137 : vector<48x120xf32>
    %cst_141 = arith.constant dense<0.000000e+00> : vector<48x120xf32>
    %139 = tpu.matmul %15, %45, %cst_141 {dimension_numbers = #tpu.dot_dimension_numbers<[1], [0], [0], [1], [0, 0, 1, 1], [], []>} : vector<48x28xbf16>, vector<28x120xbf16>, vector<48x120xf32> -> vector<48x120xf32>
    %140 = arith.addf %138, %139 : vector<48x120xf32>
    %cst_142 = arith.constant dense<0.000000e+00> : vector<48x120xf32>
    %141 = tpu.matmul %19, %47, %cst_142 {dimension_numbers = #tpu.dot_dimension_numbers<[1], [0], [0], [1], [0, 0, 1, 1], [], []>} : vector<48x28xbf16>, vector<28x120xbf16>, vector<48x120xf32> -> vector<48x120xf32>
    %142 = arith.addf %140, %141 : vector<48x120xf32>
    %cst_143 = arith.constant dense<0.000000e+00> : vector<48x120xf32>
    %143 = tpu.matmul %23, %49, %cst_143 {dimension_numbers = #tpu.dot_dimension_numbers<[1], [0], [0], [1], [0, 0, 1, 1], [], []>} : vector<48x28xbf16>, vector<28x120xbf16>, vector<48x120xf32> -> vector<48x120xf32>
    %144 = arith.addf %142, %143 : vector<48x120xf32>
    %cst_144 = arith.constant dense<0.000000e+00> : vector<48x120xf32>
    %145 = tpu.matmul %27, %51, %cst_144 {dimension_numbers = #tpu.dot_dimension_numbers<[1], [0], [0], [1], [0, 0, 1, 1], [], []>} : vector<48x28xbf16>, vector<28x120xbf16>, vector<48x120xf32> -> vector<48x120xf32>
    %146 = arith.addf %144, %145 : vector<48x120xf32>
    %147 = arith.maximumf %135, %146 : vector<48x120xf32>
    %cst_145 = arith.constant 0.000000e+00 : f32
    %148 = vector.broadcast %cst_145 : f32 to vector<48x120xf32>
    %cst_146 = arith.constant dense<0.000000e+00> : vector<48x120xf32>
    %149 = tpu.matmul %15, %33, %cst_146 {dimension_numbers = #tpu.dot_dimension_numbers<[1], [0], [0], [1], [0, 0, 1, 1], [], []>} : vector<48x28xbf16>, vector<28x120xbf16>, vector<48x120xf32> -> vector<48x120xf32>
    %150 = arith.addf %148, %149 : vector<48x120xf32>
    %cst_147 = arith.constant dense<0.000000e+00> : vector<48x120xf32>
    %151 = tpu.matmul %19, %35, %cst_147 {dimension_numbers = #tpu.dot_dimension_numbers<[1], [0], [0], [1], [0, 0, 1, 1], [], []>} : vector<48x28xbf16>, vector<28x120xbf16>, vector<48x120xf32> -> vector<48x120xf32>
    %152 = arith.addf %150, %151 : vector<48x120xf32>
    %cst_148 = arith.constant dense<0.000000e+00> : vector<48x120xf32>
    %153 = tpu.matmul %23, %37, %cst_148 {dimension_numbers = #tpu.dot_dimension_numbers<[1], [0], [0], [1], [0, 0, 1, 1], [], []>} : vector<48x28xbf16>, vector<28x120xbf16>, vector<48x120xf32> -> vector<48x120xf32>
    %154 = arith.addf %152, %153 : vector<48x120xf32>
    %cst_149 = arith.constant dense<0.000000e+00> : vector<48x120xf32>
    %155 = tpu.matmul %27, %39, %cst_149 {dimension_numbers = #tpu.dot_dimension_numbers<[1], [0], [0], [1], [0, 0, 1, 1], [], []>} : vector<48x28xbf16>, vector<28x120xbf16>, vector<48x120xf32> -> vector<48x120xf32>
    %156 = arith.addf %154, %155 : vector<48x120xf32>
    %cst_150 = arith.constant dense<0.000000e+00> : vector<48x120xf32>
    %157 = tpu.matmul %31, %41, %cst_150 {dimension_numbers = #tpu.dot_dimension_numbers<[1], [0], [0], [1], [0, 0, 1, 1], [], []>} : vector<48x28xbf16>, vector<28x120xbf16>, vector<48x120xf32> -> vector<48x120xf32>
    %158 = arith.addf %156, %157 : vector<48x120xf32>
    %159 = arith.maximumf %147, %158 : vector<48x120xf32>
    %cst_151 = arith.constant 0.000000e+00 : f32
    %160 = vector.broadcast %cst_151 : f32 to vector<48x120xf32>
    %cst_152 = arith.constant dense<0.000000e+00> : vector<48x120xf32>
    %161 = tpu.matmul %15, %43, %cst_152 {dimension_numbers = #tpu.dot_dimension_numbers<[1], [0], [0], [1], [0, 0, 1, 1], [], []>} : vector<48x28xbf16>, vector<28x120xbf16>, vector<48x120xf32> -> vector<48x120xf32>
    %162 = arith.addf %160, %161 : vector<48x120xf32>
    %cst_153 = arith.constant dense<0.000000e+00> : vector<48x120xf32>
    %163 = tpu.matmul %19, %45, %cst_153 {dimension_numbers = #tpu.dot_dimension_numbers<[1], [0], [0], [1], [0, 0, 1, 1], [], []>} : vector<48x28xbf16>, vector<28x120xbf16>, vector<48x120xf32> -> vector<48x120xf32>
    %164 = arith.addf %162, %163 : vector<48x120xf32>
    %cst_154 = arith.constant dense<0.000000e+00> : vector<48x120xf32>
    %165 = tpu.matmul %23, %47, %cst_154 {dimension_numbers = #tpu.dot_dimension_numbers<[1], [0], [0], [1], [0, 0, 1, 1], [], []>} : vector<48x28xbf16>, vector<28x120xbf16>, vector<48x120xf32> -> vector<48x120xf32>
    %166 = arith.addf %164, %165 : vector<48x120xf32>
    %cst_155 = arith.constant dense<0.000000e+00> : vector<48x120xf32>
    %167 = tpu.matmul %27, %49, %cst_155 {dimension_numbers = #tpu.dot_dimension_numbers<[1], [0], [0], [1], [0, 0, 1, 1], [], []>} : vector<48x28xbf16>, vector<28x120xbf16>, vector<48x120xf32> -> vector<48x120xf32>
    %168 = arith.addf %166, %167 : vector<48x120xf32>
    %cst_156 = arith.constant dense<0.000000e+00> : vector<48x120xf32>
    %169 = tpu.matmul %31, %51, %cst_156 {dimension_numbers = #tpu.dot_dimension_numbers<[1], [0], [0], [1], [0, 0, 1, 1], [], []>} : vector<48x28xbf16>, vector<28x120xbf16>, vector<48x120xf32> -> vector<48x120xf32>
    %170 = arith.addf %168, %169 : vector<48x120xf32>
    %171 = arith.maximumf %159, %170 : vector<48x120xf32>
    %172 = vector.broadcast %72 : vector<1x120xf32> to vector<48x120xf32>
    %173 = arith.addf %171, %172 : vector<48x120xf32>
    %cst_157 = arith.constant 0.000000e+00 : f32
    %174 = vector.broadcast %cst_157 : f32 to vector<48x120xf32>
    %175 = arith.maximumf %173, %174 : vector<48x120xf32>
    %176 = arith.truncf %175 : vector<48x120xf32> to vector<48x120xbf16>
    %c0_158 = arith.constant 0 : index
    %c0_159 = arith.constant 0 : index
    %177 = vector.load %arg5[%c0_158, %c0_159] : memref<1x80xf32, #tpu.memory_space<vmem>>, vector<1x80xf32>
    %cst_160 = arith.constant 0.000000e+00 : f32
    %178 = vector.broadcast %cst_160 : f32 to vector<32x80xf32>
    %179 = vector.extract_strided_slice %124 {offsets = [0, 0], sizes = [32, 120], strides = [1, 1]} : vector<48x120xbf16> to vector<32x120xbf16>
    %cst_161 = arith.constant dense<0.000000e+00> : vector<32x80xf32>
    %180 = tpu.matmul %179, %53, %cst_161 {dimension_numbers = #tpu.dot_dimension_numbers<[1], [0], [0], [1], [0, 0, 1, 1], [], []>} : vector<32x120xbf16>, vector<120x80xbf16>, vector<32x80xf32> -> vector<32x80xf32>
    %181 = arith.addf %178, %180 : vector<32x80xf32>
    %182 = vector.extract_strided_slice %176 {offsets = [0, 0], sizes = [32, 120], strides = [1, 1]} : vector<48x120xbf16> to vector<32x120xbf16>
    %cst_162 = arith.constant dense<0.000000e+00> : vector<32x80xf32>
    %183 = tpu.matmul %182, %55, %cst_162 {dimension_numbers = #tpu.dot_dimension_numbers<[1], [0], [0], [1], [0, 0, 1, 1], [], []>} : vector<32x120xbf16>, vector<120x80xbf16>, vector<32x80xf32> -> vector<32x80xf32>
    %184 = arith.addf %181, %183 : vector<32x80xf32>
    %185 = vector.extract_strided_slice %124 {offsets = [8, 0], sizes = [32, 120], strides = [1, 1]} : vector<48x120xbf16> to vector<32x120xbf16>
    %cst_163 = arith.constant dense<0.000000e+00> : vector<32x80xf32>
    %186 = tpu.matmul %185, %57, %cst_163 {dimension_numbers = #tpu.dot_dimension_numbers<[1], [0], [0], [1], [0, 0, 1, 1], [], []>} : vector<32x120xbf16>, vector<120x80xbf16>, vector<32x80xf32> -> vector<32x80xf32>
    %187 = arith.addf %184, %186 : vector<32x80xf32>
    %188 = vector.extract_strided_slice %176 {offsets = [8, 0], sizes = [32, 120], strides = [1, 1]} : vector<48x120xbf16> to vector<32x120xbf16>
    %cst_164 = arith.constant dense<0.000000e+00> : vector<32x80xf32>
    %189 = tpu.matmul %188, %59, %cst_164 {dimension_numbers = #tpu.dot_dimension_numbers<[1], [0], [0], [1], [0, 0, 1, 1], [], []>} : vector<32x120xbf16>, vector<120x80xbf16>, vector<32x80xf32> -> vector<32x80xf32>
    %190 = arith.addf %187, %189 : vector<32x80xf32>
    %191 = vector.extract_strided_slice %124 {offsets = [16, 0], sizes = [32, 120], strides = [1, 1]} : vector<48x120xbf16> to vector<32x120xbf16>
    %cst_165 = arith.constant dense<0.000000e+00> : vector<32x80xf32>
    %192 = tpu.matmul %191, %61, %cst_165 {dimension_numbers = #tpu.dot_dimension_numbers<[1], [0], [0], [1], [0, 0, 1, 1], [], []>} : vector<32x120xbf16>, vector<120x80xbf16>, vector<32x80xf32> -> vector<32x80xf32>
    %193 = arith.addf %190, %192 : vector<32x80xf32>
    %cst_166 = arith.constant 0.000000e+00 : f32
    %194 = vector.broadcast %cst_166 : f32 to vector<32x80xf32>
    %195 = vector.extract_strided_slice %124 {offsets = [0, 0], sizes = [32, 120], strides = [1, 1]} : vector<48x120xbf16> to vector<32x120xbf16>
    %cst_167 = arith.constant dense<0.000000e+00> : vector<32x80xf32>
    %196 = tpu.matmul %195, %63, %cst_167 {dimension_numbers = #tpu.dot_dimension_numbers<[1], [0], [0], [1], [0, 0, 1, 1], [], []>} : vector<32x120xbf16>, vector<120x80xbf16>, vector<32x80xf32> -> vector<32x80xf32>
    %197 = arith.addf %194, %196 : vector<32x80xf32>
    %198 = vector.extract_strided_slice %176 {offsets = [0, 0], sizes = [32, 120], strides = [1, 1]} : vector<48x120xbf16> to vector<32x120xbf16>
    %cst_168 = arith.constant dense<0.000000e+00> : vector<32x80xf32>
    %199 = tpu.matmul %198, %65, %cst_168 {dimension_numbers = #tpu.dot_dimension_numbers<[1], [0], [0], [1], [0, 0, 1, 1], [], []>} : vector<32x120xbf16>, vector<120x80xbf16>, vector<32x80xf32> -> vector<32x80xf32>
    %200 = arith.addf %197, %199 : vector<32x80xf32>
    %201 = vector.extract_strided_slice %124 {offsets = [8, 0], sizes = [32, 120], strides = [1, 1]} : vector<48x120xbf16> to vector<32x120xbf16>
    %cst_169 = arith.constant dense<0.000000e+00> : vector<32x80xf32>
    %202 = tpu.matmul %201, %67, %cst_169 {dimension_numbers = #tpu.dot_dimension_numbers<[1], [0], [0], [1], [0, 0, 1, 1], [], []>} : vector<32x120xbf16>, vector<120x80xbf16>, vector<32x80xf32> -> vector<32x80xf32>
    %203 = arith.addf %200, %202 : vector<32x80xf32>
    %204 = vector.extract_strided_slice %176 {offsets = [8, 0], sizes = [32, 120], strides = [1, 1]} : vector<48x120xbf16> to vector<32x120xbf16>
    %cst_170 = arith.constant dense<0.000000e+00> : vector<32x80xf32>
    %205 = tpu.matmul %204, %69, %cst_170 {dimension_numbers = #tpu.dot_dimension_numbers<[1], [0], [0], [1], [0, 0, 1, 1], [], []>} : vector<32x120xbf16>, vector<120x80xbf16>, vector<32x80xf32> -> vector<32x80xf32>
    %206 = arith.addf %203, %205 : vector<32x80xf32>
    %207 = vector.extract_strided_slice %124 {offsets = [16, 0], sizes = [32, 120], strides = [1, 1]} : vector<48x120xbf16> to vector<32x120xbf16>
    %cst_171 = arith.constant dense<0.000000e+00> : vector<32x80xf32>
    %208 = tpu.matmul %207, %71, %cst_171 {dimension_numbers = #tpu.dot_dimension_numbers<[1], [0], [0], [1], [0, 0, 1, 1], [], []>} : vector<32x120xbf16>, vector<120x80xbf16>, vector<32x80xf32> -> vector<32x80xf32>
    %209 = arith.addf %206, %208 : vector<32x80xf32>
    %210 = arith.maximumf %193, %209 : vector<32x80xf32>
    %cst_172 = arith.constant 0.000000e+00 : f32
    %211 = vector.broadcast %cst_172 : f32 to vector<32x80xf32>
    %212 = vector.extract_strided_slice %176 {offsets = [0, 0], sizes = [32, 120], strides = [1, 1]} : vector<48x120xbf16> to vector<32x120xbf16>
    %cst_173 = arith.constant dense<0.000000e+00> : vector<32x80xf32>
    %213 = tpu.matmul %212, %53, %cst_173 {dimension_numbers = #tpu.dot_dimension_numbers<[1], [0], [0], [1], [0, 0, 1, 1], [], []>} : vector<32x120xbf16>, vector<120x80xbf16>, vector<32x80xf32> -> vector<32x80xf32>
    %214 = arith.addf %211, %213 : vector<32x80xf32>
    %215 = vector.extract_strided_slice %124 {offsets = [8, 0], sizes = [32, 120], strides = [1, 1]} : vector<48x120xbf16> to vector<32x120xbf16>
    %cst_174 = arith.constant dense<0.000000e+00> : vector<32x80xf32>
    %216 = tpu.matmul %215, %55, %cst_174 {dimension_numbers = #tpu.dot_dimension_numbers<[1], [0], [0], [1], [0, 0, 1, 1], [], []>} : vector<32x120xbf16>, vector<120x80xbf16>, vector<32x80xf32> -> vector<32x80xf32>
    %217 = arith.addf %214, %216 : vector<32x80xf32>
    %218 = vector.extract_strided_slice %176 {offsets = [8, 0], sizes = [32, 120], strides = [1, 1]} : vector<48x120xbf16> to vector<32x120xbf16>
    %cst_175 = arith.constant dense<0.000000e+00> : vector<32x80xf32>
    %219 = tpu.matmul %218, %57, %cst_175 {dimension_numbers = #tpu.dot_dimension_numbers<[1], [0], [0], [1], [0, 0, 1, 1], [], []>} : vector<32x120xbf16>, vector<120x80xbf16>, vector<32x80xf32> -> vector<32x80xf32>
    %220 = arith.addf %217, %219 : vector<32x80xf32>
    %221 = vector.extract_strided_slice %124 {offsets = [16, 0], sizes = [32, 120], strides = [1, 1]} : vector<48x120xbf16> to vector<32x120xbf16>
    %cst_176 = arith.constant dense<0.000000e+00> : vector<32x80xf32>
    %222 = tpu.matmul %221, %59, %cst_176 {dimension_numbers = #tpu.dot_dimension_numbers<[1], [0], [0], [1], [0, 0, 1, 1], [], []>} : vector<32x120xbf16>, vector<120x80xbf16>, vector<32x80xf32> -> vector<32x80xf32>
    %223 = arith.addf %220, %222 : vector<32x80xf32>
    %224 = vector.extract_strided_slice %176 {offsets = [16, 0], sizes = [32, 120], strides = [1, 1]} : vector<48x120xbf16> to vector<32x120xbf16>
    %cst_177 = arith.constant dense<0.000000e+00> : vector<32x80xf32>
    %225 = tpu.matmul %224, %61, %cst_177 {dimension_numbers = #tpu.dot_dimension_numbers<[1], [0], [0], [1], [0, 0, 1, 1], [], []>} : vector<32x120xbf16>, vector<120x80xbf16>, vector<32x80xf32> -> vector<32x80xf32>
    %226 = arith.addf %223, %225 : vector<32x80xf32>
    %227 = arith.maximumf %210, %226 : vector<32x80xf32>
    %cst_178 = arith.constant 0.000000e+00 : f32
    %228 = vector.broadcast %cst_178 : f32 to vector<32x80xf32>
    %229 = vector.extract_strided_slice %176 {offsets = [0, 0], sizes = [32, 120], strides = [1, 1]} : vector<48x120xbf16> to vector<32x120xbf16>
    %cst_179 = arith.constant dense<0.000000e+00> : vector<32x80xf32>
    %230 = tpu.matmul %229, %63, %cst_179 {dimension_numbers = #tpu.dot_dimension_numbers<[1], [0], [0], [1], [0, 0, 1, 1], [], []>} : vector<32x120xbf16>, vector<120x80xbf16>, vector<32x80xf32> -> vector<32x80xf32>
    %231 = arith.addf %228, %230 : vector<32x80xf32>
    %232 = vector.extract_strided_slice %124 {offsets = [8, 0], sizes = [32, 120], strides = [1, 1]} : vector<48x120xbf16> to vector<32x120xbf16>
    %cst_180 = arith.constant dense<0.000000e+00> : vector<32x80xf32>
    %233 = tpu.matmul %232, %65, %cst_180 {dimension_numbers = #tpu.dot_dimension_numbers<[1], [0], [0], [1], [0, 0, 1, 1], [], []>} : vector<32x120xbf16>, vector<120x80xbf16>, vector<32x80xf32> -> vector<32x80xf32>
    %234 = arith.addf %231, %233 : vector<32x80xf32>
    %235 = vector.extract_strided_slice %176 {offsets = [8, 0], sizes = [32, 120], strides = [1, 1]} : vector<48x120xbf16> to vector<32x120xbf16>
    %cst_181 = arith.constant dense<0.000000e+00> : vector<32x80xf32>
    %236 = tpu.matmul %235, %67, %cst_181 {dimension_numbers = #tpu.dot_dimension_numbers<[1], [0], [0], [1], [0, 0, 1, 1], [], []>} : vector<32x120xbf16>, vector<120x80xbf16>, vector<32x80xf32> -> vector<32x80xf32>
    %237 = arith.addf %234, %236 : vector<32x80xf32>
    %238 = vector.extract_strided_slice %124 {offsets = [16, 0], sizes = [32, 120], strides = [1, 1]} : vector<48x120xbf16> to vector<32x120xbf16>
    %cst_182 = arith.constant dense<0.000000e+00> : vector<32x80xf32>
    %239 = tpu.matmul %238, %69, %cst_182 {dimension_numbers = #tpu.dot_dimension_numbers<[1], [0], [0], [1], [0, 0, 1, 1], [], []>} : vector<32x120xbf16>, vector<120x80xbf16>, vector<32x80xf32> -> vector<32x80xf32>
    %240 = arith.addf %237, %239 : vector<32x80xf32>
    %241 = vector.extract_strided_slice %176 {offsets = [16, 0], sizes = [32, 120], strides = [1, 1]} : vector<48x120xbf16> to vector<32x120xbf16>
    %cst_183 = arith.constant dense<0.000000e+00> : vector<32x80xf32>
    %242 = tpu.matmul %241, %71, %cst_183 {dimension_numbers = #tpu.dot_dimension_numbers<[1], [0], [0], [1], [0, 0, 1, 1], [], []>} : vector<32x120xbf16>, vector<120x80xbf16>, vector<32x80xf32> -> vector<32x80xf32>
    %243 = arith.addf %240, %242 : vector<32x80xf32>
    %244 = arith.maximumf %227, %243 : vector<32x80xf32>
    %245 = vector.broadcast %177 : vector<1x80xf32> to vector<32x80xf32>
    %246 = arith.addf %244, %245 : vector<32x80xf32>
    %cst_184 = arith.constant 0.000000e+00 : f32
    %247 = vector.broadcast %cst_184 : f32 to vector<32x80xf32>
    %248 = arith.maximumf %246, %247 : vector<32x80xf32>
    %249 = arith.truncf %248 : vector<32x80xf32> to vector<32x80xbf16>
    %cst_185 = arith.constant 0.000000e+00 : f32
    %250 = vector.broadcast %cst_185 : f32 to vector<8x50xf32>
    %251 = vector.extract_strided_slice %249 {offsets = [0, 0], sizes = [8, 80], strides = [1, 1]} : vector<32x80xbf16> to vector<8x80xbf16>
    %c0_186 = arith.constant 0 : index
    %c0_187 = arith.constant 0 : index
    %c0_188 = arith.constant 0 : index
    %252 = vector.load %arg6[%c0_186, %c0_187, %c0_188] : memref<4x80x50xbf16, #tpu.memory_space<vmem>>, vector<1x80x50xbf16>
    %253 = vector.shape_cast %252 : vector<1x80x50xbf16> to vector<80x50xbf16>
    %cst_189 = arith.constant dense<0.000000e+00> : vector<8x50xf32>
    %254 = tpu.matmul %251, %253, %cst_189 {dimension_numbers = #tpu.dot_dimension_numbers<[1], [0], [0], [1], [0, 0, 1, 1], [], []>} : vector<8x80xbf16>, vector<80x50xbf16>, vector<8x50xf32> -> vector<8x50xf32>
    %255 = arith.addf %250, %254 : vector<8x50xf32>
    %256 = vector.extract_strided_slice %249 {offsets = [8, 0], sizes = [8, 80], strides = [1, 1]} : vector<32x80xbf16> to vector<8x80xbf16>
    %c1_190 = arith.constant 1 : index
    %c0_191 = arith.constant 0 : index
    %c0_192 = arith.constant 0 : index
    %257 = vector.load %arg6[%c1_190, %c0_191, %c0_192] : memref<4x80x50xbf16, #tpu.memory_space<vmem>>, vector<1x80x50xbf16>
    %258 = vector.shape_cast %257 : vector<1x80x50xbf16> to vector<80x50xbf16>
    %cst_193 = arith.constant dense<0.000000e+00> : vector<8x50xf32>
    %259 = tpu.matmul %256, %258, %cst_193 {dimension_numbers = #tpu.dot_dimension_numbers<[1], [0], [0], [1], [0, 0, 1, 1], [], []>} : vector<8x80xbf16>, vector<80x50xbf16>, vector<8x50xf32> -> vector<8x50xf32>
    %260 = arith.addf %255, %259 : vector<8x50xf32>
    %261 = vector.extract_strided_slice %249 {offsets = [16, 0], sizes = [8, 80], strides = [1, 1]} : vector<32x80xbf16> to vector<8x80xbf16>
    %c2_194 = arith.constant 2 : index
    %c0_195 = arith.constant 0 : index
    %c0_196 = arith.constant 0 : index
    %262 = vector.load %arg6[%c2_194, %c0_195, %c0_196] : memref<4x80x50xbf16, #tpu.memory_space<vmem>>, vector<1x80x50xbf16>
    %263 = vector.shape_cast %262 : vector<1x80x50xbf16> to vector<80x50xbf16>
    %cst_197 = arith.constant dense<0.000000e+00> : vector<8x50xf32>
    %264 = tpu.matmul %261, %263, %cst_197 {dimension_numbers = #tpu.dot_dimension_numbers<[1], [0], [0], [1], [0, 0, 1, 1], [], []>} : vector<8x80xbf16>, vector<80x50xbf16>, vector<8x50xf32> -> vector<8x50xf32>
    %265 = arith.addf %260, %264 : vector<8x50xf32>
    %266 = vector.extract_strided_slice %249 {offsets = [24, 0], sizes = [8, 80], strides = [1, 1]} : vector<32x80xbf16> to vector<8x80xbf16>
    %c3_198 = arith.constant 3 : index
    %c0_199 = arith.constant 0 : index
    %c0_200 = arith.constant 0 : index
    %267 = vector.load %arg6[%c3_198, %c0_199, %c0_200] : memref<4x80x50xbf16, #tpu.memory_space<vmem>>, vector<1x80x50xbf16>
    %268 = vector.shape_cast %267 : vector<1x80x50xbf16> to vector<80x50xbf16>
    %cst_201 = arith.constant dense<0.000000e+00> : vector<8x50xf32>
    %269 = tpu.matmul %266, %268, %cst_201 {dimension_numbers = #tpu.dot_dimension_numbers<[1], [0], [0], [1], [0, 0, 1, 1], [], []>} : vector<8x80xbf16>, vector<80x50xbf16>, vector<8x50xf32> -> vector<8x50xf32>
    %270 = arith.addf %265, %269 : vector<8x50xf32>
    %c0_202 = arith.constant 0 : index
    %c0_203 = arith.constant 0 : index
    %271 = vector.load %arg7[%c0_202, %c0_203] : memref<1x50xf32, #tpu.memory_space<vmem>>, vector<1x50xf32>
    %272 = vector.broadcast %271 : vector<1x50xf32> to vector<8x50xf32>
    %273 = arith.addf %270, %272 : vector<8x50xf32>
    %cst_204 = arith.constant 0.000000e+00 : f32
    %274 = vector.broadcast %cst_204 : f32 to vector<8x50xf32>
    %275 = arith.maximumf %273, %274 : vector<8x50xf32>
    %276 = arith.truncf %275 : vector<8x50xf32> to vector<8x50xbf16>
    %c0_205 = arith.constant 0 : index
    %c0_206 = arith.constant 0 : index
    %277 = vector.load %arg8[%c0_205, %c0_206] : memref<50x10xbf16, #tpu.memory_space<vmem>>, vector<50x10xbf16>
    %cst_207 = arith.constant dense<0.000000e+00> : vector<8x10xf32>
    %278 = tpu.matmul %276, %277, %cst_207 {dimension_numbers = #tpu.dot_dimension_numbers<[1], [0], [0], [1], [0, 0, 1, 1], [], []>} : vector<8x50xbf16>, vector<50x10xbf16>, vector<8x10xf32> -> vector<8x10xf32>
    %c0_208 = arith.constant 0 : index
    %c0_209 = arith.constant 0 : index
    %279 = vector.load %arg9[%c0_208, %c0_209] : memref<1x10xf32, #tpu.memory_space<vmem>>, vector<1x10xf32>
    %280 = vector.broadcast %279 : vector<1x10xf32> to vector<8x10xf32>
    %281 = arith.addf %278, %280 : vector<8x10xf32>
    %cst_210 = arith.constant dense<0xFF800000> : vector<8xf32>
    %282 = vector.multi_reduction <maximumf>, %281, %cst_210 [1] : vector<8x10xf32> to vector<8xf32>
    %283 = vector.shape_cast %282 : vector<8xf32> to vector<8x1xf32>
    %284 = vector.broadcast %283 : vector<8x1xf32> to vector<8x10xf32>
    %285 = arith.subf %281, %284 : vector<8x10xf32>
    %286 = math.exp %285 : vector<8x10xf32>
    %cst_211 = arith.constant dense<0.000000e+00> : vector<8xf32>
    %287 = vector.multi_reduction <add>, %286, %cst_211 [1] : vector<8x10xf32> to vector<8xf32>
    %288 = vector.shape_cast %287 : vector<8xf32> to vector<8x1xf32>
    %289 = math.log %288 : vector<8x1xf32>
    %290 = vector.broadcast %289 : vector<8x1xf32> to vector<8x10xf32>
    %291 = arith.subf %285, %290 : vector<8x10xf32>
    %c0_212 = arith.constant 0 : index
    %c0_213 = arith.constant 0 : index
    %292 = vector.load %arg10[%c0_212, %c0_213] : memref<8x10xf32, #tpu.memory_space<vmem>>, vector<8x10xf32>
    tpu.vector_store %arg10[%c0_212, %c0_213], %291 {strides = array<i32>} : memref<8x10xf32, #tpu.memory_space<vmem>>, vector<8x10xf32>,
    return
  }
  func.func @transform_0(%arg0: i32) -> (i32, i32, i32, i32) {
    %c0_i32 = arith.constant 0 : i32
    %c0_i32_0 = arith.constant 0 : i32
    %c0_i32_1 = arith.constant 0 : i32
    %c0_i32_2 = arith.constant 0 : i32
    return %c0_i32, %c0_i32_0, %arg0, %c0_i32_1 : i32, i32, i32, i32
  }
  func.func @transform_1(%arg0: i32) -> (i32, i32, i32, i32) {
    %c0_i32 = arith.constant 0 : i32
    %c0_i32_0 = arith.constant 0 : i32
    %c0_i32_1 = arith.constant 0 : i32
    %c0_i32_2 = arith.constant 0 : i32
    %c0_i32_3 = arith.constant 0 : i32
    return %c0_i32, %c0_i32_0, %c0_i32_1, %c0_i32_2 : i32, i32, i32, i32
  }
  func.func @transform_2(%arg0: i32) -> (i32, i32) {
    %c0_i32 = arith.constant 0 : i32
    %c0_i32_0 = arith.constant 0 : i32
    %c0_i32_1 = arith.constant 0 : i32
    return %c0_i32, %c0_i32_0 : i32, i32
  }
  func.func @transform_3(%arg0: i32) -> (i32, i32, i32, i32) {
    %c0_i32 = arith.constant 0 : i32
    %c0_i32_0 = arith.constant 0 : i32
    %c0_i32_1 = arith.constant 0 : i32
    %c0_i32_2 = arith.constant 0 : i32
    %c0_i32_3 = arith.constant 0 : i32
    return %c0_i32, %c0_i32_0, %c0_i32_1, %c0_i32_2 : i32, i32, i32, i32
  }
  func.func @transform_4(%arg0: i32) -> (i32, i32) {
    %c0_i32 = arith.constant 0 : i32
    %c0_i32_0 = arith.constant 0 : i32
    %c0_i32_1 = arith.constant 0 : i32
    return %c0_i32, %c0_i32_0 : i32, i32
  }
  func.func @transform_5(%arg0: i32) -> (i32, i32, i32) {
    %c0_i32 = arith.constant 0 : i32
    %c0_i32_0 = arith.constant 0 : i32
    %c0_i32_1 = arith.constant 0 : i32
    %c0_i32_2 = arith.constant 0 : i32
    return %c0_i32, %c0_i32_0, %c0_i32_1 : i32, i32, i32
  }
  func.func @transform_6(%arg0: i32) -> (i32, i32) {
    %c0_i32 = arith.constant 0 : i32
    %c0_i32_0 = arith.constant 0 : i32
    %c0_i32_1 = arith.constant 0 : i32
    return %c0_i32, %c0_i32_0 : i32, i32
  }
  func.func @transform_7(%arg0: i32) -> (i32, i32) {
    %c0_i32 = arith.constant 0 : i32
    %c0_i32_0 = arith.constant 0 : i32
    %c0_i32_1 = arith.constant 0 : i32
    return %c0_i32, %c0_i32_0 : i32, i32
  }
  func.func @transform_8(%arg0: i32) -> (i32, i32) {
    %c0_i32 = arith.constant 0 : i32
    %c0_i32_0 = arith.constant 0 : i32
    %c0_i32_1 = arith.constant 0 : i32
    return %c0_i32, %c0_i32_0 : i32, i32
  }
  func.func @transform_9(%arg0: i32) -> (i32, i32) {
    %c0_i32 = arith.constant 0 : i32
    %c0_i32_0 = arith.constant 0 : i32
    return %arg0, %c0_i32 : i32, i32
  }
}

</mosaic_0001>

<bundles_post_ra>
// kernel: net_forward.1
= control target key start
LH: loop header
LB: loop body
LE: loop exit
PB: predicated region body
PF: predicated region fallthrough
CT: control target
= control target key end

     0   :  { %v9845_v0 = vmov 0.0   ;;  %vm342_vm0 = vcmask 1045504   ;;  %vm7746_vm1 = vmmov 0   ;;  %vm332_vm2 = vcmask 228352   ;;  %s9835_s1 = inlined_call_operand.vmem [shape: bf16[2,5,28,120], index: 1, kind: input, shape index: {}]   ;;  %s9836_s0 = inlined_call_operand.vmem [shape: f32[4,7,8,28], index: 0, kind: input, shape index: {}]   ;;  %s9837_s2 = inlined_call_operand.vmem [shape: f32[1,120], index: 2, kind: input, shape index: {}]   ;;  %s9838_s3 = inlined_call_operand.vmem [shape: bf16[2,5,120,80], index: 3, kind: input, shape index: {}]   ;;  %s9839_s5 = inlined_call_operand.vmem [shape: bf16[4,80,50], index: 5, kind: input, shape index: {}]   ;;  %s9840_s4 = inlined_call_operand.vmem [shape: f32[1,80], index: 4, kind: input, shape index: {}]   ;;  %s9841_s7 = inlined_call_operand.vmem [shape: bf16[50,10], index: 7, kind: input, shape index: {}]   ;;  %s9842_s6 = inlined_call_operand.vmem [shape: f32[1,50], index: 6, kind: input, shape index: {}]   ;;  %s9843_s8 = inlined_call_operand.vmem [shape: f32[1,10], index: 8, kind: input, shape index: {}]   ;;  %s9844_s9 = inlined_call_operand.vmem [shape: f32[8,10], index: 9, kind: output, shape index: {}]  }
   0x1   :  { %6035 = vmatprep.subr.bf16.mxu0 %v9845_v0  ;;  %7143 = vmatprep.subr.bf16.mxu1 %v9845_v0  ;;  %v7802_v1 = vld [vmem:[%s9835_s1 + $0x10] sm:$0xff]   ;;  %v7616_v2 = vld [vmem:[%s9835_s1 + $0x18] sm:$0x3f]   ;;  %v7819_v4 = vld [vmem:[%s9836_s0 + $0x40] sm:$0xff]  ;;  %vm3084_vm3 = vcmask 1043456   ;;  %vm3077_vm4 = vcmask 982016  }
   0x2   :  { %6039 = vmatprep.mubr.msk.bf16.mxu0 %vm7746_vm1, %v9845_v0  ;;  %6047 = vmatprep.mubr.msk.bf16.mxu1 %vm7746_vm1, %v9845_v0  ;;  %v5070_v3 = vld [vmem:[%s9836_s0 + $0x38] sm:$0xff]  ;;  %v7829_v6 = vsel %vm342_vm0, %v7616_v2, 0  ;;  %v7834_v7 = vld [vmem:[%s9836_s0 + $0x60] sm:$0xff]  ;;  %v7618_v11 = vld [vmem:[%s9835_s1 + $0x68] sm:$0x3f]   ;;  %vm4670_vm5 = vcmask 654336  }
   0x3   :  { %6036 = vmatpush3.bf16.msra.mxu0 %v7802_v1  ;;  %7145 = vmatpush3.bf16.msra.mxu1 %v7802_v1  ;;  %v7824_v5 = vld [vmem:[%s9836_s0 + $0x58] sm:$0xff]  ;;  %v7837_v8 = vpack.c.bf16 %v7819_v4, %v5070_v3  ;;  %v7848_v10 = vld [vmem:[%s9835_s1 + $0x60] sm:$0xff]   ;;  %v7858_v12 = vld [vmem:[%s9836_s0 + $0x48] sm:$0xff]  ;;  %v7888_v18 = vsel %vm342_vm0, %v7618_v11, 0  ;;  %vm5008_vm6 = vcmask 1040384   ;;  %vm5004_vm7 = vcmask 408576  }
   0x4   :  { %6037 = vmatprep.subr.bf16.mxu0 %v9845_v0  ;;  %7144 = vmatprep.subr.bf16.mxu1 %v9845_v0  ;;  %v7841_v9 = vpack.c.bf16 %v7834_v7, %v7824_v5  ;;  %v7863_v13 = vld [vmem:[%s9835_s1] sm:$0xff]   ;;  %v7872_v14 = vld [vmem:[%s9836_s0 + $0x50] sm:$0xff]  ;;  %v7621_v15 = vld [vmem:[%s9835_s1 + $0x8] sm:$0x3f]   ;;  %vm5052_vm8 = vcmask 80896  }
   0x5   :  { %v34_v16 = vld [vmem:[%s9836_s0 + $0x8] sm:$0xff]  ;;  %v35_v17 = vld [vmem:[%s9836_s0 + $0x10] sm:$0xff]  ;;  %v36_v20 = vld [vmem:[%s9836_s0 + $0x18] sm:$0xff]  ;;  %v7903_v22 = vpack.c.bf16 %v7872_v14, %v7858_v12  ;;  %v7907_v23 = vsel %vm342_vm0, %v7621_v15, 0 }
   0x6   :  { %v7892_v19 = vpack.c.bf16 %v35_v17, %v34_v16  ;;  %v37_v21 = vld [vmem:[%s9836_s0 + $0x20] sm:$0xff]  ;;  %v7915_v25 = vld [vmem:[%s9835_s1 + $0x50] sm:$0xff]   ;;  %v7622_v26 = vld [vmem:[%s9835_s1 + $0x58] sm:$0x3f]   ;;  %v40_v38 = vpack.c.bf16 %v36_v20, %v35_v17 }
   0x7   :  { %6038 = vmatpush3.bf16.msra.mxu0 %v7829_v6  ;;  %7146 = vmatpush3.bf16.msra.mxu1 %v7829_v6  ;;  %v7909_v24 = vpack.c.bf16 %v37_v21, %v36_v20  ;;  %v33_v27 = vld [vmem:[%s9836_s0] sm:$0xff]  ;;  %v7936_v28 = vsel %vm342_vm0, %v7622_v26, 0  ;;  %v7630_v30 = vld [vmem:[%s9835_s1 + $0x88] sm:$0x3f]   ;;  %v7634_v35 = vld [vmem:[%s9835_s1 + $0x98] sm:$0x3f]  }
   0x8   :  { %6115 = vmatprep.subr.bf16.mxu1 %v9845_v0  ;;  %6051 = vmatprep.subr.bf16.mxu0 %v9845_v0  ;;  %v39_v29 = vpack.c.bf16 %v34_v16, %v33_v27  ;;  %v7946_v31 = vld [vmem:[%s9835_s1 + $0x20] sm:$0xff]   ;;  %v7625_v32 = vld [vmem:[%s9835_s1 + $0x28] sm:$0x3f]   ;;  %v7953_v33 = vsel %vm342_vm0, %v7630_v30, 0  ;;  %v7977_v39 = vsel %vm342_vm0, %v7634_v35, 0  ;;  %v7997_v42 = vld [vmem:[%s9835_s1 + $0x70] sm:$0xff]  }
   0x9   :  { %v7633_v34 = vld [vmem:[%s9835_s1 + $0x48] sm:$0x3f]   ;;  %v7971_v36 = vsel %vm342_vm0, %v7625_v32, 0  ;;  %v7626_v43 = vld [vmem:[%s9835_s1 + $0x78] sm:$0x3f]   ;;  %v5076_v44 = vld [vmem:[%s9836_s0 + $0x70] sm:$0xff] }
   0xa   :  { %6040 = vmatmul.mubr.msk.bf16.vlgmr.msra.gmra.mrb[0].mxu0 %vm332_vm2, %v7837_v8  ;;  %6048 = vmatmul.mubr.msk.bf16.vlgmr.msra.gmra.mrb[0].mxu1 %vm332_vm2, %v7841_v9  ;;  %v7974_v37 = vsel %vm342_vm0, %v7633_v34, 0  ;;  %v7991_v40 = vld [vmem:[%s9836_s0 + $0x28] sm:$0xff]  ;;  %v8013_v45 = vld [vmem:[%s9836_s0 + $0x78] sm:$0xff]  ;;  %v8019_v46 = vsel %vm342_vm0, %v7626_v43, 0  ;;  %v8028_v48 = vld [vmem:[%s9835_s1 + $0x30] sm:$0xff]  }
   0xb   :  { %6116 = vmatpush3.bf16.msra.mxu1 %v7848_v10  ;;  %6043 = vmatprep.mubr.msk.bf16.mxu0 %vm7746_vm1, %v9845_v0  ;;  %v41_v41 = vpack.c.bf16 %v7991_v40, %v37_v21  ;;  %v8022_v47 = vpack.c.bf16 %v8013_v45, %v5076_v44  ;;  %v7629_v49 = vld [vmem:[%s9835_s1 + $0x38] sm:$0x3f]   ;;  %v8044_v50 = vld [vmem:[%s9836_s0 + $0x80] sm:$0xff]  ;;  %v8049_v51 = vld [vmem:[%s9836_s0 + $0x88] sm:$0xff] }
   0xc   :  { %6117 = vmatprep.subr.bf16.mxu1 %v9845_v0  ;;  %6119 = vmatprep.mubr.msk.bf16.mxu1 %vm7746_vm1, %v9845_v0  ;;  %v8054_v52 = vsel %vm342_vm0, %v7629_v49, 0  ;;  %v8058_v53 = vpack.c.bf16 %v8049_v51, %v8044_v50  ;;  %v8072_v54 = vld [vmem:[%s9836_s0 + $0x90] sm:$0xff]  ;;  %v8077_v55 = vld [vmem:[%s9836_s0 + $0x98] sm:$0xff]  ;;  %v8086_v57 = vld [vmem:[%s9835_s1 + $0x80] sm:$0xff]  }
   0xd   :  { %6052 = vmatpush3.bf16.msra.mxu0 %v7863_v13  ;;  %v8081_v56 = vpack.c.bf16 %v8077_v55, %v8072_v54  ;;  %v5082_v58 = vld [vmem:[%s9836_s0 + $0xa8] sm:$0xff]  ;;  %v8101_v59 = vld [vmem:[%s9836_s0 + $0xb0] sm:$0xff]  ;;  %v8113_v61 = vld [vmem:[%s9835_s1 + $0x40] sm:$0xff]  }
   0xe   :  { %6053 = vmatprep.subr.bf16.mxu0 %v9845_v0  ;;  %v8107_v60 = vpack.c.bf16 %v8101_v59, %v5082_v58  ;;  %v8127_v62 = vld [vmem:[%s9836_s0 + $0xb8] sm:$0xff]  ;;  %v8132_v63 = vld [vmem:[%s9836_s0 + $0xc0] sm:$0xff]  ;;  %v8153_v3 = vld [vmem:[%s9836_s0 + $0xc8] sm:$0xff] }
   0xf   :  { %6118 = vmatpush3.bf16.msra.mxu1 %v7888_v18  ;;  %v8138_v2 = vpack.c.bf16 %v8132_v63, %v8127_v62  ;;  %v8158_v11 = vld [vmem:[%s9836_s0 + $0xd0] sm:$0xff] }
  0x10   :  { %6131 = vmatprep.subr.bf16.mxu1 %v9845_v0  ;;  %v8162_v15 = vpack.c.bf16 %v8158_v11, %v8153_v3  ;;  %v8167_v16 = vld [vmem:[%s9835_s1 + $0x90] sm:$0xff]  }
  0x11   :  { %6054 = vmatpush3.bf16.msra.mxu0 %v7907_v23  ;;  %v5093_v17 = vld [vmem:[%s9836_s0 + $0x30] sm:$0xff] }
  0x12   :  { %6044 = vmatmul.mubr.msk.bf16.gmra.mrb[4].mxu0 %vm332_vm2, %v7903_v22  ;;  %6120 = vmatmul.mubr.msk.bf16.vlgmr.msra.gmra.mrb[4].mxu1 %vm332_vm2, %v7837_v8  ;;  %v8205_v20 = vpack.c.bf16 %v5093_v17, %v7991_v40 }
  0x13   :  { %6132 = vmatpush3.bf16.msra.mxu1 %v7915_v25  ;;  %6055 = vmatprep.mubr.msk.bf16.mxu0 %vm7746_vm1, %v9845_v0 }
  0x14   :  { %6123 = vmatprep.mubr.msk.bf16.mxu1 %vm7746_vm1, %v9845_v0  ;;  %6133 = vmatprep.subr.bf16.mxu1 %v9845_v0 }
  0x15   :  { %6067 = vmatprep.subr.bf16.mxu0 %v9845_v0 }
  0x17   :  { %6134 = vmatpush3.bf16.msra.mxu1 %v7936_v28 }
  0x18   :  { %6147 = vmatprep.subr.bf16.mxu1 %v9845_v0 }
  0x1a   :  { %6056 = vmatmul.mubr.msk.bf16.vlgmr.msra.gmra.mrb[0].mxu0 %vm332_vm2, %v39_v29  ;;  %6124 = vmatmul.mubr.msk.bf16.gmra.mrb[8].mxu1 %vm332_vm2, %v7903_v22 }
  0x1b   :  { %6059 = vmatprep.mubr.msk.bf16.mxu0 %vm7746_vm1, %v9845_v0  ;;  %6127 = vmatprep.mubr.msk.bf16.mxu1 %vm7746_vm1, %v9845_v0 }
  0x1c   :  { %6068 = vmatpush3.bf16.msra.mxu0 %v7946_v31 }
  0x1d   :  { %6069 = vmatprep.subr.bf16.mxu0 %v9845_v0 }
  0x20   :  { %6070 = vmatpush3.bf16.msra.mxu0 %v7971_v36 }
  0x21   :  { %6083 = vmatprep.subr.bf16.mxu0 %v9845_v0 }
  0x22   :  { %6060 = vmatmul.mubr.msk.bf16.gmra.mrb[4].mxu0 %vm332_vm2, %v40_v38  ;;  %6128 = vmatmul.mubr.msk.bf16.gmra.mrb[12].mxu1 %vm332_vm2, %v7841_v9 }
  0x23   :  { %6063 = vmatprep.mubr.msk.bf16.mxu0 %vm7746_vm1, %v9845_v0  ;;  %6135 = vmatprep.mubr.msk.bf16.mxu1 %vm7746_vm1, %v9845_v0 }
  0x2a   :  { %6064 = vmatmul.mubr.msk.bf16.gmra.mrb[8].mxu0 %vm332_vm2, %v41_v41  ;;  %6136 = vmatmul.mubr.msk.bf16.vlgmr.msra.gmra.mrb[4].mxu1 %vm332_vm2, %v39_v29 }
  0x2b   :  { %6148 = vmatpush3.bf16.msra.mxu1 %v7997_v42  ;;  %6071 = vmatprep.mubr.msk.bf16.mxu0 %vm7746_vm1, %v9845_v0 }
  0x2c   :  { %6139 = vmatprep.mubr.msk.bf16.mxu1 %vm7746_vm1, %v9845_v0  ;;  %6149 = vmatprep.subr.bf16.mxu1 %v9845_v0 }
  0x2f   :  { %6150 = vmatpush3.bf16.msra.mxu1 %v8019_v46 }
  0x30   :  { %6163 = vmatprep.subr.bf16.mxu1 %v9845_v0 }
  0x32   :  { %6072 = vmatmul.mubr.msk.bf16.vlgmr.msra.gmra.mrb[0].mxu0 %vm332_vm2, %v8022_v47  ;;  %6140 = vmatmul.mubr.msk.bf16.gmra.mrb[8].mxu1 %vm332_vm2, %v40_v38 }
  0x33   :  { %6075 = vmatprep.mubr.msk.bf16.mxu0 %vm7746_vm1, %v9845_v0  ;;  %6143 = vmatprep.mubr.msk.bf16.mxu1 %vm7746_vm1, %v9845_v0 }
  0x34   :  { %6084 = vmatpush3.bf16.msra.mxu0 %v8028_v48 }
  0x35   :  { %6085 = vmatprep.subr.bf16.mxu0 %v9845_v0 }
  0x38   :  { %6086 = vmatpush3.bf16.msra.mxu0 %v8054_v52 }
  0x39   :  { %6099 = vmatprep.subr.bf16.mxu0 %v9845_v0 }
  0x3a   :  { %6076 = vmatmul.mubr.msk.bf16.gmra.mrb[4].mxu0 %vm332_vm2, %v8058_v53  ;;  %6144 = vmatmul.mubr.msk.bf16.gmra.mrb[12].mxu1 %vm332_vm2, %v41_v41 }
  0x3b   :  { %6079 = vmatprep.mubr.msk.bf16.mxu0 %vm7746_vm1, %v9845_v0  ;;  %6151 = vmatprep.mubr.msk.bf16.mxu1 %vm7746_vm1, %v9845_v0 }
  0x42   :  { %6080 = vmatmul.mubr.msk.bf16.gmra.mrb[8].mxu0 %vm332_vm2, %v8081_v56  ;;  %6152 = vmatmul.mubr.msk.bf16.vlgmr.msra.gmra.mrb[4].mxu1 %vm332_vm2, %v8022_v47 }
  0x43   :  { %6164 = vmatpush3.bf16.msra.mxu1 %v8086_v57  ;;  %6087 = vmatprep.mubr.msk.bf16.mxu0 %vm7746_vm1, %v9845_v0 }
  0x44   :  { %6155 = vmatprep.mubr.msk.bf16.mxu1 %vm7746_vm1, %v9845_v0  ;;  %6165 = vmatprep.subr.bf16.mxu1 %v9845_v0 }
  0x47   :  { %6166 = vmatpush3.bf16.msra.mxu1 %v7953_v33 }
  0x48   :  { %6179 = vmatprep.subr.bf16.mxu1 %v9845_v0 }
  0x4a   :  { %6088 = vmatmul.mubr.msk.bf16.vlgmr.msra.gmra.mrb[0].mxu0 %vm332_vm2, %v8107_v60  ;;  %6156 = vmatmul.mubr.msk.bf16.gmra.mrb[8].mxu1 %vm332_vm2, %v8058_v53 }
  0x4b   :  { %6091 = vmatprep.mubr.msk.bf16.mxu0 %vm7746_vm1, %v9845_v0  ;;  %6159 = vmatprep.mubr.msk.bf16.mxu1 %vm7746_vm1, %v9845_v0 }
  0x4c   :  { %6100 = vmatpush3.bf16.msra.mxu0 %v8113_v61 }
  0x4d   :  { %6101 = vmatprep.subr.bf16.mxu0 %v9845_v0 }
  0x50   :  { %6102 = vmatpush3.bf16.msra.mxu0 %v7974_v37 }
  0x51   :  { %6195 = vmatprep.subr.bf16.mxu0 %v9845_v0 }
  0x52   :  { %6092 = vmatmul.mubr.msk.bf16.gmra.mrb[4].mxu0 %vm332_vm2, %v8138_v2  ;;  %6160 = vmatmul.mubr.msk.bf16.gmra.mrb[12].mxu1 %vm332_vm2, %v8081_v56 }
  0x53   :  { %6095 = vmatprep.mubr.msk.bf16.mxu0 %vm7746_vm1, %v9845_v0  ;;  %6167 = vmatprep.mubr.msk.bf16.mxu1 %vm7746_vm1, %v9845_v0 }
  0x5a   :  { %6096 = vmatmul.mubr.msk.bf16.gmra.mrb[8].mxu0 %vm332_vm2, %v8162_v15  ;;  %6168 = vmatmul.mubr.msk.bf16.vlgmr.msra.gmra.mrb[4].mxu1 %vm332_vm2, %v8107_v60 }
  0x5b   :  { %6180 = vmatpush3.bf16.msra.mxu1 %v8167_v16  ;;  %6103 = vmatprep.mubr.msk.bf16.mxu0 %vm7746_vm1, %v9845_v0 }
  0x5c   :  { %6171 = vmatprep.mubr.msk.bf16.mxu1 %vm7746_vm1, %v9845_v0  ;;  %6181 = vmatprep.subr.bf16.mxu1 %v9845_v0 }
  0x5f   :  { %6182 = vmatpush3.bf16.msra.mxu1 %v7977_v39 }
  0x60   :  { %6275 = vmatprep.subr.bf16.mxu1 %v9845_v0 }
  0x62   :  { %6104 = vmatmul.mubr.msk.bf16.vlgmr.msra.gmra.mrb[0].mxu0 %vm332_vm2, %v7892_v19  ;;  %6172 = vmatmul.mubr.msk.bf16.gmra.mrb[8].mxu1 %vm332_vm2, %v8138_v2 }
  0x63   :  { %6107 = vmatprep.mubr.msk.bf16.mxu0 %vm7746_vm1, %v9845_v0  ;;  %6175 = vmatprep.mubr.msk.bf16.mxu1 %vm7746_vm1, %v9845_v0 }
  0x64   :  { %6196 = vmatpush3.bf16.msra.mxu0 %v7802_v1 }
  0x65   :  { %6197 = vmatprep.subr.bf16.mxu0 %v9845_v0 }
  0x68   :  { %6198 = vmatpush3.bf16.msra.mxu0 %v7829_v6 }
  0x69   :  { %6211 = vmatprep.subr.bf16.mxu0 %v9845_v0 }
  0x6a   :  { %6108 = vmatmul.mubr.msk.bf16.gmra.mrb[4].mxu0 %vm332_vm2, %v7909_v24  ;;  %6176 = vmatmul.mubr.msk.bf16.gmra.mrb[12].mxu1 %vm332_vm2, %v8162_v15 }
  0x6b   :  { %6111 = vmatprep.mubr.msk.bf16.mxu0 %vm7746_vm1, %v9845_v0  ;;  %6183 = vmatprep.mubr.msk.bf16.mxu1 %vm7746_vm1, %v9845_v0 }
  0x72   :  { %6112 = vmatmul.mubr.msk.bf16.gmra.mrb[8].mxu0 %vm332_vm2, %v8205_v20  ;;  %6184 = vmatmul.mubr.msk.bf16.vlgmr.msra.gmra.mrb[4].mxu1 %vm332_vm2, %v7892_v19 }
  0x73   :  { %6276 = vmatpush3.bf16.msra.mxu1 %v7848_v10  ;;  %6187 = vmatprep.mubr.msk.bf16.mxu1 %vm7746_vm1, %v9845_v0 }
  0x74   :  { %6199 = vmatprep.mubr.msk.bf16.mxu0 %vm7746_vm1, %v9845_v0  ;;  %6277 = vmatprep.subr.bf16.mxu1 %v9845_v0 }
  0x77   :  { %6278 = vmatpush3.bf16.msra.mxu1 %v7888_v18 }
  0x78   :  { %6291 = vmatprep.subr.bf16.mxu1 %v9845_v0 }
  0x7a   :  { %6188 = vmatmul.mubr.msk.bf16.gmra.mrb[8].mxu1 %vm332_vm2, %v7909_v24  ;;  %6200 = vmatmul.mubr.msk.bf16.vlgmr.msra.gmra.mrb[12].mxu0 %vm332_vm2, %v8022_v47 }
  0x7b   :  { %6191 = vmatprep.mubr.msk.bf16.mxu1 %vm7746_vm1, %v9845_v0  ;;  %6203 = vmatprep.mubr.msk.bf16.mxu0 %vm7746_vm1, %v9845_v0 }
  0x7c   :  { %6212 = vmatpush3.bf16.msra.mxu0 %v7863_v13 }
  0x7d   :  { %6213 = vmatprep.subr.bf16.mxu0 %v9845_v0 }
  0x80   :  { %6214 = vmatpush3.bf16.msra.mxu0 %v7907_v23 }
  0x81   :  { %6227 = vmatprep.subr.bf16.mxu0 %v9845_v0 }
  0x82   :  { %6192 = vmatmul.mubr.msk.bf16.gmra.mrb[12].mxu1 %vm332_vm2, %v8205_v20  ;;  %6204 = vmatmul.mubr.msk.bf16.gmra.mrb[16].mxu0 %vm332_vm2, %v8058_v53 }
  0x83   :  { %6207 = vmatprep.mubr.msk.bf16.mxu0 %vm7746_vm1, %v9845_v0  ;;  %6279 = vmatprep.mubr.msk.bf16.mxu1 %vm7746_vm1, %v9845_v0 }
  0x8a   :  { %6208 = vmatmul.mubr.msk.bf16.gmra.mrb[20].mxu0 %vm332_vm2, %v8081_v56  ;;  %6280 = vmatmul.mubr.msk.bf16.vlgmr.msra.gmra.mrb[16].mxu1 %vm332_vm2, %v8022_v47 }
  0x8b   :  { %6292 = vmatpush3.bf16.msra.mxu1 %v7915_v25  ;;  %6215 = vmatprep.mubr.msk.bf16.mxu0 %vm7746_vm1, %v9845_v0 }
  0x8c   :  { %6283 = vmatprep.mubr.msk.bf16.mxu1 %vm7746_vm1, %v9845_v0  ;;  %6293 = vmatprep.subr.bf16.mxu1 %v9845_v0 }
  0x8f   :  { %6294 = vmatpush3.bf16.msra.mxu1 %v7936_v28 }
  0x90   :  { %6307 = vmatprep.subr.bf16.mxu1 %v9845_v0 }
  0x92   :  { %6216 = vmatmul.mubr.msk.bf16.vlgmr.msra.gmra.mrb[12].mxu0 %vm332_vm2, %v7837_v8  ;;  %6284 = vmatmul.mubr.msk.bf16.gmra.mrb[20].mxu1 %vm332_vm2, %v8058_v53 }
  0x93   :  { %6219 = vmatprep.mubr.msk.bf16.mxu0 %vm7746_vm1, %v9845_v0  ;;  %6287 = vmatprep.mubr.msk.bf16.mxu1 %vm7746_vm1, %v9845_v0 }
  0x94   :  { %6228 = vmatpush3.bf16.msra.mxu0 %v7946_v31 }
  0x95   :  { %6229 = vmatprep.subr.bf16.mxu0 %v9845_v0 }
  0x98   :  { %6230 = vmatpush3.bf16.msra.mxu0 %v7971_v36 }
  0x99   :  { %6243 = vmatprep.subr.bf16.mxu0 %v9845_v0 }
  0x9a   :  { %6220 = vmatmul.mubr.msk.bf16.gmra.mrb[16].mxu0 %vm332_vm2, %v7903_v22  ;;  %6288 = vmatmul.mubr.msk.bf16.gmra.mrb[24].mxu1 %vm332_vm2, %v8081_v56 }
  0x9b   :  { %6223 = vmatprep.mubr.msk.bf16.mxu0 %vm7746_vm1, %v9845_v0  ;;  %6295 = vmatprep.mubr.msk.bf16.mxu1 %vm7746_vm1, %v9845_v0 }
  0xa2   :  { %6224 = vmatmul.mubr.msk.bf16.gmra.mrb[20].mxu0 %vm332_vm2, %v7841_v9  ;;  %6296 = vmatmul.mubr.msk.bf16.vlgmr.msra.gmra.mrb[16].mxu1 %vm332_vm2, %v7837_v8  ;;  %v8347_v8 = vpack.c.bf16 %v7858_v12, %v7819_v4  ;;  %v8365_v12 = vpack.c.bf16 %v7824_v5, %v7872_v14  ;;  %v5099_v5 = vld [vmem:[%s9836_s0 + $0x68] sm:$0xff] }
  0xa3   :  { %6308 = vmatpush3.bf16.msra.mxu1 %v7997_v42  ;;  %6231 = vmatprep.mubr.msk.bf16.mxu0 %vm7746_vm1, %v9845_v0  ;;  %v8383_v14 = vpack.c.bf16 %v5099_v5, %v7834_v7  ;;  %v8551_v5 = vpack.c.bf16 %v8044_v50, %v8013_v45 }
  0xa4   :  { %6299 = vmatprep.mubr.msk.bf16.mxu1 %vm7746_vm1, %v9845_v0  ;;  %6309 = vmatprep.subr.bf16.mxu1 %v9845_v0 }
  0xa7   :  { %6310 = vmatpush3.bf16.msra.mxu1 %v8019_v46 }
  0xa8   :  { %6323 = vmatprep.subr.bf16.mxu1 %v9845_v0 }
  0xaa   :  { %6232 = vmatmul.mubr.msk.bf16.vlgmr.msra.gmra.mrb[12].mxu0 %vm332_vm2, %v8107_v60  ;;  %6300 = vmatmul.mubr.msk.bf16.gmra.mrb[20].mxu1 %vm332_vm2, %v7903_v22 }
  0xab   :  { %6235 = vmatprep.mubr.msk.bf16.mxu0 %vm7746_vm1, %v9845_v0  ;;  %6303 = vmatprep.mubr.msk.bf16.mxu1 %vm7746_vm1, %v9845_v0 }
  0xac   :  { %6244 = vmatpush3.bf16.msra.mxu0 %v8028_v48 }
  0xad   :  { %6245 = vmatprep.subr.bf16.mxu0 %v9845_v0 }
  0xb0   :  { %6246 = vmatpush3.bf16.msra.mxu0 %v8054_v52 }
  0xb1   :  { %6259 = vmatprep.subr.bf16.mxu0 %v9845_v0 }
  0xb2   :  { %6236 = vmatmul.mubr.msk.bf16.gmra.mrb[16].mxu0 %vm332_vm2, %v8138_v2  ;;  %6304 = vmatmul.mubr.msk.bf16.gmra.mrb[24].mxu1 %vm332_vm2, %v7841_v9 }
  0xb3   :  { %6239 = vmatprep.mubr.msk.bf16.mxu0 %vm7746_vm1, %v9845_v0  ;;  %6311 = vmatprep.mubr.msk.bf16.mxu1 %vm7746_vm1, %v9845_v0 }
  0xba   :  { %6240 = vmatmul.mubr.msk.bf16.gmra.mrb[20].mxu0 %vm332_vm2, %v8162_v15  ;;  %6312 = vmatmul.mubr.msk.bf16.vlgmr.msra.gmra.mrb[16].mxu1 %vm332_vm2, %v8107_v60 }
  0xbb   :  { %6324 = vmatpush3.bf16.msra.mxu1 %v8086_v57  ;;  %6247 = vmatprep.mubr.msk.bf16.mxu0 %vm7746_vm1, %v9845_v0 }
  0xbc   :  { %6315 = vmatprep.mubr.msk.bf16.mxu1 %vm7746_vm1, %v9845_v0  ;;  %6325 = vmatprep.subr.bf16.mxu1 %v9845_v0 }
  0xbf   :  { %6326 = vmatpush3.bf16.msra.mxu1 %v7953_v33 }
  0xc0   :  { %6339 = vmatprep.subr.bf16.mxu1 %v9845_v0 }
  0xc2   :  { %6248 = vmatmul.mubr.msk.bf16.vlgmr.msra.gmra.mrb[12].mxu0 %vm332_vm2, %v7892_v19  ;;  %6316 = vmatmul.mubr.msk.bf16.gmra.mrb[20].mxu1 %vm332_vm2, %v8138_v2 }
  0xc3   :  { %6251 = vmatprep.mubr.msk.bf16.mxu0 %vm7746_vm1, %v9845_v0  ;;  %6319 = vmatprep.mubr.msk.bf16.mxu1 %vm7746_vm1, %v9845_v0 }
  0xc4   :  { %6260 = vmatpush3.bf16.msra.mxu0 %v8113_v61 }
  0xc5   :  { %6261 = vmatprep.subr.bf16.mxu0 %v9845_v0 }
  0xc8   :  { %6262 = vmatpush3.bf16.msra.mxu0 %v7974_v37 }
  0xc9   :  { %6355 = vmatprep.subr.bf16.mxu0 %v9845_v0 }
  0xca   :  { %6252 = vmatmul.mubr.msk.bf16.gmra.mrb[16].mxu0 %vm332_vm2, %v7909_v24  ;;  %6320 = vmatmul.mubr.msk.bf16.gmra.mrb[24].mxu1 %vm332_vm2, %v8162_v15 }
  0xcb   :  { %6255 = vmatprep.mubr.msk.bf16.mxu0 %vm7746_vm1, %v9845_v0  ;;  %6327 = vmatprep.mubr.msk.bf16.mxu1 %vm7746_vm1, %v9845_v0 }
  0xd2   :  { %6256 = vmatmul.mubr.msk.bf16.gmra.mrb[20].mxu0 %vm332_vm2, %v8205_v20  ;;  %6328 = vmatmul.mubr.msk.bf16.vlgmr.msra.gmra.mrb[16].mxu1 %vm332_vm2, %v7892_v19 }
  0xd3   :  { %6340 = vmatpush3.bf16.msra.mxu1 %v8167_v16  ;;  %6263 = vmatprep.mubr.msk.bf16.mxu0 %vm7746_vm1, %v9845_v0 }
  0xd4   :  { %6331 = vmatprep.mubr.msk.bf16.mxu1 %vm7746_vm1, %v9845_v0  ;;  %6341 = vmatprep.subr.bf16.mxu1 %v9845_v0 }
  0xd7   :  { %6342 = vmatpush3.bf16.msra.mxu1 %v7977_v39 }
  0xd8   :  { %6435 = vmatprep.subr.bf16.mxu1 %v9845_v0 }
  0xda   :  { %6264 = vmatmul.mubr.msk.bf16.vlgmr.msra.gmra.mrb[12].mxu0 %vm332_vm2, %v8347_v8  ;;  %6332 = vmatmul.mubr.msk.bf16.gmra.mrb[20].mxu1 %vm332_vm2, %v7909_v24 }
  0xdb   :  { %6267 = vmatprep.mubr.msk.bf16.mxu0 %vm7746_vm1, %v9845_v0  ;;  %6335 = vmatprep.mubr.msk.bf16.mxu1 %vm7746_vm1, %v9845_v0 }
  0xdc   :  { %6356 = vmatpush3.bf16.msra.mxu0 %v7802_v1 }
  0xdd   :  { %v8360_v4 = vpop.f32.mrb[0].mxu1  ;;  %6357 = vmatprep.subr.bf16.mxu0 %v9845_v0 }
  0xde   :  { %v6049_v9 = vpop.f32.mrb[1].mxu1 }
  0xdf   :  { %v8367_v21 = vpop.f32.mrb[2].mxu1 }
  0xe0   :  { %v6050_v22 = vpop.f32.mrb[3].mxu1  ;;  %6358 = vmatpush3.bf16.msra.mxu0 %v7829_v6 }
  0xe1   :  { %6371 = vmatprep.subr.bf16.mxu0 %v9845_v0 }
  0xe2   :  { %6268 = vmatmul.mubr.msk.bf16.gmra.mrb[16].mxu0 %vm332_vm2, %v8365_v12  ;;  %6336 = vmatmul.mubr.msk.bf16.gmra.mrb[24].mxu1 %vm332_vm2, %v8205_v20 }
  0xe3   :  { %6271 = vmatprep.mubr.msk.bf16.mxu0 %vm7746_vm1, %v9845_v0  ;;  %6343 = vmatprep.mubr.msk.bf16.mxu1 %vm7746_vm1, %v9845_v0 }
  0xea   :  { %6272 = vmatmul.mubr.msk.bf16.gmra.mrb[20].mxu0 %vm332_vm2, %v8383_v14  ;;  %6344 = vmatmul.mubr.msk.bf16.vlgmr.msra.gmra.mrb[16].mxu1 %vm332_vm2, %v8347_v8 }
  0xeb   :  { %6436 = vmatpush3.bf16.msra.mxu1 %v7848_v10  ;;  %6347 = vmatprep.mubr.msk.bf16.mxu1 %vm7746_vm1, %v9845_v0 }
  0xec   :  { %6359 = vmatprep.mubr.msk.bf16.mxu0 %vm7746_vm1, %v9845_v0  ;;  %6437 = vmatprep.subr.bf16.mxu1 %v9845_v0 }
  0xef   :  { %6438 = vmatpush3.bf16.msra.mxu1 %v7888_v18 }
  0xf0   :  { %6451 = vmatprep.subr.bf16.mxu1 %v9845_v0 }
  0xf2   :  { %6348 = vmatmul.mubr.msk.bf16.gmra.mrb[20].mxu1 %vm332_vm2, %v8365_v12  ;;  %6360 = vmatmul.mubr.msk.bf16.vlgmr.msra.gmra.mrb[24].mxu0 %vm332_vm2, %v8107_v60 }
  0xf3   :  { %6351 = vmatprep.mubr.msk.bf16.mxu1 %vm7746_vm1, %v9845_v0  ;;  %6363 = vmatprep.mubr.msk.bf16.mxu0 %vm7746_vm1, %v9845_v0 }
  0xf4   :  { %6372 = vmatpush3.bf16.msra.mxu0 %v7863_v13 }
  0xf5   :  { %6373 = vmatprep.subr.bf16.mxu0 %v9845_v0 }
  0xf8   :  { %6374 = vmatpush3.bf16.msra.mxu0 %v7907_v23 }
  0xf9   :  { %6387 = vmatprep.subr.bf16.mxu0 %v9845_v0 }
  0xfa   :  { %6352 = vmatmul.mubr.msk.bf16.gmra.mrb[24].mxu1 %vm332_vm2, %v8383_v14  ;;  %6364 = vmatmul.mubr.msk.bf16.gmra.mrb[28].mxu0 %vm332_vm2, %v8138_v2 }
  0xfb   :  { %6367 = vmatprep.mubr.msk.bf16.mxu0 %vm7746_vm1, %v9845_v0  ;;  %6439 = vmatprep.mubr.msk.bf16.mxu1 %vm7746_vm1, %v9845_v0 }
 0x102   :  { %6368 = vmatmul.mubr.msk.bf16.gmra.mrb[32].mxu0 %vm332_vm2, %v8162_v15  ;;  %6440 = vmatmul.mubr.msk.bf16.vlgmr.msra.gmra.mrb[28].mxu1 %vm332_vm2, %v8107_v60 }
 0x103   :  { %6452 = vmatpush3.bf16.msra.mxu1 %v7915_v25  ;;  %6375 = vmatprep.mubr.msk.bf16.mxu0 %vm7746_vm1, %v9845_v0 }
 0x104   :  { %6443 = vmatprep.mubr.msk.bf16.mxu1 %vm7746_vm1, %v9845_v0  ;;  %6453 = vmatprep.subr.bf16.mxu1 %v9845_v0 }
 0x107   :  { %6454 = vmatpush3.bf16.msra.mxu1 %v7936_v28 }
 0x108   :  { %6467 = vmatprep.subr.bf16.mxu1 %v9845_v0 }
 0x10a   :  { %6376 = vmatmul.mubr.msk.bf16.vlgmr.msra.gmra.mrb[24].mxu0 %vm332_vm2, %v8022_v47  ;;  %6444 = vmatmul.mubr.msk.bf16.gmra.mrb[32].mxu1 %vm332_vm2, %v8138_v2 }
 0x10b   :  { %6379 = vmatprep.mubr.msk.bf16.mxu0 %vm7746_vm1, %v9845_v0  ;;  %6447 = vmatprep.mubr.msk.bf16.mxu1 %vm7746_vm1, %v9845_v0 }
 0x10c   :  { %6388 = vmatpush3.bf16.msra.mxu0 %v7946_v31 }
 0x10d   :  { %6389 = vmatprep.subr.bf16.mxu0 %v9845_v0 }
 0x110   :  { %6390 = vmatpush3.bf16.msra.mxu0 %v7971_v36 }
 0x111   :  { %6403 = vmatprep.subr.bf16.mxu0 %v9845_v0 }
 0x112   :  { %6380 = vmatmul.mubr.msk.bf16.gmra.mrb[28].mxu0 %vm332_vm2, %v8058_v53  ;;  %6448 = vmatmul.mubr.msk.bf16.gmra.mrb[36].mxu1 %vm332_vm2, %v8162_v15 }
 0x113   :  { %6383 = vmatprep.mubr.msk.bf16.mxu0 %vm7746_vm1, %v9845_v0  ;;  %6455 = vmatprep.mubr.msk.bf16.mxu1 %vm7746_vm1, %v9845_v0 }
 0x11a   :  { %6384 = vmatmul.mubr.msk.bf16.gmra.mrb[32].mxu0 %vm332_vm2, %v8081_v56  ;;  %6456 = vmatmul.mubr.msk.bf16.vlgmr.msra.gmra.mrb[28].mxu1 %vm332_vm2, %v8022_v47 }
 0x11b   :  { %6468 = vmatpush3.bf16.msra.mxu1 %v7997_v42  ;;  %6391 = vmatprep.mubr.msk.bf16.mxu0 %vm7746_vm1, %v9845_v0 }
 0x11c   :  { %6459 = vmatprep.mubr.msk.bf16.mxu1 %vm7746_vm1, %v9845_v0  ;;  %6469 = vmatprep.subr.bf16.mxu1 %v9845_v0 }
 0x11f   :  { %6470 = vmatpush3.bf16.msra.mxu1 %v8019_v46 }
 0x120   :  { %6483 = vmatprep.subr.bf16.mxu1 %v9845_v0 }
 0x122   :  { %6392 = vmatmul.mubr.msk.bf16.vlgmr.msra.gmra.mrb[24].mxu0 %vm332_vm2, %v7892_v19  ;;  %6460 = vmatmul.mubr.msk.bf16.gmra.mrb[32].mxu1 %vm332_vm2, %v8058_v53 }
 0x123   :  { %6395 = vmatprep.mubr.msk.bf16.mxu0 %vm7746_vm1, %v9845_v0  ;;  %6463 = vmatprep.mubr.msk.bf16.mxu1 %vm7746_vm1, %v9845_v0 }
 0x124   :  { %6404 = vmatpush3.bf16.msra.mxu0 %v8028_v48 }
 0x125   :  { %6405 = vmatprep.subr.bf16.mxu0 %v9845_v0 }
 0x128   :  { %6406 = vmatpush3.bf16.msra.mxu0 %v8054_v52 }
 0x129   :  { %6419 = vmatprep.subr.bf16.mxu0 %v9845_v0 }
 0x12a   :  { %6396 = vmatmul.mubr.msk.bf16.gmra.mrb[28].mxu0 %vm332_vm2, %v7909_v24  ;;  %6464 = vmatmul.mubr.msk.bf16.gmra.mrb[36].mxu1 %vm332_vm2, %v8081_v56 }
 0x12b   :  { %6399 = vmatprep.mubr.msk.bf16.mxu0 %vm7746_vm1, %v9845_v0  ;;  %6471 = vmatprep.mubr.msk.bf16.mxu1 %vm7746_vm1, %v9845_v0 }
 0x132   :  { %6400 = vmatmul.mubr.msk.bf16.gmra.mrb[32].mxu0 %vm332_vm2, %v8205_v20  ;;  %6472 = vmatmul.mubr.msk.bf16.vlgmr.msra.gmra.mrb[28].mxu1 %vm332_vm2, %v7892_v19 }
 0x133   :  { %6484 = vmatpush3.bf16.msra.mxu1 %v8086_v57  ;;  %6407 = vmatprep.mubr.msk.bf16.mxu0 %vm7746_vm1, %v9845_v0 }
 0x134   :  { %6475 = vmatprep.mubr.msk.bf16.mxu1 %vm7746_vm1, %v9845_v0  ;;  %6485 = vmatprep.subr.bf16.mxu1 %v9845_v0 }
 0x135   :  { %v8491_v7 = vpop.f32.mrb[0].mxu0 }
 0x136   :  { %v6105_v26 = vpop.f32.mrb[1].mxu0 }
 0x137   :  { %v8493_v27 = vpop.f32.mrb[2].mxu0  ;;  %6486 = vmatpush3.bf16.msra.mxu1 %v7953_v33 }
 0x138   :  { %v6106_v29 = vpop.f32.mrb[3].mxu0  ;;  %6499 = vmatprep.subr.bf16.mxu1 %v9845_v0 }
 0x13a   :  { %6408 = vmatmul.mubr.msk.bf16.vlgmr.msra.gmra.mrb[24].mxu0 %vm332_vm2, %v8347_v8  ;;  %6476 = vmatmul.mubr.msk.bf16.gmra.mrb[32].mxu1 %vm332_vm2, %v7909_v24 }
 0x13b   :  { %6411 = vmatprep.mubr.msk.bf16.mxu0 %vm7746_vm1, %v9845_v0  ;;  %6479 = vmatprep.mubr.msk.bf16.mxu1 %vm7746_vm1, %v9845_v0 }
 0x13c   :  { %6420 = vmatpush3.bf16.msra.mxu0 %v8113_v61 }
 0x13d   :  { %v8506_v30 = vpop.f32.mrb[4].mxu0  ;;  %6421 = vmatprep.subr.bf16.mxu0 %v9845_v0 }
 0x13e   :  { %v6109_v32 = vpop.f32.mrb[5].mxu0 }
 0x13f   :  { %v8509_v34 = vpop.f32.mrb[6].mxu0 }
 0x140   :  { %v6110_v35 = vpop.f32.mrb[7].mxu0  ;;  %6422 = vmatpush3.bf16.msra.mxu0 %v7974_v37 }
 0x141   :  { %6515 = vmatprep.subr.bf16.mxu0 %v9845_v0 }
 0x142   :  { %6412 = vmatmul.mubr.msk.bf16.gmra.mrb[28].mxu0 %vm332_vm2, %v8365_v12  ;;  %6480 = vmatmul.mubr.msk.bf16.gmra.mrb[36].mxu1 %vm332_vm2, %v8205_v20 }
 0x143   :  { %6415 = vmatprep.mubr.msk.bf16.mxu0 %vm7746_vm1, %v9845_v0  ;;  %6487 = vmatprep.mubr.msk.bf16.mxu1 %vm7746_vm1, %v9845_v0 }
 0x145   :  { %v728_v38 = vpop.f32.mrb[8].mxu0  ;;  %v8521_v40 = vpop.f32.mrb[4].mxu1 }
 0x146   :  { %v8524_v41 = vadd.f32 %v728_v38, %v8360_v4  ;;  %v1114_v43 = vmax.f32 %v8491_v7, %v8521_v40  ;;  %v6113_v44 = vpop.f32.mrb[9].mxu0  ;;  %v6185_v47 = vpop.f32.mrb[5].mxu1  ;;  %v8575_v38 = vpack.c.bf16 %v8072_v54, %v8049_v51 }
 0x147   :  { %v731_v49 = vpop.f32.mrb[10].mxu0  ;;  %v8528_v53 = vpop.f32.mrb[6].mxu1 }
 0x148   :  { %v8531_v56 = vadd.f32 %v731_v49, %v8367_v21  ;;  %v1115_v58 = vmax.f32 %v8493_v27, %v8528_v53  ;;  %v6114_v17 = vpop.f32.mrb[11].mxu0  ;;  %v6186_v9 = vpop.f32.mrb[7].mxu1 }
 0x14a   :  { %6416 = vmatmul.mubr.msk.bf16.gmra.mrb[32].mxu0 %vm332_vm2, %v8383_v14  ;;  %6488 = vmatmul.mubr.msk.bf16.vlgmr.msra.gmra.mrb[28].mxu1 %vm332_vm2, %v8347_v8 }
 0x14b   :  { %6500 = vmatpush3.bf16.msra.mxu1 %v8167_v16  ;;  %6423 = vmatprep.mubr.msk.bf16.mxu0 %vm7746_vm1, %v9845_v0 }
 0x14c   :  { %6491 = vmatprep.mubr.msk.bf16.mxu1 %vm7746_vm1, %v9845_v0  ;;  %6501 = vmatprep.subr.bf16.mxu1 %v9845_v0 }
 0x14d   :  { %v8545_v4 = vpop.f32.mrb[8].mxu1 }
 0x14e   :  { %v1116_v21 = vmax.f32 %v8506_v30, %v8545_v4  ;;  %v6189_v22 = vpop.f32.mrb[9].mxu1 }
 0x14f   :  { %v8553_v26 = vpop.f32.mrb[10].mxu1  ;;  %6502 = vmatpush3.bf16.msra.mxu1 %v7977_v39 }
 0x150   :  { %v1117_v29 = vmax.f32 %v8509_v34, %v8553_v26  ;;  %v6190_v32 = vpop.f32.mrb[11].mxu1  ;;  %6595 = vmatprep.subr.bf16.mxu1 %v9845_v0 }
 0x152   :  { %6424 = vmatmul.mubr.msk.bf16.vlgmr.msra.gmra.mrb[24].mxu0 %vm332_vm2, %v8551_v5  ;;  %6492 = vmatmul.mubr.msk.bf16.gmra.mrb[32].mxu1 %vm332_vm2, %v8365_v12 }
 0x153   :  { %6427 = vmatprep.mubr.msk.bf16.mxu0 %vm7746_vm1, %v9845_v0  ;;  %6495 = vmatprep.mubr.msk.bf16.mxu1 %vm7746_vm1, %v9845_v0 }
 0x154   :  { %6516 = vmatpush3.bf16.msra.mxu0 %v7802_v1  ;;  %v5105_v1 = vld [vmem:[%s9836_s0 + $0xa0] sm:$0xff] }
 0x155   :  { %v8568_v45 = vpop.f32.mrb[12].mxu1  ;;  %6517 = vmatprep.subr.bf16.mxu0 %v9845_v0 }
 0x156   :  { %v1118_v50 = vmax.f32 %v8524_v41, %v8568_v45  ;;  %v6193_v35 = vpop.f32.mrb[13].mxu1  ;;  %v109_v41 = vpack.c.bf16 %v8127_v62, %v8101_v59 }
 0x157   :  { %v8577_v44 = vpop.f32.mrb[14].mxu1 }
 0x158   :  { %v1119_v47 = vmax.f32 %v8531_v56, %v8577_v44  ;;  %v6194_v49 = vpop.f32.mrb[15].mxu1  ;;  %6518 = vmatpush3.bf16.msra.mxu0 %v7829_v6  ;;  %v8595_v6 = vpack.c.bf16 %v5105_v1, %v8077_v55  ;;  %v8816_v44 = vld [vmem:[%s9838_s3 + $0x44] sm:$0xff]   ;;  %v8833_v1 = vld [vmem:[%s9838_s3 + $0x4c] sm:$0xff]  }
 0x159   :  { %6531 = vmatprep.subr.bf16.mxu0 %v9845_v0 }
 0x15a   :  { %6428 = vmatmul.mubr.msk.bf16.gmra.mrb[28].mxu0 %vm332_vm2, %v8575_v38  ;;  %6496 = vmatmul.mubr.msk.bf16.gmra.mrb[36].mxu1 %vm332_vm2, %v8383_v14 }
 0x15b   :  { %6431 = vmatprep.mubr.msk.bf16.mxu0 %vm7746_vm1, %v9845_v0  ;;  %6503 = vmatprep.mubr.msk.bf16.mxu1 %vm7746_vm1, %v9845_v0 }
 0x162   :  { %6432 = vmatmul.mubr.msk.bf16.gmra.mrb[32].mxu0 %vm332_vm2, %v8595_v6  ;;  %6504 = vmatmul.mubr.msk.bf16.vlgmr.msra.gmra.mrb[28].mxu1 %vm332_vm2, %v8551_v5 }
 0x163   :  { %6596 = vmatpush3.bf16.msra.mxu1 %v7848_v10  ;;  %6507 = vmatprep.mubr.msk.bf16.mxu1 %vm7746_vm1, %v9845_v0 }
 0x164   :  { %6519 = vmatprep.mubr.msk.bf16.mxu0 %vm7746_vm1, %v9845_v0  ;;  %6597 = vmatprep.subr.bf16.mxu1 %v9845_v0 }
 0x167   :  { %6598 = vmatpush3.bf16.msra.mxu1 %v7888_v18 }
 0x168   :  { %6611 = vmatprep.subr.bf16.mxu1 %v9845_v0 }
 0x16a   :  { %6508 = vmatmul.mubr.msk.bf16.gmra.mrb[32].mxu1 %vm332_vm2, %v8575_v38  ;;  %6520 = vmatmul.mubr.msk.bf16.vlgmr.msra.gmra.mrb[36].mxu0 %vm332_vm2, %v7892_v19 }
 0x16b   :  { %6511 = vmatprep.mubr.msk.bf16.mxu1 %vm7746_vm1, %v9845_v0  ;;  %6523 = vmatprep.mubr.msk.bf16.mxu0 %vm7746_vm1, %v9845_v0 }
 0x16c   :  { %6532 = vmatpush3.bf16.msra.mxu0 %v7863_v13 }
 0x16d   :  { %6533 = vmatprep.subr.bf16.mxu0 %v9845_v0 }
 0x170   :  { %6534 = vmatpush3.bf16.msra.mxu0 %v7907_v23 }
 0x171   :  { %6547 = vmatprep.subr.bf16.mxu0 %v9845_v0 }
 0x172   :  { %6512 = vmatmul.mubr.msk.bf16.gmra.mrb[36].mxu1 %vm332_vm2, %v8595_v6  ;;  %6524 = vmatmul.mubr.msk.bf16.gmra.mrb[40].mxu0 %vm332_vm2, %v7909_v24 }
 0x173   :  { %6527 = vmatprep.mubr.msk.bf16.mxu0 %vm7746_vm1, %v9845_v0  ;;  %6599 = vmatprep.mubr.msk.bf16.mxu1 %vm7746_vm1, %v9845_v0 }
 0x17a   :  { %6528 = vmatmul.mubr.msk.bf16.gmra.mrb[44].mxu0 %vm332_vm2, %v8205_v20  ;;  %6600 = vmatmul.mubr.msk.bf16.vlgmr.msra.gmra.mrb[40].mxu1 %vm332_vm2, %v7892_v19 }
 0x17b   :  { %6612 = vmatpush3.bf16.msra.mxu1 %v7915_v25  ;;  %6535 = vmatprep.mubr.msk.bf16.mxu0 %vm7746_vm1, %v9845_v0 }
 0x17c   :  { %6603 = vmatprep.mubr.msk.bf16.mxu1 %vm7746_vm1, %v9845_v0  ;;  %6613 = vmatprep.subr.bf16.mxu1 %v9845_v0 }
 0x17f   :  { %6614 = vmatpush3.bf16.msra.mxu1 %v7936_v28 }
 0x180   :  { %6627 = vmatprep.subr.bf16.mxu1 %v9845_v0 }
 0x182   :  { %6536 = vmatmul.mubr.msk.bf16.vlgmr.msra.gmra.mrb[36].mxu0 %vm332_vm2, %v8107_v60  ;;  %6604 = vmatmul.mubr.msk.bf16.gmra.mrb[44].mxu1 %vm332_vm2, %v7909_v24 }
 0x183   :  { %6539 = vmatprep.mubr.msk.bf16.mxu0 %vm7746_vm1, %v9845_v0  ;;  %6607 = vmatprep.mubr.msk.bf16.mxu1 %vm7746_vm1, %v9845_v0 }
 0x184   :  { %6548 = vmatpush3.bf16.msra.mxu0 %v7946_v31 }
 0x185   :  { %6549 = vmatprep.subr.bf16.mxu0 %v9845_v0 }
 0x188   :  { %6550 = vmatpush3.bf16.msra.mxu0 %v7971_v36 }
 0x189   :  { %6563 = vmatprep.subr.bf16.mxu0 %v9845_v0 }
 0x18a   :  { %6540 = vmatmul.mubr.msk.bf16.gmra.mrb[40].mxu0 %vm332_vm2, %v8138_v2  ;;  %6608 = vmatmul.mubr.msk.bf16.gmra.mrb[48].mxu1 %vm332_vm2, %v8205_v20 }
 0x18b   :  { %6543 = vmatprep.mubr.msk.bf16.mxu0 %vm7746_vm1, %v9845_v0  ;;  %6615 = vmatprep.mubr.msk.bf16.mxu1 %vm7746_vm1, %v9845_v0 }
 0x192   :  { %6544 = vmatmul.mubr.msk.bf16.gmra.mrb[44].mxu0 %vm332_vm2, %v8162_v15  ;;  %6616 = vmatmul.mubr.msk.bf16.vlgmr.msra.gmra.mrb[40].mxu1 %vm332_vm2, %v8107_v60 }
 0x193   :  { %6628 = vmatpush3.bf16.msra.mxu1 %v7997_v42  ;;  %6551 = vmatprep.mubr.msk.bf16.mxu0 %vm7746_vm1, %v9845_v0 }
 0x194   :  { %6619 = vmatprep.mubr.msk.bf16.mxu1 %vm7746_vm1, %v9845_v0  ;;  %6629 = vmatprep.subr.bf16.mxu1 %v9845_v0 }
 0x197   :  { %6630 = vmatpush3.bf16.msra.mxu1 %v8019_v46 }
 0x198   :  { %6643 = vmatprep.subr.bf16.mxu1 %v9845_v0 }
 0x19a   :  { %6552 = vmatmul.mubr.msk.bf16.vlgmr.msra.gmra.mrb[36].mxu0 %vm332_vm2, %v8347_v8  ;;  %6620 = vmatmul.mubr.msk.bf16.gmra.mrb[44].mxu1 %vm332_vm2, %v8138_v2 }
 0x19b   :  { %6555 = vmatprep.mubr.msk.bf16.mxu0 %vm7746_vm1, %v9845_v0  ;;  %6623 = vmatprep.mubr.msk.bf16.mxu1 %vm7746_vm1, %v9845_v0 }
 0x19c   :  { %6564 = vmatpush3.bf16.msra.mxu0 %v8028_v48  ;;  %v8739_v48 = vld [vmem:[%s9837_s2] ss:$0 sm:$0xff] }
 0x19d   :  { %6565 = vmatprep.subr.bf16.mxu0 %v9845_v0 }
 0x1a0   :  { %6566 = vmatpush3.bf16.msra.mxu0 %v8054_v52 }
 0x1a1   :  { %6579 = vmatprep.subr.bf16.mxu0 %v9845_v0 }
 0x1a2   :  { %6556 = vmatmul.mubr.msk.bf16.gmra.mrb[40].mxu0 %vm332_vm2, %v8365_v12  ;;  %6624 = vmatmul.mubr.msk.bf16.gmra.mrb[48].mxu1 %vm332_vm2, %v8162_v15 }
 0x1a3   :  { %6559 = vmatprep.mubr.msk.bf16.mxu0 %vm7746_vm1, %v9845_v0  ;;  %6631 = vmatprep.mubr.msk.bf16.mxu1 %vm7746_vm1, %v9845_v0 }
 0x1aa   :  { %6560 = vmatmul.mubr.msk.bf16.gmra.mrb[44].mxu0 %vm332_vm2, %v8383_v14  ;;  %6632 = vmatmul.mubr.msk.bf16.vlgmr.msra.gmra.mrb[40].mxu1 %vm332_vm2, %v8347_v8 }
 0x1ab   :  { %6644 = vmatpush3.bf16.msra.mxu1 %v8086_v57  ;;  %6567 = vmatprep.mubr.msk.bf16.mxu0 %vm7746_vm1, %v9845_v0 }
 0x1ac   :  { %6635 = vmatprep.mubr.msk.bf16.mxu1 %vm7746_vm1, %v9845_v0  ;;  %6645 = vmatprep.subr.bf16.mxu1 %v9845_v0 }
 0x1ad   :  { %v1403_v10 = vpop.f32.mrb[12].mxu0 }
 0x1ae   :  { %v1432_v13 = vmax.f32 %v1114_v43, %v1403_v10  ;;  %v6265_v18 = vpop.f32.mrb[13].mxu0 }
 0x1af   :  { %v1406_v19 = vpop.f32.mrb[14].mxu0  ;;  %6646 = vmatpush3.bf16.msra.mxu1 %v7953_v33 }
 0x1b0   :  { %v1433_v23 = vmax.f32 %v1115_v58, %v1406_v19  ;;  %v6266_v24 = vpop.f32.mrb[15].mxu0  ;;  %6659 = vmatprep.subr.bf16.mxu1 %v9845_v0  ;;  %v8848_v19 = vld [vmem:[%s9838_s3 + $0x54] sm:$0xff]  }
 0x1b2   :  { %6568 = vmatmul.mubr.msk.bf16.vlgmr.msra.gmra.mrb[36].mxu0 %vm332_vm2, %v8551_v5  ;;  %6636 = vmatmul.mubr.msk.bf16.gmra.mrb[44].mxu1 %vm332_vm2, %v8365_v12 }
 0x1b3   :  { %6571 = vmatprep.mubr.msk.bf16.mxu0 %vm7746_vm1, %v9845_v0  ;;  %6639 = vmatprep.mubr.msk.bf16.mxu1 %vm7746_vm1, %v9845_v0 }
 0x1b4   :  { %6580 = vmatpush3.bf16.msra.mxu0 %v8113_v61 }
 0x1b5   :  { %v1411_v25 = vpop.f32.mrb[16].mxu0  ;;  %6581 = vmatprep.subr.bf16.mxu0 %v9845_v0 }
 0x1b6   :  { %v1434_v28 = vmax.f32 %v1116_v21, %v1411_v25  ;;  %v6269_v31 = vpop.f32.mrb[17].mxu0  ;;  %v110_v21 = vpack.c.bf16 %v8153_v3, %v8132_v63  ;;  %v5111_v63 = vld [vmem:[%s9836_s0 + $0xd8] sm:$0xff] }
 0x1b7   :  { %v1414_v33 = vpop.f32.mrb[18].mxu0  ;;  %v111_v35 = vpack.c.bf16 %v5111_v63, %v8158_v11  ;;  %v8808_v11 = vld [vmem:[%s9838_s3 + $0x168] sm:$0xff]   ;;  %v8865_v25 = vld [vmem:[%s9838_s3 + $0x5c] sm:$0xff]  }
 0x1b8   :  { %v1435_v36 = vmax.f32 %v1117_v29, %v1414_v33  ;;  %v6270_v42 = vpop.f32.mrb[19].mxu0  ;;  %6582 = vmatpush3.bf16.msra.mxu0 %v7974_v37 }
 0x1b9   :  { %v8881_v42 = vld [vmem:[%s9838_s3 + $0x64] sm:$0xff]  }
 0x1ba   :  { %6572 = vmatmul.mubr.msk.bf16.gmra.mrb[40].mxu0 %vm332_vm2, %v8575_v38  ;;  %6640 = vmatmul.mubr.msk.bf16.gmra.mrb[48].mxu1 %vm332_vm2, %v8383_v14 }
 0x1bb   :  { %6575 = vmatprep.mubr.msk.bf16.mxu0 %vm7746_vm1, %v9845_v0  ;;  %6647 = vmatprep.mubr.msk.bf16.mxu1 %vm7746_vm1, %v9845_v0 }
 0x1bd   :  { %v1419_v46 = vpop.f32.mrb[20].mxu0  ;;  %v1712_v51 = vpop.f32.mrb[16].mxu1 }
 0x1be   :  { %v1436_v37 = vmax.f32 %v1118_v50, %v1419_v46  ;;  %v1741_v52 = vmax.f32 %v1432_v13, %v1712_v51  ;;  %v6273_v54 = vpop.f32.mrb[21].mxu0  ;;  %v6345_v55 = vpop.f32.mrb[17].mxu1  ;;  %v8886_v46 = vld [vmem:[%s9838_s3 + $0x190] sm:$0xff]  }
 0x1bf   :  { %v1422_v57 = vpop.f32.mrb[22].mxu0  ;;  %v1715_v60 = vpop.f32.mrb[18].mxu1  ;;  %v8900_v54 = vld [vmem:[%s9838_s3 + $0x198] sm:$0xff]  }
 0x1c0   :  { %v1753_v61 = vadd.f32 %v8739_v48, %v1741_v52  ;;  %v1437_v2 = vmax.f32 %v1119_v47, %v1422_v57  ;;  %v1742_v15 = vmax.f32 %v1433_v23, %v1715_v60  ;;  %v6274_v20 = vpop.f32.mrb[23].mxu0  ;;  %v6346_v8 = vpop.f32.mrb[19].mxu1  ;;  %v8821_v47 = vld [vmem:[%s9838_s3 + $0x170] sm:$0xff]   ;;  %v8853_v23 = vld [vmem:[%s9838_s3 + $0x180] sm:$0xff]  }
 0x1c1   :  { %v8895_v52 = vld [vmem:[%s9838_s3 + $0x6c] sm:$0xff]  }
 0x1c2   :  { %v1754_v12 = vadd.f32 %v8739_v48, %v1742_v15  ;;  %6576 = vmatmul.mubr.msk.bf16.gmra.mrb[44].mxu0 %vm332_vm2, %v8595_v6  ;;  %6648 = vmatmul.mubr.msk.bf16.vlgmr.msra.gmra.mrb[40].mxu1 %vm332_vm2, %v8551_v5  ;;  %v1759_v14 = vmax.f32 %v1753_v61, 0.0 }
 0x1c3   :  { %6660 = vmatpush3.bf16.msra.mxu1 %v8167_v16  ;;  %6583 = vmatprep.mubr.msk.bf16.mxu0 %vm7746_vm1, %v9845_v0 }
 0x1c4   :  { %v1760_v7 = vmax.f32 %v1754_v12, 0.0  ;;  %6651 = vmatprep.mubr.msk.bf16.mxu1 %vm7746_vm1, %v9845_v0  ;;  %6661 = vmatprep.subr.bf16.mxu1 %v9845_v0  ;;  %v8911_v12 = vld [vmem:[%s9838_s3 + $0x74] ss:$0 sps:$4 sm:$0xff]  }
 0x1c5   :  { %v1720_v27 = vpop.f32.mrb[20].mxu1 }
 0x1c6   :  { %v8759_v30 = vpack.c.bf16 %v1760_v7, %v1759_v14  ;;  %v1743_v34 = vmax.f32 %v1434_v28, %v1720_v27  ;;  %v6349_v40 = vpop.f32.mrb[21].mxu1  ;;  %v8870_v28 = vld [vmem:[%s9838_s3 + $0x188] sm:$0xff]   ;;  %v8916_v14 = vld [vmem:[%s9838_s3 + $0x1a0] ss:$0 sps:$4 sm:$0xff]   ;;  %v8924_v7 = vsel %vm3084_vm3, %v8911_v12, 0 }
 0x1c7   :  { %v1723_v43 = vpop.f32.mrb[22].mxu1  ;;  %6662 = vmatpush3.bf16.msra.mxu1 %v7977_v39  ;;  %v8928_v27 = vsel %vm3084_vm3, %v8916_v14, 0  ;;  %v8935_v40 = vld [vmem:[%s9838_s3] sm:$0xff]  }
 0x1c8   :  { %v1755_v16 = vadd.f32 %v8739_v48, %v1743_v34  ;;  %v1744_v53 = vmax.f32 %v1435_v36, %v1723_v43  ;;  %v6350_v56 = vpop.f32.mrb[23].mxu1  ;;  %6775 = vmatprep.subr.bf16.mxu1 %v8808_v11 }
 0x1ca   :  { %v1756_v58 = vadd.f32 %v8739_v48, %v1744_v53  ;;  %6584 = vmatmul.mubr.msk.bf16.vlgmr.msra.gmra.mrb[36].mxu0 %vm332_vm2, %v109_v41  ;;  %6652 = vmatmul.mubr.msk.bf16.gmra.mrb[44].mxu1 %vm332_vm2, %v8575_v38  ;;  %v1761_v59 = vmax.f32 %v1755_v16, 0.0  ;;  %v8803_v38 = vld [vmem:[%s9838_s3 + $0x3c] sm:$0xff]  }
 0x1cb   :  { %6587 = vmatprep.mubr.msk.bf16.mxu0 %vm7746_vm1, %v9845_v0  ;;  %6655 = vmatprep.mubr.msk.bf16.mxu1 %vm7746_vm1, %v9845_v0 }
 0x1cc   :  { %v1762_v62 = vmax.f32 %v1756_v58, 0.0  ;;  %6675 = vmatprep.subr.bf16.mxu0 %v8803_v38 }
 0x1cd   :  { %v1728_v39 = vpop.f32.mrb[24].mxu1  ;;  %6676 = vmatpush3.bf16.msra.mxu0 %v8803_v38 }
 0x1ce   :  { %v8773_v17 = vpack.c.bf16 %v1762_v62, %v1761_v59  ;;  %v1745_v9 = vmax.f32 %v1436_v37, %v1728_v39  ;;  %v6353_v4 = vpop.f32.mrb[25].mxu1  ;;  %6677 = vmatprep.subr.bf16.mxu0 %v8816_v44 }
 0x1cf   :  { %v1731_v22 = vpop.f32.mrb[26].mxu1 }
 0x1d0   :  { %v1757_v5 = vadd.f32 %v8739_v48, %v1745_v9  ;;  %v1746_v26 = vmax.f32 %v1437_v2, %v1731_v22  ;;  %v6354_v29 = vpop.f32.mrb[27].mxu1 }
 0x1d1   :  { %6678 = vmatpush3.bf16.msra.mxu0 %v8816_v44 }
 0x1d2   :  { %v1758_v32 = vadd.f32 %v8739_v48, %v1746_v26  ;;  %6588 = vmatmul.mubr.msk.bf16.gmra.mrb[40].mxu0 %vm332_vm2, %v110_v21  ;;  %6656 = vmatmul.mubr.msk.bf16.gmra.mrb[48].mxu1 %vm332_vm2, %v8595_v6  ;;  %v1763_v3 = vmax.f32 %v1757_v5, 0.0  ;;  %v8838_v6 = vld [vmem:[%s9838_s3 + $0x178] sm:$0xff]  }
 0x1d3   :  { %6591 = vmatprep.mubr.msk.bf16.mxu0 %vm7746_vm1, %v9845_v0  ;;  %6663 = vmatprep.mubr.msk.bf16.mxu1 %vm7746_vm1, %v9845_v0 }
 0x1d4   :  { %v1764_v45 = vmax.f32 %v1758_v32, 0.0  ;;  %6679 = vmatprep.subr.bf16.mxu0 %v8833_v1 }
 0x1d5   :  { %6680 = vmatpush3.bf16.msra.mxu0 %v8833_v1 }
 0x1d6   :  { %v8789_v50 = vpack.c.bf16 %v1764_v45, %v1763_v3  ;;  %6681 = vmatprep.subr.bf16.mxu0 %v8848_v19 }
 0x1d9   :  { %6682 = vmatpush3.bf16.msra.mxu0 %v8848_v19 }
 0x1da   :  { %6592 = vmatmul.mubr.msk.bf16.gmra.mrb[44].mxu0 %vm332_vm2, %v111_v35  ;;  %6664 = vmatmul.mubr.msk.bf16.vlgmr.msra.gmra.mrb[40].mxu1 %vm332_vm2, %v109_v41  ;;  %v8940_v41 = vld [vmem:[%s9838_s3 + $0x12c] sm:$0xff]  }
 0x1db   :  { %6667 = vmatprep.mubr.msk.bf16.mxu1 %vm7746_vm1, %v9845_v0  ;;  %6776 = vmatpush3.bf16.msra.mxu1 %v8808_v11 }
 0x1dc   :  { %6777 = vmatprep.subr.bf16.mxu1 %v8821_v47  ;;  %6683 = vmatprep.subr.bf16.mxu0 %v8865_v25 }
 0x1dd   :  { %6684 = vmatpush3.bf16.msra.mxu0 %v8865_v25 }
 0x1de   :  { %6685 = vmatprep.subr.bf16.mxu0 %v8881_v42 }
 0x1df   :  { %6778 = vmatpush3.bf16.msra.mxu1 %v8821_v47 }
 0x1e0   :  { %6779 = vmatprep.subr.bf16.mxu1 %v8838_v6 }
 0x1e1   :  { %6686 = vmatpush3.bf16.msra.mxu0 %v8881_v42 }
 0x1e2   :  { %6668 = vmatmul.mubr.msk.bf16.gmra.mrb[44].mxu1 %vm332_vm2, %v110_v21  ;;  %6687 = vmatprep.subr.bf16.mxu0 %v8895_v52 }
 0x1e3   :  { %6671 = vmatprep.mubr.msk.bf16.mxu1 %vm7746_vm1, %v9845_v0  ;;  %6780 = vmatpush3.bf16.msra.mxu1 %v8838_v6  ;;  %v9224_v0 = vld [vmem:[%s9838_s3 + $0x1e0] sm:$0xff]  }
 0x1e4   :  { %6781 = vmatprep.subr.bf16.mxu1 %v8853_v23  ;;  %9921 = vst [vmem:[#allocation10_spill] sm:$0xff] %v9224_v0 }
 0x1e5   :  { %6688 = vmatpush3.bf16.msra.mxu0 %v8895_v52 }
 0x1e6   :  { %7593 = vmatprep.subr.msk.bf16.mxu0 %vm3084_vm3, %v8911_v12 }
 0x1e7   :  { %6782 = vmatpush3.bf16.msra.mxu1 %v8853_v23 }
 0x1e8   :  { %6783 = vmatprep.subr.bf16.mxu1 %v8870_v28 }
 0x1e9   :  { %6690 = vmatpush3.bf16.msra.mxu0 %v8924_v7 }
 0x1ea   :  { %6672 = vmatmul.mubr.msk.bf16.gmra.mrb[48].mxu1 %vm332_vm2, %v111_v35  ;;  %6695 = vmatprep.subr.bf16.mxu0 %v8935_v40 }
 0x1eb   :  { %6784 = vmatpush3.bf16.msra.mxu1 %v8870_v28 }
 0x1ec   :  { %6785 = vmatprep.subr.bf16.mxu1 %v8886_v46 }
 0x1ef   :  { %6786 = vmatpush3.bf16.msra.mxu1 %v8886_v46 }
 0x1f0   :  { %6787 = vmatprep.subr.bf16.mxu1 %v8900_v54 }
 0x1f3   :  { %6788 = vmatpush3.bf16.msra.mxu1 %v8900_v54 }
 0x1f4   :  { %7598 = vmatprep.subr.msk.bf16.mxu1 %vm3084_vm3, %v8916_v14 }
 0x1f7   :  { %6790 = vmatpush3.bf16.msra.mxu1 %v8928_v27 }
 0x1f8   :  { %6795 = vmatprep.subr.bf16.mxu1 %v8940_v41 }
 0x225   :  { %v8827_v49 = vpop.f32.mrb[24].mxu0 }
 0x226   :  { %v6425_v10 = vpop.f32.mrb[25].mxu0 }
 0x227   :  { %v8840_v13 = vpop.f32.mrb[26].mxu0 }
 0x228   :  { %v6426_v18 = vpop.f32.mrb[27].mxu0 }
 0x22d   :  { %v8859_v24 = vpop.f32.mrb[28].mxu0 }
 0x22e   :  { %v6429_v31 = vpop.f32.mrb[29].mxu0 }
 0x22f   :  { %v8872_v33 = vpop.f32.mrb[30].mxu0 }
 0x230   :  { %v6430_v36 = vpop.f32.mrb[31].mxu0 }
 0x235   :  { %v2067_v51 = vpop.f32.mrb[32].mxu0  ;;  %v2354_v37 = vpop.f32.mrb[28].mxu1 }
 0x236   :  { %v2383_v55 = vmax.f32 %v8827_v49, %v2354_v37  ;;  %v6433_v57 = vpop.f32.mrb[33].mxu0  ;;  %v6505_v60 = vpop.f32.mrb[29].mxu1 }
 0x237   :  { %v2070_v61 = vpop.f32.mrb[34].mxu0  ;;  %v2357_v2 = vpop.f32.mrb[30].mxu1 }
 0x238   :  { %v2384_v15 = vmax.f32 %v8840_v13, %v2357_v2  ;;  %v6434_v20 = vpop.f32.mrb[35].mxu0  ;;  %v6506_v8 = vpop.f32.mrb[31].mxu1 }
 0x23d   :  { %v2362_v34 = vpop.f32.mrb[32].mxu1 }
 0x23e   :  { %v2385_v43 = vmax.f32 %v8859_v24, %v2362_v34  ;;  %v6509_v16 = vpop.f32.mrb[33].mxu1 }
 0x23f   :  { %v2365_v53 = vpop.f32.mrb[34].mxu1 }
 0x240   :  { %v2386_v56 = vmax.f32 %v8872_v33, %v2365_v53  ;;  %v6510_v58 = vpop.f32.mrb[35].mxu1 }
 0x245   :  { %v2370_v59 = vpop.f32.mrb[36].mxu1 }
 0x246   :  { %v2387_v62 = vmax.f32 %v2067_v51, %v2370_v59  ;;  %v6513_v39 = vpop.f32.mrb[37].mxu1 }
 0x247   :  { %v2373_v9 = vpop.f32.mrb[38].mxu1 }
 0x248   :  { %v2388_v4 = vmax.f32 %v2070_v61, %v2373_v9  ;;  %v6514_v21 = vpop.f32.mrb[39].mxu1 }
 0x29d   :  { %v2672_v22 = vpop.f32.mrb[36].mxu0 }
 0x29e   :  { %v2701_v5 = vmax.f32 %v2383_v55, %v2672_v22  ;;  %v6585_v26 = vpop.f32.mrb[37].mxu0 }
 0x29f   :  { %v2675_v29 = vpop.f32.mrb[38].mxu0 }
 0x2a0   :  { %v2702_v32 = vmax.f32 %v2384_v15, %v2675_v29  ;;  %v6586_v63 = vpop.f32.mrb[39].mxu0 }
 0x2a1   :  { %v8961_v63 = vld [vmem:[%s9838_s3 + $0x8] sm:$0xff]  }
 0x2a5   :  { %v2680_v3 = vpop.f32.mrb[40].mxu0 }
 0x2a6   :  { %v2703_v45 = vmax.f32 %v2385_v43, %v2680_v3  ;;  %v6589_v35 = vpop.f32.mrb[41].mxu0  ;;  %v8966_v3 = vld [vmem:[%s9838_s3 + $0x134] sm:$0xff]  }
 0x2a7   :  { %v2683_v49 = vpop.f32.mrb[42].mxu0 }
 0x2a8   :  { %v2704_v10 = vmax.f32 %v2386_v56, %v2683_v49  ;;  %v6590_v13 = vpop.f32.mrb[43].mxu0 }
 0x2a9   :  { %v8983_v13 = vld [vmem:[%s9838_s3 + $0x10] sm:$0xff]  }
 0x2ad   :  { %v2688_v18 = vpop.f32.mrb[44].mxu0  ;;  %v2981_v24 = vpop.f32.mrb[40].mxu1 }
 0x2ae   :  { %v2705_v31 = vmax.f32 %v2387_v62, %v2688_v18  ;;  %v3010_v33 = vmax.f32 %v2701_v5, %v2981_v24  ;;  %v6593_v36 = vpop.f32.mrb[45].mxu0  ;;  %v6665_v51 = vpop.f32.mrb[41].mxu1  ;;  %v8988_v18 = vld [vmem:[%s9838_s3 + $0x13c] sm:$0xff]  }
 0x2af   :  { %v2691_v37 = vpop.f32.mrb[46].mxu0  ;;  %v2984_v57 = vpop.f32.mrb[42].mxu1  ;;  %v9006_v36 = vld [vmem:[%s9838_s3 + $0x144] sm:$0xff]  }
 0x2b0   :  { %v3016_v55 = vadd.f32 %v8739_v48, %v3010_v33  ;;  %v2706_v60 = vmax.f32 %v2388_v4, %v2691_v37  ;;  %v3011_v61 = vmax.f32 %v2702_v32, %v2984_v57  ;;  %v6594_v2 = vpop.f32.mrb[47].mxu0  ;;  %v6666_v15 = vpop.f32.mrb[43].mxu1  ;;  %v9001_v33 = vld [vmem:[%s9838_s3 + $0x18] sm:$0xff]   ;;  %v9015_v51 = vld [vmem:[%s9838_s3 + $0x20] sm:$0xff]   ;;  %v9020_v37 = vld [vmem:[%s9838_s3 + $0x14c] sm:$0xff]  }
 0x2b1   :  { %v9029_v57 = vld [vmem:[%s9838_s3 + $0x28] sm:$0xff]   ;;  %v9057_v2 = vld [vmem:[%s9838_s3 + $0x38] ss:$0 sps:$4 sm:$0xff]   ;;  %v9062_v15 = vld [vmem:[%s9838_s3 + $0x164] ss:$0 sps:$4 sm:$0xff]  }
 0x2b2   :  { %v3017_v20 = vadd.f32 %v8739_v48, %v3011_v61  ;;  %v3022_v8 = vmax.f32 %v3016_v55, 0.0  ;;  %v9034_v55 = vld [vmem:[%s9838_s3 + $0x154] sm:$0xff]   ;;  %v9048_v61 = vld [vmem:[%s9838_s3 + $0x15c] sm:$0xff]  }
 0x2b4   :  { %v3023_v34 = vmax.f32 %v3017_v20, 0.0  ;;  %v9072_v20 = vsel %vm3084_vm3, %v9057_v2, 0 }
 0x2b5   :  { %v2989_v43 = vpop.f32.mrb[44].mxu1 }
 0x2b6   :  { %v8948_v16 = vpack.c.bf16 %v3023_v34, %v3022_v8  ;;  %v3012_v53 = vmax.f32 %v2703_v45, %v2989_v43  ;;  %v6669_v56 = vpop.f32.mrb[45].mxu1  ;;  %v9076_v8 = vsel %vm3084_vm3, %v9062_v15, 0  ;;  %v9081_v34 = vld [vmem:[%s9838_s3 + $0x78] sm:$0xff]   ;;  %v9086_v43 = vld [vmem:[%s9838_s3 + $0x1a4] sm:$0xff]  }
 0x2b7   :  { %v2992_v58 = vpop.f32.mrb[46].mxu1  ;;  %v3244_v56 = vrot.slane %v8759_v30, 4 }
 0x2b8   :  { %v3018_v59 = vadd.f32 %v8739_v48, %v3012_v53  ;;  %v3013_v62 = vmax.f32 %v2704_v10, %v2992_v58  ;;  %v6670_v39 = vpop.f32.mrb[47].mxu1  ;;  %6691 = vmatprep.mubr.msk.bf16.mxu0 %vm3077_vm4, %v8948_v16  ;;  %6791 = vmatprep.mubr.msk.bf16.mxu1 %vm3077_vm4, %v8948_v16  ;;  %v9847_v53 = vrot.slane %v8773_v17, 4  ;;  %v9097_v58 = vld [vmem:[%s9838_s3 + $0x80] sm:$0xff]  }
 0x2b9   :  { %v9129_v39 = vld [vmem:[%s9838_s3 + $0x1b4] sm:$0xff]  }
 0x2ba   :  { %v3019_v9 = vadd.f32 %v8739_v48, %v3013_v62  ;;  %v3024_v4 = vmax.f32 %v3018_v59, 0.0  ;;  %v9102_v59 = vld [vmem:[%s9838_s3 + $0x1ac] sm:$0xff]  }
 0x2bb   :  { %v9122_v62 = vld [vmem:[%s9838_s3 + $0x88] sm:$0xff]  }
 0x2bc   :  { %v3025_v21 = vmax.f32 %v3019_v9, 0.0  ;;  %v9137_v9 = vld [vmem:[%s9838_s3 + $0x90] sm:$0xff]  }
 0x2bd   :  { %v2997_v22 = vpop.f32.mrb[48].mxu1 }
 0x2be   :  { %v8956_v5 = vpack.c.bf16 %v3025_v21, %v3024_v4  ;;  %v3014_v26 = vmax.f32 %v2705_v31, %v2997_v22  ;;  %v6673_v29 = vpop.f32.mrb[49].mxu1  ;;  %v9143_v4 = vld [vmem:[%s9838_s3 + $0x1bc] sm:$0xff]   ;;  %v9157_v22 = vld [vmem:[%s9838_s3 + $0x1c4] sm:$0xff]  }
 0x2bf   :  { %v3000_v32 = vpop.f32.mrb[50].mxu1  ;;  %v9151_v21 = vld [vmem:[%s9838_s3 + $0x98] sm:$0xff]   ;;  %v9171_v29 = vld [vmem:[%s9838_s3 + $0x1cc] sm:$0xff]  }
 0x2c0   :  { %v3020_v45 = vadd.f32 %v8739_v48, %v3014_v26  ;;  %v3015_v35 = vmax.f32 %v2706_v60, %v3000_v32  ;;  %v6674_v49 = vpop.f32.mrb[51].mxu1  ;;  %6692 = vmatmul.mubr.msk.bf16.vlgmr.msra.gmra.mrb[48].mxu0 %vm3077_vm4, %v8956_v5  ;;  %6792 = vmatmul.mubr.msk.bf16.vlgmr.msra.gmra.mrb[52].mxu1 %vm3077_vm4, %v8956_v5  ;;  %v9043_v60 = vld [vmem:[%s9838_s3 + $0x30] sm:$0xff]   ;;  %v9165_v26 = vld [vmem:[%s9838_s3 + $0xa0] sm:$0xff]   ;;  %v9179_v32 = vld [vmem:[%s9838_s3 + $0xa8] sm:$0xff]  }
 0x2c1   :  { %6696 = vmatpush3.bf16.msra.mxu0 %v8935_v40  ;;  %6796 = vmatpush3.bf16.msra.mxu1 %v8940_v41  ;;  %9914 = vst [vmem:[#allocation3_spill] sm:$0xff] %v9179_v32  ;;  %v9199_v49 = vld [vmem:[%s9838_s3 + $0x1dc] ss:$0 sps:$4 sm:$0xff]  }
 0x2c2   :  { %v3021_v10 = vadd.f32 %v8739_v48, %v3015_v35  ;;  %6711 = vmatprep.mubr.msk.bf16.mxu0 %vm3077_vm4, %v8759_v30  ;;  %6811 = vmatprep.mubr.msk.bf16.mxu1 %vm3077_vm4, %v8759_v30  ;;  %v3026_v48 = vmax.f32 %v3020_v45, 0.0  ;;  %v9111_v30 = vsel %vm3084_vm3, %v3244_v56, %v9847_v53  ;;  %v9185_v45 = vld [vmem:[%s9838_s3 + $0x1d4] sm:$0xff]   ;;  %v9193_v35 = vld [vmem:[%s9838_s3 + $0xb0] ss:$0 sps:$4 sm:$0xff]   ;;  %9917 = vst [vmem:[#allocation6_spill] sm:$0xff] %v9199_v49  ;;  %v3247_v56 = vrot.slane %v8789_v50, 4 }
 0x2c3   :  { %6697 = vmatprep.subr.bf16.mxu0 %v8961_v63  ;;  %6797 = vmatprep.subr.bf16.mxu1 %v8966_v3  ;;  %9915 = vst [vmem:[#allocation4_spill] sm:$0xff] %v9185_v45  ;;  %9916 = vst [vmem:[#allocation5_spill] sm:$0xff] %v9193_v35  ;;  %v3360_v53 = vrot.slane %v8956_v5, 4 }
 0x2c4   :  { %v3027_v24 = vmax.f32 %v3021_v10, 0.0  ;;  %v9207_v10 = vsel %vm3084_vm3, %v9193_v35, 0 }
 0x2c5   :  { %6698 = vmatpush3.bf16.msra.mxu0 %v8961_v63  ;;  %6798 = vmatpush3.bf16.msra.mxu1 %v8966_v3  ;;  %9918 = vst [vmem:[#allocation7_spill] sm:$0xff] %v9207_v10 }
 0x2c6   :  { %v8994_v31 = vpack.c.bf16 %v3027_v24, %v3026_v48  ;;  %6699 = vmatprep.subr.bf16.mxu0 %v8983_v13  ;;  %6799 = vmatprep.subr.bf16.mxu1 %v8988_v18  ;;  %v9212_v48 = vld [vmem:[%s9838_s3 + $0xb4] sm:$0xff]   ;;  %v9218_v24 = vsel %vm3084_vm3, %v9199_v49, 0 }
 0x2c7   :  { %9919 = vst [vmem:[#allocation8_spill] sm:$0xff] %v9212_v48  ;;  %9920 = vst [vmem:[#allocation9_spill] sm:$0xff] %v9218_v24 }
 0x2c8   :  { %9913 = vst [vmem:[#allocation2_spill] sm:$0xff] %v8994_v31 }
 0x2c9   :  { %6700 = vmatpush3.bf16.msra.mxu0 %v8983_v13  ;;  %6800 = vmatpush3.bf16.msra.mxu1 %v8988_v18 }
 0x2ca   :  { %6701 = vmatprep.subr.bf16.mxu0 %v9001_v33  ;;  %6801 = vmatprep.subr.bf16.mxu1 %v9006_v36 }
 0x2cd   :  { %6702 = vmatpush3.bf16.msra.mxu0 %v9001_v33  ;;  %6802 = vmatpush3.bf16.msra.mxu1 %v9006_v36 }
 0x2ce   :  { %6703 = vmatprep.subr.bf16.mxu0 %v9015_v51  ;;  %6803 = vmatprep.subr.bf16.mxu1 %v9020_v37 }
 0x2d1   :  { %6704 = vmatpush3.bf16.msra.mxu0 %v9015_v51  ;;  %6804 = vmatpush3.bf16.msra.mxu1 %v9020_v37 }
 0x2d2   :  { %6705 = vmatprep.subr.bf16.mxu0 %v9029_v57  ;;  %6805 = vmatprep.subr.bf16.mxu1 %v9034_v55 }
 0x2d5   :  { %6706 = vmatpush3.bf16.msra.mxu0 %v9029_v57  ;;  %6806 = vmatpush3.bf16.msra.mxu1 %v9034_v55 }
 0x2d6   :  { %6707 = vmatprep.subr.bf16.mxu0 %v9043_v60  ;;  %6807 = vmatprep.subr.bf16.mxu1 %v9048_v61 }
 0x2d9   :  { %6708 = vmatpush3.bf16.msra.mxu0 %v9043_v60  ;;  %6808 = vmatpush3.bf16.msra.mxu1 %v9048_v61 }
 0x2da   :  { %7594 = vmatprep.subr.msk.bf16.mxu0 %vm3084_vm3, %v9057_v2  ;;  %7599 = vmatprep.subr.msk.bf16.mxu1 %vm3084_vm3, %v9062_v15 }
 0x2dd   :  { %6710 = vmatpush3.bf16.msra.mxu0 %v9072_v20  ;;  %6810 = vmatpush3.bf16.msra.mxu1 %v9076_v8 }
 0x2de   :  { %6715 = vmatprep.subr.bf16.mxu0 %v9081_v34  ;;  %6815 = vmatprep.subr.bf16.mxu1 %v9086_v43 }
 0x2e0   :  { %6712 = vmatmul.mubr.msk.bf16.vlgmr.msra.gmra.mrb[48].mxu0 %vm3077_vm4, %v8773_v17  ;;  %6812 = vmatmul.mubr.msk.bf16.vlgmr.msra.gmra.mrb[52].mxu1 %vm3077_vm4, %v8773_v17 }
 0x2e1   :  { %6716 = vmatpush3.bf16.msra.mxu0 %v9081_v34  ;;  %6731 = vmatprep.mubr.msk.bf16.mxu0 %vm3077_vm4, %v9111_v30 }
 0x2e2   :  { %6816 = vmatpush3.bf16.msra.mxu1 %v9086_v43  ;;  %6831 = vmatprep.mubr.msk.bf16.mxu1 %vm3077_vm4, %v9111_v30 }
 0x2e3   :  { %6717 = vmatprep.subr.bf16.mxu0 %v9097_v58  ;;  %6817 = vmatprep.subr.bf16.mxu1 %v9102_v59 }
 0x2e5   :  { %6718 = vmatpush3.bf16.msra.mxu0 %v9097_v58 }
 0x2e6   :  { %6818 = vmatpush3.bf16.msra.mxu1 %v9102_v59  ;;  %6719 = vmatprep.subr.bf16.mxu0 %v9122_v62 }
 0x2e7   :  { %6819 = vmatprep.subr.bf16.mxu1 %v9129_v39 }
 0x2e9   :  { %6720 = vmatpush3.bf16.msra.mxu0 %v9122_v62 }
 0x2ea   :  { %6820 = vmatpush3.bf16.msra.mxu1 %v9129_v39  ;;  %6721 = vmatprep.subr.bf16.mxu0 %v9137_v9 }
 0x2eb   :  { %6821 = vmatprep.subr.bf16.mxu1 %v9143_v4 }
 0x2ed   :  { %6722 = vmatpush3.bf16.msra.mxu0 %v9137_v9 }
 0x2ee   :  { %6822 = vmatpush3.bf16.msra.mxu1 %v9143_v4  ;;  %6723 = vmatprep.subr.bf16.mxu0 %v9151_v21 }
 0x2ef   :  { %6823 = vmatprep.subr.bf16.mxu1 %v9157_v22 }
 0x2f1   :  { %6724 = vmatpush3.bf16.msra.mxu0 %v9151_v21 }
 0x2f2   :  { %6824 = vmatpush3.bf16.msra.mxu1 %v9157_v22  ;;  %6725 = vmatprep.subr.bf16.mxu0 %v9165_v26 }
 0x2f3   :  { %6825 = vmatprep.subr.bf16.mxu1 %v9171_v29 }
 0x2f5   :  { %6726 = vmatpush3.bf16.msra.mxu0 %v9165_v26 }
 0x2f6   :  { %6826 = vmatpush3.bf16.msra.mxu1 %v9171_v29  ;;  %6727 = vmatprep.subr.bf16.mxu0 %v9179_v32 }
 0x2f7   :  { %6827 = vmatprep.subr.bf16.mxu1 %v9185_v45 }
 0x2f9   :  { %6728 = vmatpush3.bf16.msra.mxu0 %v9179_v32  ;;  %v9240_v32 = vld [vmem:[%s9838_s3 + $0xbc] sm:$0xff]  }
 0x2fa   :  { %6828 = vmatpush3.bf16.msra.mxu1 %v9185_v45  ;;  %7595 = vmatprep.subr.msk.bf16.mxu0 %vm3084_vm3, %v9193_v35  ;;  %v9922_v35 = vrot.slane %v8773_v17, 4  ;;  %v3359_v45 = vrot.slane %v8948_v16, 4  ;;  %9923 = vst [vmem:[#allocation11_spill] sm:$0xff] %v9240_v32 }
 0x2fb   :  { %7600 = vmatprep.subr.msk.bf16.mxu1 %vm3084_vm3, %v9199_v49 }
 0x2fc   :  { %v9233_v49 = vsel %vm3084_vm3, %v9922_v35, %v3247_v56  ;;  %v9253_v35 = vsel %vm3084_vm3, %v3359_v45, %v3360_v53  ;;  %v9261_v56 = vld [vmem:[%s9838_s3 + $0xc4] sm:$0xff]   ;;  %v9269_v45 = vld [vmem:[%s9838_s3 + $0x1f0] sm:$0xff]  }
 0x2fd   :  { %6730 = vmatpush3.bf16.msra.mxu0 %v9207_v10  ;;  %9925 = vst [vmem:[#allocation13_spill] sm:$0xff] %v9261_v56  ;;  %9926 = vst [vmem:[#allocation14_spill] sm:$0xff] %v9269_v45  ;;  %v3362_v10 = vrot.slane %v8994_v31, 4 }
 0x2fe   :  { %6830 = vmatpush3.bf16.msra.mxu1 %v9218_v24  ;;  %6735 = vmatprep.subr.bf16.mxu0 %v9212_v48  ;;  %v9247_v24 = vld [vmem:[%s9838_s3 + $0x1e8] sm:$0xff]  }
 0x2ff   :  { %6835 = vmatprep.subr.bf16.mxu1 %v9224_v0  ;;  %9924 = vst [vmem:[#allocation12_spill] sm:$0xff] %v9247_v24  ;;  %v9371_v31 = vsel %vm3084_vm3, %v3360_v53, %v3362_v10  ;;  %v9395_v53 = vld [vmem:[%s9838_s3 + $0x100] sm:$0xff]   ;;  %v9403_v10 = vld [vmem:[%s9838_s3 + $0x22c] sm:$0xff]  }
 0x300   :  { %6732 = vmatmul.mubr.msk.bf16.vlgmr.msra.gmra.mrb[48].mxu0 %vm3077_vm4, %v9233_v49  ;;  %9941 = vst [vmem:[#allocation29_spill] sm:$0xff] %v9395_v53  ;;  %9942 = vst [vmem:[#allocation30_spill] sm:$0xff] %v9403_v10 }
 0x301   :  { %6832 = vmatmul.mubr.msk.bf16.vlgmr.msra.gmra.mrb[52].mxu1 %vm3077_vm4, %v9233_v49  ;;  %6736 = vmatpush3.bf16.msra.mxu0 %v9212_v48  ;;  %v9284_v48 = vld [vmem:[%s9838_s3 + $0x1f8] sm:$0xff]  }
 0x302   :  { %6751 = vmatprep.mubr.msk.bf16.mxu0 %vm3077_vm4, %v9253_v35  ;;  %6836 = vmatpush3.bf16.msra.mxu1 %v9224_v0  ;;  %v9278_v0 = vld [vmem:[%s9838_s3 + $0xcc] sm:$0xff]   ;;  %9928 = vst [vmem:[#allocation16_spill] sm:$0xff] %v9284_v48 }
 0x303   :  { %6851 = vmatprep.mubr.msk.bf16.mxu1 %vm3077_vm4, %v9253_v35  ;;  %6737 = vmatprep.subr.bf16.mxu0 %v9240_v32  ;;  %9927 = vst [vmem:[#allocation15_spill] sm:$0xff] %v9278_v0 }
 0x304   :  { %6837 = vmatprep.subr.bf16.mxu1 %v9247_v24 }
 0x305   :  { %6738 = vmatpush3.bf16.msra.mxu0 %v9240_v32  ;;  %v9298_v32 = vld [vmem:[%s9838_s3 + $0x200] sm:$0xff]  }
 0x306   :  { %6838 = vmatpush3.bf16.msra.mxu1 %v9247_v24  ;;  %6739 = vmatprep.subr.bf16.mxu0 %v9261_v56  ;;  %v9292_v24 = vld [vmem:[%s9838_s3 + $0xd4] sm:$0xff]   ;;  %9930 = vst [vmem:[#allocation18_spill] sm:$0xff] %v9298_v32 }
 0x307   :  { %6839 = vmatprep.subr.bf16.mxu1 %v9269_v45  ;;  %9929 = vst [vmem:[#allocation17_spill] sm:$0xff] %v9292_v24 }
 0x309   :  { %6740 = vmatpush3.bf16.msra.mxu0 %v9261_v56  ;;  %v9312_v56 = vld [vmem:[%s9838_s3 + $0x208] sm:$0xff]  }
 0x30a   :  { %6840 = vmatpush3.bf16.msra.mxu1 %v9269_v45  ;;  %6741 = vmatprep.subr.bf16.mxu0 %v9278_v0  ;;  %v9306_v45 = vld [vmem:[%s9838_s3 + $0xdc] sm:$0xff]   ;;  %9932 = vst [vmem:[#allocation20_spill] sm:$0xff] %v9312_v56 }
 0x30b   :  { %6841 = vmatprep.subr.bf16.mxu1 %v9284_v48  ;;  %9931 = vst [vmem:[#allocation19_spill] sm:$0xff] %v9306_v45 }
 0x30d   :  { %6742 = vmatpush3.bf16.msra.mxu0 %v9278_v0  ;;  %v9326_v0 = vld [vmem:[%s9838_s3 + $0x210] sm:$0xff]  }
 0x30e   :  { %6842 = vmatpush3.bf16.msra.mxu1 %v9284_v48  ;;  %6743 = vmatprep.subr.bf16.mxu0 %v9292_v24  ;;  %v9320_v48 = vld [vmem:[%s9838_s3 + $0xe4] sm:$0xff]   ;;  %9934 = vst [vmem:[#allocation22_spill] sm:$0xff] %v9326_v0 }
 0x30f   :  { %6843 = vmatprep.subr.bf16.mxu1 %v9298_v32  ;;  %9933 = vst [vmem:[#allocation21_spill] sm:$0xff] %v9320_v48 }
 0x311   :  { %6744 = vmatpush3.bf16.msra.mxu0 %v9292_v24  ;;  %v9340_v24 = vld [vmem:[%s9838_s3 + $0x218] ss:$0 sps:$4 sm:$0xff]  }
 0x312   :  { %6844 = vmatpush3.bf16.msra.mxu1 %v9298_v32  ;;  %6745 = vmatprep.subr.bf16.mxu0 %v9306_v45  ;;  %v9334_v32 = vld [vmem:[%s9838_s3 + $0xec] ss:$0 sps:$4 sm:$0xff]   ;;  %9935 = vst [vmem:[#allocation23_spill] sm:$0xff] %v9340_v24 }
 0x313   :  { %6845 = vmatprep.subr.bf16.mxu1 %v9312_v56 }
 0x315   :  { %6746 = vmatpush3.bf16.msra.mxu0 %v9306_v45  ;;  %v9353_v45 = vld [vmem:[%s9838_s3 + $0xf0] sm:$0xff]  }
 0x316   :  { %6846 = vmatpush3.bf16.msra.mxu1 %v9312_v56  ;;  %6747 = vmatprep.subr.bf16.mxu0 %v9320_v48  ;;  %v9348_v56 = vsel %vm3084_vm3, %v9334_v32, 0  ;;  %9937 = vst [vmem:[#allocation25_spill] sm:$0xff] %v9353_v45 }
 0x317   :  { %6847 = vmatprep.subr.bf16.mxu1 %v9326_v0  ;;  %9936 = vst [vmem:[#allocation24_spill] sm:$0xff] %v9348_v56 }
 0x319   :  { %6748 = vmatpush3.bf16.msra.mxu0 %v9320_v48  ;;  %v9365_v48 = vld [vmem:[%s9838_s3 + $0x21c] sm:$0xff]  }
 0x31a   :  { %6848 = vmatpush3.bf16.msra.mxu1 %v9326_v0  ;;  %7596 = vmatprep.subr.msk.bf16.mxu0 %vm3084_vm3, %v9334_v32  ;;  %v9360_v0 = vsel %vm3084_vm3, %v9340_v24, 0  ;;  %9938 = vst [vmem:[#allocation26_spill] sm:$0xff] %v9365_v48 }
 0x31b   :  { %7601 = vmatprep.subr.msk.bf16.mxu1 %vm3084_vm3, %v9340_v24  ;;  %v9377_v24 = vld [vmem:[%s9838_s3 + $0xf8] sm:$0xff]  }
 0x31c   :  { %9939 = vst [vmem:[#allocation27_spill] sm:$0xff] %v9377_v24 }
 0x31d   :  { %6750 = vmatpush3.bf16.msra.mxu0 %v9348_v56  ;;  %v9384_v56 = vld [vmem:[%s9838_s3 + $0x224] sm:$0xff]  }
 0x31e   :  { %6850 = vmatpush3.bf16.msra.mxu1 %v9360_v0  ;;  %6755 = vmatprep.subr.bf16.mxu0 %v9353_v45  ;;  %9940 = vst [vmem:[#allocation28_spill] sm:$0xff] %v9384_v56 }
 0x31f   :  { %6855 = vmatprep.subr.bf16.mxu1 %v9365_v48 }
 0x320   :  { %6752 = vmatmul.mubr.msk.bf16.vlgmr.msra.gmra.mrb[48].mxu0 %vm3077_vm4, %v9371_v31 }
 0x321   :  { %6852 = vmatmul.mubr.msk.bf16.vlgmr.msra.gmra.mrb[52].mxu1 %vm3077_vm4, %v9371_v31  ;;  %6756 = vmatpush3.bf16.msra.mxu0 %v9353_v45  ;;  %v9418_v45 = vld [vmem:[%s9838_s3 + $0x234] sm:$0xff]  }
 0x322   :  { %6771 = vmatprep.mubr.msk.bf16.mxu0 %vm3077_vm4, %v8773_v17  ;;  %6856 = vmatpush3.bf16.msra.mxu1 %v9365_v48  ;;  %v9412_v48 = vld [vmem:[%s9838_s3 + $0x108] sm:$0xff]   ;;  %9944 = vst [vmem:[#allocation32_spill] sm:$0xff] %v9418_v45 }
 0x323   :  { %6871 = vmatprep.mubr.msk.bf16.mxu1 %vm3077_vm4, %v8773_v17  ;;  %6757 = vmatprep.subr.bf16.mxu0 %v9377_v24  ;;  %9943 = vst [vmem:[#allocation31_spill] sm:$0xff] %v9412_v48 }
 0x324   :  { %6857 = vmatprep.subr.bf16.mxu1 %v9384_v56 }
 0x325   :  { %6758 = vmatpush3.bf16.msra.mxu0 %v9377_v24  ;;  %v9432_v24 = vld [vmem:[%s9838_s3 + $0x23c] sm:$0xff]  }
 0x326   :  { %6858 = vmatpush3.bf16.msra.mxu1 %v9384_v56  ;;  %6759 = vmatprep.subr.bf16.mxu0 %v9395_v53  ;;  %v9426_v56 = vld [vmem:[%s9838_s3 + $0x110] sm:$0xff]   ;;  %9946 = vst [vmem:[#allocation34_spill] sm:$0xff] %v9432_v24 }
 0x327   :  { %6859 = vmatprep.subr.bf16.mxu1 %v9403_v10  ;;  %9945 = vst [vmem:[#allocation33_spill] sm:$0xff] %v9426_v56 }
 0x329   :  { %6760 = vmatpush3.bf16.msra.mxu0 %v9395_v53  ;;  %v9446_v53 = vld [vmem:[%s9838_s3 + $0x244] sm:$0xff]  }
 0x32a   :  { %6860 = vmatpush3.bf16.msra.mxu1 %v9403_v10  ;;  %6761 = vmatprep.subr.bf16.mxu0 %v9412_v48  ;;  %v9440_v10 = vld [vmem:[%s9838_s3 + $0x118] sm:$0xff]   ;;  %9948 = vst [vmem:[#allocation36_spill] sm:$0xff] %v9446_v53 }
 0x32b   :  { %6861 = vmatprep.subr.bf16.mxu1 %v9418_v45  ;;  %9947 = vst [vmem:[#allocation35_spill] sm:$0xff] %v9440_v10 }
 0x32d   :  { %6762 = vmatpush3.bf16.msra.mxu0 %v9412_v48  ;;  %v9460_v48 = vld [vmem:[%s9838_s3 + $0x24c] sm:$0xff]  }
 0x32e   :  { %6862 = vmatpush3.bf16.msra.mxu1 %v9418_v45  ;;  %6763 = vmatprep.subr.bf16.mxu0 %v9426_v56  ;;  %v9454_v45 = vld [vmem:[%s9838_s3 + $0x120] sm:$0xff]  }
 0x32f   :  { %6863 = vmatprep.subr.bf16.mxu1 %v9432_v24 }
 0x331   :  { %6764 = vmatpush3.bf16.msra.mxu0 %v9426_v56  ;;  %v9474_v56 = vld [vmem:[%s9838_s3 + $0x254] ss:$0 sps:$4 sm:$0xff]  }
 0x332   :  { %6864 = vmatpush3.bf16.msra.mxu1 %v9432_v24  ;;  %6765 = vmatprep.subr.bf16.mxu0 %v9440_v10  ;;  %v9468_v24 = vld [vmem:[%s9838_s3 + $0x128] ss:$0 sps:$4 sm:$0xff]  }
 0x333   :  { %6865 = vmatprep.subr.bf16.mxu1 %v9446_v53  ;;  %9949 = vst [vmem:[#allocation37_spill] sm:$0xff] %v9468_v24 }
 0x335   :  { %6766 = vmatpush3.bf16.msra.mxu0 %v9440_v10  ;;  %v9488_v10 = vsel %vm3084_vm3, %v9474_v56, 0 }
 0x336   :  { %6866 = vmatpush3.bf16.msra.mxu1 %v9446_v53  ;;  %6767 = vmatprep.subr.bf16.mxu0 %v9454_v45  ;;  %v9482_v53 = vsel %vm3084_vm3, %v9468_v24, 0 }
 0x337   :  { %6867 = vmatprep.subr.bf16.mxu1 %v9460_v48 }
 0x339   :  { %6768 = vmatpush3.bf16.msra.mxu0 %v9454_v45 }
 0x33a   :  { %6868 = vmatpush3.bf16.msra.mxu1 %v9460_v48  ;;  %7597 = vmatprep.subr.msk.bf16.mxu0 %vm3084_vm3, %v9468_v24  ;;  %v7743_v24 = vld [vmem:[%s9838_s3 + $0x3c] sm:$0xff]  }
 0x33b   :  { %7602 = vmatprep.subr.msk.bf16.mxu1 %vm3084_vm3, %v9474_v56 }
 0x33d   :  { %6770 = vmatpush3.bf16.msra.mxu0 %v9482_v53 }
 0x33e   :  { %6870 = vmatpush3.bf16.msra.mxu1 %v9488_v10  ;;  %6875 = vmatprep.subr.bf16.mxu0 %v8803_v38  ;;  %v7744_v38 = vld [vmem:[%s9838_s3 + $0x168] sm:$0xff]  }
 0x33f   :  { %6975 = vmatprep.subr.bf16.mxu1 %v8808_v11  ;;  %v9950_v11 = vld [vmem:[#allocation3_spill] sm:$0xff] }
 0x340   :  { %6772 = vmatmul.mubr.msk.bf16.vlgmr.msra.gmra.mrb[48].mxu0 %vm3077_vm4, %v8789_v50 }
 0x341   :  { %6872 = vmatmul.mubr.msk.bf16.vlgmr.msra.gmra.mrb[52].mxu1 %vm3077_vm4, %v8789_v50  ;;  %6876 = vmatpush3.bf16.msra.mxu0 %v7743_v24  ;;  %v7723_v24 = vld [vmem:[%s9839_s5 + $0x20] sm:$0xff]  }
 0x342   :  { %6891 = vmatprep.mubr.msk.bf16.mxu0 %vm3077_vm4, %v9111_v30  ;;  %6976 = vmatpush3.bf16.msra.mxu1 %v7744_v38  ;;  %v5544_v38 = vld [vmem:[%s9840_s4] ss:$0 sm:$0xff] }
 0x343   :  { %6991 = vmatprep.mubr.msk.bf16.mxu1 %vm3077_vm4, %v9111_v30  ;;  %6877 = vmatprep.subr.bf16.mxu0 %v8816_v44 }
 0x344   :  { %6977 = vmatprep.subr.bf16.mxu1 %v8821_v47 }
 0x345   :  { %6878 = vmatpush3.bf16.msra.mxu0 %v8816_v44  ;;  %v9951_v44 = vld [vmem:[#allocation4_spill] sm:$0xff] }
 0x346   :  { %6978 = vmatpush3.bf16.msra.mxu1 %v8821_v47  ;;  %6879 = vmatprep.subr.bf16.mxu0 %v8833_v1  ;;  %v9952_v47 = vld [vmem:[#allocation5_spill] sm:$0xff] }
 0x347   :  { %6979 = vmatprep.subr.bf16.mxu1 %v8838_v6 }
 0x349   :  { %6880 = vmatpush3.bf16.msra.mxu0 %v8833_v1  ;;  %v9953_v1 = vld [vmem:[#allocation6_spill] sm:$0xff] }
 0x34a   :  { %6980 = vmatpush3.bf16.msra.mxu1 %v8838_v6  ;;  %6881 = vmatprep.subr.bf16.mxu0 %v8848_v19  ;;  %v9954_v6 = vld [vmem:[#allocation7_spill] sm:$0xff] }
 0x34b   :  { %6981 = vmatprep.subr.bf16.mxu1 %v8853_v23 }
 0x34d   :  { %6882 = vmatpush3.bf16.msra.mxu0 %v8848_v19  ;;  %v9955_v19 = vld [vmem:[#allocation9_spill] sm:$0xff] }
 0x34e   :  { %6982 = vmatpush3.bf16.msra.mxu1 %v8853_v23  ;;  %6883 = vmatprep.subr.bf16.mxu0 %v8865_v25  ;;  %v9956_v23 = vld [vmem:[#allocation8_spill] sm:$0xff] }
 0x34f   :  { %6983 = vmatprep.subr.bf16.mxu1 %v8870_v28 }
 0x351   :  { %6884 = vmatpush3.bf16.msra.mxu0 %v8865_v25  ;;  %v9957_v25 = vld [vmem:[#allocation10_spill] sm:$0xff] }
 0x352   :  { %6984 = vmatpush3.bf16.msra.mxu1 %v8870_v28  ;;  %6885 = vmatprep.subr.bf16.mxu0 %v8881_v42  ;;  %v9958_v28 = vld [vmem:[#allocation11_spill] sm:$0xff] }
 0x353   :  { %6985 = vmatprep.subr.bf16.mxu1 %v8886_v46 }
 0x355   :  { %6886 = vmatpush3.bf16.msra.mxu0 %v8881_v42  ;;  %v9959_v42 = vld [vmem:[#allocation12_spill] sm:$0xff] }
 0x356   :  { %6986 = vmatpush3.bf16.msra.mxu1 %v8886_v46  ;;  %6887 = vmatprep.subr.bf16.mxu0 %v8895_v52  ;;  %v9960_v46 = vld [vmem:[#allocation13_spill] sm:$0xff] }
 0x357   :  { %6987 = vmatprep.subr.bf16.mxu1 %v8900_v54 }
 0x359   :  { %6888 = vmatpush3.bf16.msra.mxu0 %v8895_v52  ;;  %v9961_v52 = vld [vmem:[#allocation14_spill] sm:$0xff] }
 0x35a   :  { %6988 = vmatpush3.bf16.msra.mxu1 %v8900_v54  ;;  %7603 = vmatprep.subr.msk.bf16.mxu0 %vm3084_vm3, %v8911_v12  ;;  %v9962_v54 = vld [vmem:[#allocation15_spill] sm:$0xff]  ;;  %v9963_v12 = vld [vmem:[#allocation16_spill] sm:$0xff] }
 0x35b   :  { %7608 = vmatprep.subr.msk.bf16.mxu1 %vm3084_vm3, %v8916_v14  ;;  %v9965_v14 = vld [vmem:[#allocation18_spill] sm:$0xff] }
 0x35d   :  { %6890 = vmatpush3.bf16.msra.mxu0 %v8924_v7  ;;  %v9966_v7 = vld [vmem:[#allocation19_spill] sm:$0xff] }
 0x35e   :  { %6990 = vmatpush3.bf16.msra.mxu1 %v8928_v27  ;;  %6895 = vmatprep.subr.bf16.mxu0 %v8935_v40  ;;  %v9967_v27 = vld [vmem:[#allocation20_spill] sm:$0xff] }
 0x35f   :  { %6995 = vmatprep.subr.bf16.mxu1 %v8940_v41 }
 0x360   :  { %6892 = vmatmul.mubr.msk.bf16.vlgmr.msra.gmra.mrb[52].mxu0 %vm3077_vm4, %v9233_v49 }
 0x361   :  { %6992 = vmatmul.mubr.msk.bf16.vlgmr.msra.gmra.mrb[56].mxu1 %vm3077_vm4, %v9233_v49  ;;  %6896 = vmatpush3.bf16.msra.mxu0 %v8935_v40  ;;  %v9968_v40 = vld [vmem:[#allocation21_spill] sm:$0xff] }
 0x362   :  { %6911 = vmatprep.mubr.msk.bf16.mxu0 %vm3077_vm4, %v8948_v16  ;;  %6996 = vmatpush3.bf16.msra.mxu1 %v8940_v41  ;;  %v9969_v41 = vld [vmem:[#allocation22_spill] sm:$0xff]  ;;  %v7721_v49 = vld [vmem:[%s9839_s5 + $0x18] sm:$0xff]  }
 0x363   :  { %7011 = vmatprep.mubr.msk.bf16.mxu1 %vm3077_vm4, %v8948_v16  ;;  %6897 = vmatprep.subr.bf16.mxu0 %v8961_v63  ;;  %v9970_v16 = vld [vmem:[#allocation23_spill] sm:$0xff] }
 0x364   :  { %6997 = vmatprep.subr.bf16.mxu1 %v8966_v3 }
 0x365   :  { %6898 = vmatpush3.bf16.msra.mxu0 %v8961_v63  ;;  %v9971_v63 = vld [vmem:[#allocation24_spill] sm:$0xff] }
 0x366   :  { %6998 = vmatpush3.bf16.msra.mxu1 %v8966_v3  ;;  %6899 = vmatprep.subr.bf16.mxu0 %v8983_v13  ;;  %v9972_v3 = vld [vmem:[#allocation25_spill] sm:$0xff] }
 0x367   :  { %6999 = vmatprep.subr.bf16.mxu1 %v8988_v18 }
 0x369   :  { %6900 = vmatpush3.bf16.msra.mxu0 %v8983_v13  ;;  %v9973_v13 = vld [vmem:[#allocation26_spill] sm:$0xff] }
 0x36a   :  { %7000 = vmatpush3.bf16.msra.mxu1 %v8988_v18  ;;  %6901 = vmatprep.subr.bf16.mxu0 %v9001_v33  ;;  %v9975_v18 = vld [vmem:[#allocation28_spill] sm:$0xff] }
 0x36b   :  { %7001 = vmatprep.subr.bf16.mxu1 %v9006_v36 }
 0x36d   :  { %6902 = vmatpush3.bf16.msra.mxu0 %v9001_v33  ;;  %v9978_v33 = vld [vmem:[#allocation31_spill] sm:$0xff] }
 0x36e   :  { %7002 = vmatpush3.bf16.msra.mxu1 %v9006_v36  ;;  %6903 = vmatprep.subr.bf16.mxu0 %v9015_v51  ;;  %v9979_v36 = vld [vmem:[#allocation32_spill] sm:$0xff] }
 0x36f   :  { %7003 = vmatprep.subr.bf16.mxu1 %v9020_v37 }
 0x371   :  { %6904 = vmatpush3.bf16.msra.mxu0 %v9015_v51  ;;  %v9981_v51 = vld [vmem:[#allocation34_spill] sm:$0xff] }
 0x372   :  { %7004 = vmatpush3.bf16.msra.mxu1 %v9020_v37  ;;  %6905 = vmatprep.subr.bf16.mxu0 %v9029_v57  ;;  %v9982_v37 = vld [vmem:[#allocation35_spill] sm:$0xff] }
 0x373   :  { %7005 = vmatprep.subr.bf16.mxu1 %v9034_v55 }
 0x375   :  { %6906 = vmatpush3.bf16.msra.mxu0 %v9029_v57  ;;  %v9983_v57 = vld [vmem:[#allocation36_spill] sm:$0xff] }
 0x376   :  { %7006 = vmatpush3.bf16.msra.mxu1 %v9034_v55  ;;  %6907 = vmatprep.subr.bf16.mxu0 %v9043_v60  ;;  %v9984_v55 = vld [vmem:[#allocation37_spill] sm:$0xff] }
 0x377   :  { %7007 = vmatprep.subr.bf16.mxu1 %v9048_v61 }
 0x379   :  { %6908 = vmatpush3.bf16.msra.mxu0 %v9043_v60  ;;  %v7716_v60 = vld [vmem:[%s9839_s5 + $0x28] sm:$0xff]  }
 0x37a   :  { %7008 = vmatpush3.bf16.msra.mxu1 %v9048_v61  ;;  %7604 = vmatprep.subr.msk.bf16.mxu0 %vm3084_vm3, %v9057_v2  ;;  %v7715_v61 = vld [vmem:[%s9839_s5] sm:$0xff]   ;;  %v9985_v2 = vmov 0.0  }
 0x37b   :  { %7609 = vmatprep.subr.msk.bf16.mxu1 %vm3084_vm3, %v9062_v15  ;;  %v9986_v15 = vld [vmem:[#allocation2_spill] sm:$0xff] }
 0x37d   :  { %6910 = vmatpush3.bf16.msra.mxu0 %v9072_v20  ;;  %v7717_v20 = vld [vmem:[%s9839_s5 + $0x8] sm:$0xff]  }
 0x37e   :  { %7010 = vmatpush3.bf16.msra.mxu1 %v9076_v8  ;;  %6915 = vmatprep.subr.bf16.mxu0 %v9081_v34 }
 0x37f   :  { %7015 = vmatprep.subr.bf16.mxu1 %v9086_v43 }
 0x380   :  { %6912 = vmatmul.mubr.msk.bf16.vlgmr.msra.gmra.mrb[52].mxu0 %vm3077_vm4, %v8956_v5 }
 0x381   :  { %7012 = vmatmul.mubr.msk.bf16.vlgmr.msra.gmra.mrb[56].mxu1 %vm3077_vm4, %v8956_v5  ;;  %6916 = vmatpush3.bf16.msra.mxu0 %v9081_v34 }
 0x382   :  { %6931 = vmatprep.mubr.msk.bf16.mxu0 %vm3077_vm4, %v9253_v35  ;;  %7016 = vmatpush3.bf16.msra.mxu1 %v9086_v43 }
 0x383   :  { %7031 = vmatprep.mubr.msk.bf16.mxu1 %vm3077_vm4, %v9253_v35  ;;  %6917 = vmatprep.subr.bf16.mxu0 %v9097_v58  ;;  %v7724_v35 = vld [vmem:[%s9839_s5 + $0x48] sm:$0xff]  }
 0x384   :  { %7017 = vmatprep.subr.bf16.mxu1 %v9102_v59 }
 0x385   :  { %6918 = vmatpush3.bf16.msra.mxu0 %v9097_v58 }
 0x386   :  { %7018 = vmatpush3.bf16.msra.mxu1 %v9102_v59  ;;  %6919 = vmatprep.subr.bf16.mxu0 %v9122_v62 }
 0x387   :  { %7019 = vmatprep.subr.bf16.mxu1 %v9129_v39 }
 0x389   :  { %6920 = vmatpush3.bf16.msra.mxu0 %v9122_v62 }
 0x38a   :  { %7020 = vmatpush3.bf16.msra.mxu1 %v9129_v39  ;;  %6921 = vmatprep.subr.bf16.mxu0 %v9137_v9 }
 0x38b   :  { %7021 = vmatprep.subr.bf16.mxu1 %v9143_v4 }
 0x38d   :  { %6922 = vmatpush3.bf16.msra.mxu0 %v9137_v9 }
 0x38e   :  { %7022 = vmatpush3.bf16.msra.mxu1 %v9143_v4  ;;  %6923 = vmatprep.subr.bf16.mxu0 %v9151_v21 }
 0x38f   :  { %7023 = vmatprep.subr.bf16.mxu1 %v9157_v22 }
 0x391   :  { %6924 = vmatpush3.bf16.msra.mxu0 %v9151_v21 }
 0x392   :  { %7024 = vmatpush3.bf16.msra.mxu1 %v9157_v22  ;;  %6925 = vmatprep.subr.bf16.mxu0 %v9165_v26 }
 0x393   :  { %7025 = vmatprep.subr.bf16.mxu1 %v9171_v29 }
 0x395   :  { %6926 = vmatpush3.bf16.msra.mxu0 %v9165_v26  ;;  %v7718_v26 = vld [vmem:[%s9839_s5 + $0x30] sm:$0xff]  }
 0x396   :  { %7026 = vmatpush3.bf16.msra.mxu1 %v9171_v29  ;;  %6927 = vmatprep.subr.bf16.mxu0 %v9950_v11  ;;  %v7719_v29 = vld [vmem:[%s9839_s5 + $0x10] sm:$0xff]  }
 0x397   :  { %7027 = vmatprep.subr.bf16.mxu1 %v9951_v44 }
 0x399   :  { %6928 = vmatpush3.bf16.msra.mxu0 %v9950_v11 }
 0x39a   :  { %7028 = vmatpush3.bf16.msra.mxu1 %v9951_v44  ;;  %7605 = vmatprep.subr.msk.bf16.mxu0 %vm3084_vm3, %v9952_v47 }
 0x39b   :  { %7610 = vmatprep.subr.msk.bf16.mxu1 %vm3084_vm3, %v9953_v1 }
 0x39d   :  { %6930 = vmatpush3.bf16.msra.mxu0 %v9954_v6 }
 0x39e   :  { %7030 = vmatpush3.bf16.msra.mxu1 %v9955_v19  ;;  %6935 = vmatprep.subr.bf16.mxu0 %v9956_v23 }
 0x39f   :  { %7035 = vmatprep.subr.bf16.mxu1 %v9957_v25 }
 0x3a0   :  { %6932 = vmatmul.mubr.msk.bf16.vlgmr.msra.gmra.mrb[52].mxu0 %vm3077_vm4, %v9371_v31 }
 0x3a1   :  { %7032 = vmatmul.mubr.msk.bf16.vlgmr.msra.gmra.mrb[56].mxu1 %vm3077_vm4, %v9371_v31  ;;  %6936 = vmatpush3.bf16.msra.mxu0 %v9956_v23  ;;  %v9976_v31 = vld [vmem:[#allocation29_spill] sm:$0xff] }
 0x3a2   :  { %6951 = vmatprep.mubr.msk.bf16.mxu0 %vm3077_vm4, %v8773_v17  ;;  %7036 = vmatpush3.bf16.msra.mxu1 %v9957_v25 }
 0x3a3   :  { %7051 = vmatprep.mubr.msk.bf16.mxu1 %vm3077_vm4, %v8773_v17  ;;  %6937 = vmatprep.subr.bf16.mxu0 %v9958_v28  ;;  %v9964_v17 = vld [vmem:[#allocation17_spill] sm:$0xff] }
 0x3a4   :  { %7037 = vmatprep.subr.bf16.mxu1 %v9959_v42 }
 0x3a5   :  { %6938 = vmatpush3.bf16.msra.mxu0 %v9958_v28 }
 0x3a6   :  { %7038 = vmatpush3.bf16.msra.mxu1 %v9959_v42  ;;  %6939 = vmatprep.subr.bf16.mxu0 %v9960_v46 }
 0x3a7   :  { %7039 = vmatprep.subr.bf16.mxu1 %v9961_v52 }
 0x3a9   :  { %6940 = vmatpush3.bf16.msra.mxu0 %v9960_v46 }
 0x3aa   :  { %7040 = vmatpush3.bf16.msra.mxu1 %v9961_v52  ;;  %6941 = vmatprep.subr.bf16.mxu0 %v9962_v54 }
 0x3ab   :  { %7041 = vmatprep.subr.bf16.mxu1 %v9963_v12 }
 0x3ad   :  { %6942 = vmatpush3.bf16.msra.mxu0 %v9962_v54 }
 0x3ae   :  { %7042 = vmatpush3.bf16.msra.mxu1 %v9963_v12  ;;  %6943 = vmatprep.subr.bf16.mxu0 %v9964_v17 }
 0x3af   :  { %7043 = vmatprep.subr.bf16.mxu1 %v9965_v14 }
 0x3b1   :  { %6944 = vmatpush3.bf16.msra.mxu0 %v9964_v17 }
 0x3b2   :  { %7044 = vmatpush3.bf16.msra.mxu1 %v9965_v14  ;;  %6945 = vmatprep.subr.bf16.mxu0 %v9966_v7 }
 0x3b3   :  { %7045 = vmatprep.subr.bf16.mxu1 %v9967_v27 }
 0x3b5   :  { %6946 = vmatpush3.bf16.msra.mxu0 %v9966_v7 }
 0x3b6   :  { %7046 = vmatpush3.bf16.msra.mxu1 %v9967_v27  ;;  %6947 = vmatprep.subr.bf16.mxu0 %v9968_v40 }
 0x3b7   :  { %7047 = vmatprep.subr.bf16.mxu1 %v9969_v41 }
 0x3b9   :  { %6948 = vmatpush3.bf16.msra.mxu0 %v9968_v40 }
 0x3ba   :  { %7048 = vmatpush3.bf16.msra.mxu1 %v9969_v41  ;;  %7606 = vmatprep.subr.msk.bf16.mxu0 %vm3084_vm3, %v9334_v32  ;;  %v7720_v32 = vld [vmem:[%s9839_s5 + $0x38] sm:$0xff]  }
 0x3bb   :  { %7611 = vmatprep.subr.msk.bf16.mxu1 %vm3084_vm3, %v9970_v16 }
 0x3bd   :  { %6950 = vmatpush3.bf16.msra.mxu0 %v9971_v63  ;;  %v7725_v63 = vld [vmem:[%s9839_s5 + $0x78] sm:$0xff]  }
 0x3be   :  { %7050 = vmatpush3.bf16.msra.mxu1 %v9360_v0  ;;  %6955 = vmatprep.subr.bf16.mxu0 %v9972_v3  ;;  %v9974_v0 = vld [vmem:[#allocation27_spill] sm:$0xff] }
 0x3bf   :  { %7055 = vmatprep.subr.bf16.mxu1 %v9973_v13 }
 0x3c0   :  { %6952 = vmatmul.mubr.msk.bf16.vlgmr.msra.gmra.mrb[52].mxu0 %vm3077_vm4, %v8789_v50 }
 0x3c1   :  { %7052 = vmatmul.mubr.msk.bf16.vlgmr.msra.gmra.mrb[56].mxu1 %vm3077_vm4, %v8789_v50  ;;  %6956 = vmatpush3.bf16.msra.mxu0 %v9972_v3  ;;  %v9977_v50 = vld [vmem:[#allocation30_spill] sm:$0xff] }
 0x3c2   :  { %6971 = vmatprep.mubr.msk.bf16.mxu0 %vm3077_vm4, %v8956_v5  ;;  %7056 = vmatpush3.bf16.msra.mxu1 %v9973_v13  ;;  %v7726_v13 = vld [vmem:[%s9839_s5 + $0x50] sm:$0xff]  }
 0x3c3   :  { %7071 = vmatprep.mubr.msk.bf16.mxu1 %vm3077_vm4, %v8956_v5  ;;  %6957 = vmatprep.subr.bf16.mxu0 %v9974_v0  ;;  %v9980_v5 = vld [vmem:[#allocation33_spill] sm:$0xff] }
 0x3c4   :  { %7057 = vmatprep.subr.bf16.mxu1 %v9975_v18 }
 0x3c5   :  { %6958 = vmatpush3.bf16.msra.mxu0 %v9974_v0 }
 0x3c6   :  { %7058 = vmatpush3.bf16.msra.mxu1 %v9975_v18  ;;  %6959 = vmatprep.subr.bf16.mxu0 %v9976_v31  ;;  %v7727_v18 = vld [vmem:[%s9839_s5 + $0x80] sm:$0xff]  }
 0x3c7   :  { %7059 = vmatprep.subr.bf16.mxu1 %v9977_v50 }
 0x3c9   :  { %6960 = vmatpush3.bf16.msra.mxu0 %v9976_v31  ;;  %v7728_v31 = vld [vmem:[%s9839_s5 + $0x58] sm:$0xff]  }
 0x3ca   :  { %7060 = vmatpush3.bf16.msra.mxu1 %v9977_v50  ;;  %6961 = vmatprep.subr.bf16.mxu0 %v9978_v33  ;;  %v7729_v50 = vld [vmem:[%s9839_s5 + $0x88] sm:$0xff]  }
 0x3cb   :  { %7061 = vmatprep.subr.bf16.mxu1 %v9979_v36 }
 0x3cd   :  { %6962 = vmatpush3.bf16.msra.mxu0 %v9978_v33  ;;  %v7730_v33 = vld [vmem:[%s9839_s5 + $0x60] sm:$0xff]  }
 0x3ce   :  { %7062 = vmatpush3.bf16.msra.mxu1 %v9979_v36  ;;  %6963 = vmatprep.subr.bf16.mxu0 %v9980_v5  ;;  %v7731_v36 = vld [vmem:[%s9839_s5 + $0x90] sm:$0xff]  }
 0x3cf   :  { %7063 = vmatprep.subr.bf16.mxu1 %v9981_v51 }
 0x3d1   :  { %6964 = vmatpush3.bf16.msra.mxu0 %v9980_v5  ;;  %v7732_v5 = vld [vmem:[%s9839_s5 + $0x68] sm:$0xff]  }
 0x3d2   :  { %7064 = vmatpush3.bf16.msra.mxu1 %v9981_v51  ;;  %6965 = vmatprep.subr.bf16.mxu0 %v9982_v37  ;;  %v7733_v51 = vld [vmem:[%s9839_s5 + $0x98] sm:$0xff]  }
 0x3d3   :  { %7065 = vmatprep.subr.bf16.mxu1 %v9983_v57 }
 0x3d5   :  { %6966 = vmatpush3.bf16.msra.mxu0 %v9982_v37  ;;  %v7734_v37 = vld [vmem:[%s9839_s5 + $0x70] sm:$0xff]  }
 0x3d6   :  { %7066 = vmatpush3.bf16.msra.mxu1 %v9983_v57  ;;  %6967 = vmatprep.subr.bf16.mxu0 %v9454_v45 }
 0x3d7   :  { %7067 = vmatprep.subr.bf16.mxu1 %v9460_v48 }
 0x3d9   :  { %6968 = vmatpush3.bf16.msra.mxu0 %v9454_v45 }
 0x3da   :  { %7068 = vmatpush3.bf16.msra.mxu1 %v9460_v48  ;;  %7607 = vmatprep.subr.msk.bf16.mxu0 %vm3084_vm3, %v9984_v55  ;;  %v7722_v48 = vld [vmem:[%s9839_s5 + $0x40] sm:$0xff]  }
 0x3db   :  { %7612 = vmatprep.subr.msk.bf16.mxu1 %vm3084_vm3, %v9474_v56  ;;  %v7735_v55 = vld [vmem:[%s9841_s7] sm:$0xff]  }
 0x3dd   :  { %6970 = vmatpush3.bf16.msra.mxu0 %v9482_v53 }
 0x3de   :  { %7070 = vmatpush3.bf16.msra.mxu1 %v9488_v10  ;;  %7075 = vmatprep.subr.bf16.mxu0 %v9985_v2 }
 0x3df   :  { %7089 = vmatprep.subr.bf16.mxu1 %v9985_v2 }
 0x3e0   :  { %6972 = vmatmul.mubr.msk.bf16.vlgmr.msra.gmra.mrb[52].mxu0 %vm3077_vm4, %v9986_v15 }
 0x3e1   :  { %7072 = vmatmul.mubr.msk.bf16.vlgmr.msra.gmra.mrb[56].mxu1 %vm3077_vm4, %v9986_v15  ;;  %7076 = vmatpush3.bf16.msra.mxu0 %v7716_v60  ;;  %v7736_v60 = vld [vmem:[%s9841_s7 + $0x8] sm:$0xff]   ;;  %v7738_v15 = vld [vmem:[%s9841_s7 + $0x18] ss:$0 sps:$4 sm:$0x11]  }
 0x3e2   :  { %7090 = vmatpush3.bf16.msra.mxu1 %v7715_v61  ;;  %7077 = vmatprep.subr.bf16.mxu0 %v9985_v2  ;;  %v7737_v61 = vld [vmem:[%s9841_s7 + $0x10] sm:$0xff]  }
 0x3e3   :  { %7091 = vmatprep.subr.bf16.mxu1 %v9985_v2  ;;  %7099 = vmatprep.mubr.msk.bf16.mxu1 %vm7746_vm1, %v9985_v2 }
 0x3e4   :  { %7085 = vmatprep.mubr.msk.bf16.mxu0 %vm7746_vm1, %v9985_v2 }
 0x3e5   :  { %7078 = vmatpush3.bf16.msra.mxu0 %v7718_v26 }
 0x3e6   :  { %7092 = vmatpush3.bf16.msra.mxu1 %v7717_v20  ;;  %7079 = vmatprep.subr.bf16.mxu0 %v9985_v2  ;;  %v5010_v20 = vsel %vm5008_vm6, %v7738_v15, 0 }
 0x3e7   :  { %7093 = vmatprep.subr.bf16.mxu1 %v9985_v2 }
 0x3e9   :  { %7080 = vmatpush3.bf16.msra.mxu0 %v7720_v32 }
 0x3ea   :  { %7094 = vmatpush3.bf16.msra.mxu1 %v7719_v29  ;;  %7081 = vmatprep.subr.bf16.mxu0 %v9985_v2 }
 0x3eb   :  { %7095 = vmatprep.subr.bf16.mxu1 %v9985_v2 }
 0x3ed   :  { %7082 = vmatpush3.bf16.msra.mxu0 %v7722_v48 }
 0x3ee   :  { %7096 = vmatpush3.bf16.msra.mxu1 %v7721_v49  ;;  %7083 = vmatprep.subr.bf16.mxu0 %v9985_v2  ;;  %v5599_v49 = vld [vmem:[%s9842_s6] ss:$0 sm:$0xff] }
 0x3ef   :  { %7097 = vmatprep.subr.bf16.mxu1 %v9985_v2 }
 0x3f1   :  { %7084 = vmatpush3.bf16.msra.mxu0 %v7724_v35 }
 0x3f2   :  { %7098 = vmatpush3.bf16.msra.mxu1 %v7723_v24  ;;  %7103 = vmatprep.subr.bf16.mxu0 %v9985_v2 }
 0x3f3   :  { %7117 = vmatprep.subr.bf16.mxu1 %v9985_v2 }
 0x413   :  { %v6773_v8 = vpop.f32.mrb[48].mxu0 }
 0x414   :  { %v6873_v34 = vpop.f32.mrb[52].mxu1  ;;  %v3556_v43 = vpop.f32.mrb[49].mxu0 }
 0x415   :  { %v4074_v58 = vmax.f32 %v6773_v8, %v6873_v34  ;;  %v4053_v59 = vpop.f32.mrb[53].mxu1  ;;  %v6774_v30 = vpop.f32.mrb[50].mxu0 }
 0x416   :  { %v4072_v62 = vmax.f32 %v3556_v43, %v4053_v59  ;;  %v6874_v39 = vpop.f32.mrb[54].mxu1  ;;  %v3559_v9 = vpop.f32.mrb[51].mxu0 }
 0x417   :  { %v4075_v4 = vmax.f32 %v6774_v30, %v6874_v39  ;;  %v4056_v21 = vpop.f32.mrb[55].mxu1 }
 0x418   :  { %v4073_v22 = vmax.f32 %v3559_v9, %v4056_v21 }
 0x4b3   :  { %v6973_v56 = vpop.f32.mrb[52].mxu0 }
 0x4b4   :  { %v4338_v45 = vmax.f32 %v4074_v58, %v6973_v56  ;;  %v7073_v53 = vpop.f32.mrb[56].mxu1  ;;  %v4317_v10 = vpop.f32.mrb[53].mxu0 }
 0x4b5   :  { %v4336_v11 = vmax.f32 %v4072_v62, %v4317_v10  ;;  %v4578_v44 = vpop.f32.mrb[57].mxu1  ;;  %v6974_v47 = vpop.f32.mrb[54].mxu0  ;;  %v5600_v10 = vld [vmem:[%s9843_s8] ss:$0 sm:$0xff] }
 0x4b6   :  { %v4599_v1 = vmax.f32 %v4338_v45, %v7073_v53  ;;  %v4339_v6 = vmax.f32 %v4075_v4, %v6974_v47  ;;  %v7074_v19 = vpop.f32.mrb[58].mxu1  ;;  %v4320_v23 = vpop.f32.mrb[55].mxu0 }
 0x4b7   :  { %v4597_v25 = vmax.f32 %v4336_v11, %v4578_v44  ;;  %v4337_v28 = vmax.f32 %v4073_v22, %v4320_v23  ;;  %v4581_v42 = vpop.f32.mrb[59].mxu1 }
 0x4b8   :  { %v4609_v46 = vadd.f32 %v5544_v38, %v4599_v1  ;;  %v4600_v52 = vmax.f32 %v4339_v6, %v7074_v19 }
 0x4b9   :  { %v4607_v54 = vadd.f32 %v5544_v38, %v4597_v25  ;;  %v4598_v12 = vmax.f32 %v4337_v28, %v4581_v42 }
 0x4ba   :  { %v4610_v17 = vadd.f32 %v5544_v38, %v4600_v52  ;;  %v4613_v7 = vmax.f32 %v4609_v46, 0.0 }
 0x4bb   :  { %v4608_v14 = vadd.f32 %v5544_v38, %v4598_v12  ;;  %v4611_v40 = vmax.f32 %v4607_v54, 0.0 }
 0x4bc   :  { %v4614_v27 = vmax.f32 %v4610_v17, 0.0 }
 0x4bd   :  { %v4612_v41 = vmax.f32 %v4608_v14, 0.0 }
 0x4be   :  { %v4616_v16 = vpack.c.bf16 %v4614_v27, %v4613_v7 }
 0x4bf   :  { %v4615_v3 = vpack.c.bf16 %v4612_v41, %v4611_v40 }
 0x4c0   :  { %v4884_v57 = vrot.slane %v4616_v16, 4 }
 0x4c1   :  { %v4639_v0 = vrot.slane %v4615_v3, 4  ;;  %7100 = vmatmul.mubr.msk.bf16.vlgmr.msra.gmra.mrb[60].mxu1 %vm4670_vm5, %v4615_v3 }
 0x4c2   :  { %7118 = vmatpush3.bf16.msra.mxu1 %v7725_v63  ;;  %7127 = vmatprep.mubr.msk.bf16.mxu1 %vm7746_vm1, %v9985_v2 }
 0x4c3   :  { %7086 = vmatmul.mubr.msk.bf16.vlgmr.msra.gmra.mrb[56].mxu0 %vm4670_vm5, %v4639_v0  ;;  %7119 = vmatprep.subr.bf16.mxu1 %v9985_v2 }
 0x4c4   :  { %7104 = vmatpush3.bf16.msra.mxu0 %v7726_v13  ;;  %7113 = vmatprep.mubr.msk.bf16.mxu0 %vm7746_vm1, %v9985_v2 }
 0x4c5   :  { %7105 = vmatprep.subr.bf16.mxu0 %v9985_v2 }
 0x4c6   :  { %7120 = vmatpush3.bf16.msra.mxu1 %v7727_v18 }
 0x4c7   :  { %7121 = vmatprep.subr.bf16.mxu1 %v9985_v2 }
 0x4c8   :  { %7106 = vmatpush3.bf16.msra.mxu0 %v7728_v31 }
 0x4c9   :  { %7107 = vmatprep.subr.bf16.mxu0 %v9985_v2 }
 0x4ca   :  { %7122 = vmatpush3.bf16.msra.mxu1 %v7729_v50 }
 0x4cb   :  { %7123 = vmatprep.subr.bf16.mxu1 %v9985_v2 }
 0x4cc   :  { %7108 = vmatpush3.bf16.msra.mxu0 %v7730_v33 }
 0x4cd   :  { %7109 = vmatprep.subr.bf16.mxu0 %v9985_v2 }
 0x4ce   :  { %7124 = vmatpush3.bf16.msra.mxu1 %v7731_v36 }
 0x4cf   :  { %7125 = vmatprep.subr.bf16.mxu1 %v9985_v2 }
 0x4d0   :  { %7110 = vmatpush3.bf16.msra.mxu0 %v7732_v5 }
 0x4d1   :  { %7111 = vmatprep.subr.bf16.mxu0 %v9985_v2 }
 0x4d2   :  { %7126 = vmatpush3.bf16.msra.mxu1 %v7733_v51 }
 0x4d4   :  { %7112 = vmatpush3.bf16.msra.mxu0 %v7734_v37 }
 0x4d5   :  { %7128 = vmatmul.mubr.msk.bf16.vlgmr.msra.gmra.mrb[64].mxu1 %vm4670_vm5, %v4884_v57  ;;  %7131 = vmatprep.subr.bf16.mxu0 %v9985_v2 }
 0x4d7   :  { %7114 = vmatmul.mubr.msk.bf16.vlgmr.msra.gmra.mrb[60].mxu0 %vm4670_vm5, %v4616_v16 }
 0x4d8   :  { %7139 = vmatprep.mubr.msk.bf16.mxu0 %vm7746_vm1, %v9985_v2  ;;  %7132 = vmatpush3.bf16.msra.mxu0 %v7735_v55 }
 0x4d9   :  { %7133 = vmatprep.subr.bf16.mxu0 %v9985_v2 }
 0x4dc   :  { %7134 = vmatpush3.bf16.msra.mxu0 %v7736_v60 }
 0x4dd   :  { %7135 = vmatprep.subr.bf16.mxu0 %v9985_v2 }
 0x4e0   :  { %7136 = vmatpush3.bf16.msra.mxu0 %v7737_v61 }
 0x4e1   :  { %7137 = vmatprep.subr.bf16.mxu0 %v9985_v2 }
 0x4e4   :  { %7138 = vmatpush3.bf16.msra.mxu0 %v5010_v20 }
 0x594   :  { %v4781_v8 = vpop.f32.mrb[60].mxu1 }
 0x595   :  { %v7101_v34 = vpop.f32.mrb[61].mxu1 }
 0x596   :  { %v4708_v43 = vpop.f32.mrb[56].mxu0  ;;  %v4784_v58 = vpop.f32.mrb[62].mxu1 }
 0x597   :  { %v4782_v59 = vadd.f32 %v4781_v8, %v4708_v43  ;;  %v7087_v30 = vpop.f32.mrb[57].mxu0  ;;  %v7102_v62 = vpop.f32.mrb[63].mxu1 }
 0x598   :  { %v4711_v39 = vpop.f32.mrb[58].mxu0 }
 0x599   :  { %v7088_v9 = vpop.f32.mrb[59].mxu0 }
 0x5a8   :  { %v4952_v4 = vpop.f32.mrb[64].mxu1 }
 0x5a9   :  { %v7129_v21 = vpop.f32.mrb[65].mxu1 }
 0x5aa   :  { %v4865_v22 = vpop.f32.mrb[60].mxu0  ;;  %v4955_v2 = vpop.f32.mrb[66].mxu1 }
 0x5ab   :  { %v4871_v26 = vadd.f32 %v4865_v22, %v4782_v59  ;;  %v7115_v29 = vpop.f32.mrb[61].mxu0  ;;  %v7130_v32 = vpop.f32.mrb[67].mxu1 }
 0x5ac   :  { %v4868_v48 = vpop.f32.mrb[62].mxu0 }
 0x5ad   :  { %v4958_v24 = vadd.f32 %v4952_v4, %v4871_v26  ;;  %v7116_v35 = vpop.f32.mrb[63].mxu0 }
 0x5af   :  { %v4966_v56 = vadd.f32 %v5599_v49, %v4958_v24 }
 0x5b1   :  { %v4967_v45 = vmax.f32 %v4966_v56, 0.0 }
 0x5b3   :  { %v4968_v53 = vpack.c.bf16 %v4967_v45, %v4967_v45 }
 0x5b5   :  { %7140 = vmatmul.mubr.msk.bf16.vlgmr.msra.gmra.mrb[64].mxu0 %vm5004_vm7, %v4968_v53 }
 0x688   :  { %v5046_v38 = vpop.f32.mrb[64].mxu0 }
 0x689   :  { %v5047_v11 = vadd.f32 %v5600_v10, %v5046_v38  ;;  %v7141_v44 = vpop.f32.mrb[65].mxu0 }
 0x68a   :  { %v5049_v47 = vpop.f32.mrb[66].mxu0 }
 0x68b   :  { %v7142_v1 = vpop.f32.mrb[67].mxu0  ;;  %v5053_v6 = vsel %vm5052_vm8, %v5047_v11, -inf }
 0x68c   :  { %5054 = vmax.xlane.f32.xlu0 %v5053_v6 }
 0x719   :  { %v5055_v19 = vpop.xlane.xlu0 %5054 }
 0x71a   :  { %v5056_v23 = vsub.f32 %v5047_v11, %v5055_v19 }
 0x71c   :  { %v5057_v25 = vmul.f32 1.442695, %v5056_v23 }
 0x71e   :  { %7739 = vpow2.f32 %v5057_v25 }
 0x728   :  { %v7740_v28 = vpop.eup %7739 }
 0x729   :  { %v5059_v42 = vsel %vm5052_vm8, %v7740_v28, 0.0 }
 0x72a   :  { %5060 = vadd.xlane.f32.xlu0 %v5059_v42 }
 0x7b7   :  { %v5061_v46 = vpop.xlane.xlu0 %5060 }
 0x7b8   :  { %7741 = vlog2.f32 %v5061_v46 }
 0x7c2   :  { %v7742_v52 = vpop.eup %7741 }
 0x7c3   :  { %v5063_v54 = vmul.f32 0.6931472, %v7742_v52 }
 0x7c5   :  { %v5064_v12 = vsub.f32 %v5056_v23, %v5063_v54 }
 0x7c7   :  { %5065 = vst.msk [vmem:[%s9844_s9] sm:$0xff] %vm5052_vm8, %v5064_v12 }

</bundles_post_ra>
